<compile_context>
chip_gen: v7x
topology: tpu7x:2x2x1
jax: 0.10.0
libtpu: 0.0.40
codegen_flags: <defaults>
</compile_context>

<pallas_src>
import functools

import jax
import jax.numpy as jnp
from jax.experimental import pallas as pl
from jax.experimental.pallas import tpu as pltpu

_EPS = 1e-12  # torch.nn.functional.normalize eps


def _vq_kernel(x_ref, wnt_ref, whi_ref, wlo_ref,        # inputs
               q_ref, idx_ref, ploss_ref,                # outputs (resident over K)
               xn_ref, best_ref,                         # VMEM scratch carries
               *, tile_k, k_valid, n_valid, mask_cols, mask_rows):
    i = pl.program_id(0)          # row-tile index (parallel)
    k = pl.program_id(1)          # codebook-block index (arbitrary / carried)
    last_k = pl.num_programs(1) - 1
    tn, dp = xn_ref.shape

    # ---- per-row-tile init: normalize x exactly once per row tile ----------
    # F.normalize(x, p=2, dim=-1) == x / clamp_min(||x||, eps).  Exact
    # sqrt+divide kept (pl.reciprocal(approx=True) would perturb the bf16
    # ranking / 1e-5 tolerances for no measurable win at this size).
    @pl.when(k == 0)
    def _():
        x = x_ref[...].astype(jnp.float32)
        xn_ref[...] = x / jnp.maximum(
            jnp.sqrt(jnp.sum(x * x, axis=-1, keepdims=True)), _EPS)

    xn = xn_ref[...]                                          # (TN, Dp) f32

    # ---- cosine similarity against this codebook block (bf16 MXU) ----------
    sim = jnp.dot(xn.astype(jnp.bfloat16), wnt_ref[...],
                  preferred_element_type=jnp.float32)         # (TN, TK)
    col = jax.lax.broadcasted_iota(jnp.int32, (tn, tile_k), 1)
    if mask_cols:   # padded codebook columns must never win
        sim = jnp.where(col + k * tile_k < k_valid, sim, -jnp.inf)

    # ---- block-local argmax (first occurrence on ties, like torch) ---------
    blk_max = jnp.max(sim, axis=-1, keepdims=True)            # (TN, 1)
    local_idx = jnp.min(jnp.where(sim == blk_max, col, tile_k),
                        axis=-1, keepdims=True)
    # NaN-row guard: all-NaN rows keep an in-range index (block 0, last col);
    # torch.argmin would surface the NaN position instead (documented edge case).
    local_idx = jnp.minimum(local_idx, tile_k - 1)

    # ---- gather the block-local winners: one-hot x (hi + lo) bf16 matmuls ---
    # onehot is exactly representable in bf16, and hi + lo reconstructs the f32
    # normalized codebook to ~1e-6, so 2 bf16 MXU passes replace the f32 gather.
    onehot = (col == local_idx).astype(jnp.bfloat16)          # (TN, TK)
    q_blk = (jnp.dot(onehot, whi_ref[...], preferred_element_type=jnp.float32)
             + jnp.dot(onehot, wlo_ref[...], preferred_element_type=jnp.float32))

    # ---- running (best_sim, best_idx, best_q) carry across K blocks --------
    # Strict '>' so an earlier block wins exact ties (torch first-occurrence);
    # the resident q/idx output blocks double as the carry (no extra scratch).
    better = (blk_max > best_ref[...]) | (k == 0)
    best_ref[...] = jnp.where(better, blk_max, best_ref[...])
    idx_ref[...] = jnp.where(better, local_idx + k * tile_k, idx_ref[...])
    q_ref[...] = jnp.where(better, q_blk,
                           q_ref[...].astype(jnp.float32)).astype(q_ref.dtype)

    # ---- finalize: lane-shaped partial loss row (scalar reduce in wrapper) --
    @pl.when(k == last_k)
    def _():
        diff = q_ref[...].astype(jnp.float32) - xn
        if mask_rows:   # padded rows must not contribute to the loss
            row = jax.lax.broadcasted_iota(jnp.int32, (tn, 1), 0)
            diff = jnp.where(row + i * tn < n_valid, diff, 0.0)
        ploss_ref[...] = jnp.sum(diff * diff, axis=0, keepdims=True)[None]


def _round_up(a, b):
    return (a + b - 1) // b * b


def vector_quantize(x, embeddings, commitment_cost, *, tile_n=512, max_tile_k=512):
    """x: (N, D) float32, embeddings: (K, D) float32.

    Returns (quantized (N, D) f32, loss scalar, indices (N,) int32).
    """
    n, d = x.shape
    k, dk = embeddings.shape
    assert d == dk

    # Lane-dense tiles: pad D to a multiple of 128 (zeros do not change the
    # norms, the contraction, the gather, or the loss; sliced off on return).
    d_pad = _round_up(d, 128)

    # Keep tile_n large (256-512) for any N: pad N instead of shrinking the
    # tile, and keep >= 2 row tiles when possible (feeds both v7x TensorCores).
    tile_n = max(8, min(tile_n, _round_up(pl.cdiv(n, 2), 8)))
    n_pad = _round_up(n, tile_n)
    n_tiles = n_pad // tile_n

    # K blocking: whole codebook resident when small, else 512-wide blocks with
    # a running argmax carry (keeps VMEM flat in K).
    if k <= max_tile_k:
        tile_k, k_pad = k, k
    else:
        tile_k = max_tile_k                      # multiple of 128
        k_pad = _round_up(k, tile_k)
    k_tiles = k_pad // tile_k

    # ---- grid-invariant codebook preprocessing (hoisted, done once) --------
    emb = embeddings.astype(jnp.float32)
    if k_pad != k or d_pad != d:
        emb = jnp.pad(emb, ((0, k_pad - k), (0, d_pad - d)))
    wn = emb / jnp.maximum(
        jnp.sqrt(jnp.sum(emb * emb, axis=-1, keepdims=True)), _EPS)   # (Kp, Dp)
    w_hi = wn.astype(jnp.bfloat16)                                    # (Kp, Dp)
    w_lo = (wn - w_hi.astype(jnp.float32)).astype(jnp.bfloat16)       # residual
    wn_t = w_hi.T                                                     # (Dp, Kp)

    xp = x.astype(jnp.float32)
    if n_pad != n or d_pad != d:
        xp = jnp.pad(xp, ((0, n_pad - n), (0, d_pad - d)))

    # ---- per-generation VMEM limit: ~0.75x physical capacity ----------------
    # (~96 MiB on v5e/v6e's 128 MiB, ~48 MiB on v7x's 64 MiB.)
    try:
        vmem_cap = int(pltpu.get_tpu_info().vmem_capacity_bytes)
    except Exception:
        vmem_cap = 64 * 2**20
    vmem_limit = max(32 * 2**20, int(0.75 * vmem_cap))

    kernel = functools.partial(
        _vq_kernel, tile_k=tile_k, k_valid=k, n_valid=n,
        mask_cols=(k_pad != k), mask_rows=(n_pad != n))

    # TODO(synk): when k_tiles == 1 the codebook blocks are grid-invariant and
    # could be single-buffered (pipeline_mode=pl.Buffered(1)) to halve their
    # resident VMEM; left double-buffered here for lowering portability.
    quantized, idx2d, loss_parts = pl.pallas_call(
        kernel,
        out_shape=(
            jax.ShapeDtypeStruct((n_pad, d_pad), jnp.float32),    # quantized
            jax.ShapeDtypeStruct((n_pad, 1), jnp.int32),          # indices
            jax.ShapeDtypeStruct((n_tiles, 1, d_pad), jnp.float32),  # partial loss
        ),
        grid_spec=pltpu.PrefetchScalarGridSpec(
            num_scalar_prefetch=0,
            grid=(n_tiles, k_tiles),
            in_specs=[
                pl.BlockSpec((tile_n, d_pad), lambda i, kk: (i, 0)),   # x tile
                pl.BlockSpec((d_pad, tile_k), lambda i, kk: (0, kk)),  # wn^T (bf16)
                pl.BlockSpec((tile_k, d_pad), lambda i, kk: (kk, 0)),  # wn hi (bf16)
                pl.BlockSpec((tile_k, d_pad), lambda i, kk: (kk, 0)),  # wn lo (bf16)
            ],
            out_specs=[
                pl.BlockSpec((tile_n, d_pad), lambda i, kk: (i, 0)),
                pl.BlockSpec((tile_n, 1), lambda i, kk: (i, 0)),
                pl.BlockSpec((1, 1, d_pad), lambda i, kk: (i, 0, 0)),
            ],
            scratch_shapes=[
                pltpu.VMEM((tile_n, d_pad), jnp.float32),   # xn (per row tile)
                pltpu.VMEM((tile_n, 1), jnp.float32),       # running best similarity
            ],
        ),
        compiler_params=pltpu.CompilerParams(
            # Row axis carries no cross-step state -> splittable across v7x's
            # two TensorCores; K axis carries the argmax -> arbitrary.
            dimension_semantics=("parallel", "arbitrary"),
            vmem_limit_bytes=vmem_limit,
        ),
    )(xp, wn_t, w_hi, w_lo)

    # TODO(synk): PyTorch returns int64 indices; int32 is emitted (OK for K < 2^31).
    # TODO(synk): forward values only -- the straight-through estimator and the
    # split q-latent/commitment gradients need a custom_vjp for training.
    loss = jnp.sum(loss_parts) * ((1.0 + float(commitment_cost)) / float(n * d))
    return quantized[:n, :d], loss, idx2d[:n, 0]


def _reference(x, embeddings, commitment_cost):
    """Pure-JAX mirror of the PyTorch forward (all-f32)."""
    xn = x / jnp.maximum(jnp.sqrt(jnp.sum(x * x, axis=-1, keepdims=True)), _EPS)
    wn = embeddings / jnp.maximum(
        jnp.sqrt(jnp.sum(embeddings * embeddings, axis=-1, keepdims=True)), _EPS)
    dist = (jnp.sum(xn ** 2, axis=-1, keepdims=True)
            + jnp.sum(wn ** 2, axis=-1)[None, :]
            - 2.0 * xn @ wn.T)
    idx = jnp.argmin(dist, axis=1)
    q = wn[idx]
    loss = (1.0 + commitment_cost) * jnp.mean((q - xn) ** 2)
    return xn, wn, dist, idx, q, loss


if __name__ == "__main__":
    embedding_dim = 32
    num_embeddings = 64
    commitment_cost = 0.25

    key = jax.random.PRNGKey(0)
    kx, kw = jax.random.split(key)
    # Typical VQ-VAE usage: (batch, H, W, D) encoder features flattened to
    # (N, D) tokens before quantization (the module's argmin(dim=1) expects 2-D).
    feat = jax.random.normal(kx, (2, 16, 16, embedding_dim), dtype=jnp.float32)
    x = feat.reshape(-1, embedding_dim)                      # (512, 32)
    # nn.Embedding default init: N(0, 1)
    embeddings = jax.random.normal(
        kw, (num_embeddings, embedding_dim), dtype=jnp.float32)

    quantized, loss, indices = vector_quantize(x, embeddings, commitment_cost)
    jax.block_until_ready((quantized, loss, indices))

    # ---- validate against the pure-JAX (f32) mirror of the PyTorch forward ----
    xn_ref, wn_ref, dist_ref, idx_ref, q_ref, loss_ref = _reference(
        x, embeddings, commitment_cost)

    n = x.shape[0]
    rows = jnp.arange(n)
    # The bf16 similarity matmul may pick the other code on genuine near-ties;
    # any disagreement must be rare and confined to tiny f32 distance gaps.
    mismatch = indices != idx_ref.astype(jnp.int32)
    n_mis = int(jnp.sum(mismatch))
    assert n_mis <= max(4, n // 10), f"too many index mismatches: {n_mis}"
    if n_mis:
        gap = jnp.abs(dist_ref[rows, indices] - dist_ref[rows, idx_ref])
        max_gap = float(jnp.max(jnp.where(mismatch, gap, 0.0)))
        assert max_gap < 2e-2, f"index mismatch beyond near-tie tolerance: {max_gap}"
    # Quantized rows must be the normalized codebook entries for the chosen ids
    # (hi/lo bf16 reconstruction is exact to ~1e-6).
    assert jnp.allclose(quantized, wn_ref[indices], atol=1e-5, rtol=1e-5), \
        "quantized mismatch"
    # Loss must equal (1 + commitment_cost) * mse(q, xn) for the chosen ids
    # (tolerance covers the ~1e-6 hi/lo codebook reconstruction error) ...
    loss_idx = (1.0 + commitment_cost) * jnp.mean((wn_ref[indices] - xn_ref) ** 2)
    assert jnp.allclose(loss, loss_idx, atol=1e-5, rtol=1e-4), "loss mismatch"
    # ... and stay (near-tie) close to the full-f32 reference loss.
    assert jnp.allclose(loss, loss_ref, atol=1e-4, rtol=1e-3), "loss far from reference"

    print("KERNEL_OK")
</pallas_src>

<mosaic_0001>
module attributes {stable_mosaic.version = 11 : i64} {
  func.func @_vq_kernel(%arg0: i32, %arg1: i32, %arg2: memref<256x128xf32, #tpu.memory_space<vmem>>, %arg3: memref<128x64xbf16, #tpu.memory_space<vmem>>, %arg4: memref<64x128xbf16, #tpu.memory_space<vmem>>, %arg5: memref<64x128xbf16, #tpu.memory_space<vmem>>, %arg6: memref<256x128xf32, #tpu.memory_space<vmem>>, %arg7: memref<256x1xi32, #tpu.memory_space<vmem>>, %arg8: memref<1x1x128xf32, #tpu.memory_space<vmem>>, %arg9: memref<256x128xf32, #tpu.memory_space<vmem>>, %arg10: memref<256x1xf32, #tpu.memory_space<vmem>>) attributes {dimension_semantics = [#tpu.dimension_semantics<parallel>, #tpu.dimension_semantics<arbitrary>], iteration_bounds = array<i64: 2, 1>, scalar_prefetch = 0 : i64, scratch_operands = 2 : i64, tpu.core_type = #tpu.core_type<tc>, window_params = [{transform_indices = @transform_0, window_bounds = array<i64: 256, 128>}, {transform_indices = @transform_1, window_bounds = array<i64: 128, 64>}, {transform_indices = @transform_2, window_bounds = array<i64: 64, 128>}, {transform_indices = @transform_3, window_bounds = array<i64: 64, 128>}, {transform_indices = @transform_4, window_bounds = array<i64: 256, 128>}, {transform_indices = @transform_5, window_bounds = array<i64: 256, 1>}, {transform_indices = @transform_6, window_bounds = array<i64: 1, 1, 128>}]} {
    %c0_i32 = arith.constant 0 : i32
    %0 = arith.cmpi eq, %arg1, %c0_i32 : i32
    %1 = arith.extui %0 : i1 to i32
    %c0_i32_0 = arith.constant 0 : i32
    %2 = arith.cmpi ne, %1, %c0_i32_0 : i32
    scf.if %2 {
      %c0_30 = arith.constant 0 : index
      %c0_31 = arith.constant 0 : index
      %50 = vector.load %arg2[%c0_30, %c0_31] : memref<256x128xf32, #tpu.memory_space<vmem>>, vector<256x128xf32>
      %51 = arith.mulf %50, %50 : vector<256x128xf32>
      %cst_32 = arith.constant dense<0.000000e+00> : vector<256xf32>
      %52 = vector.multi_reduction <add>, %51, %cst_32 [1] : vector<256x128xf32> to vector<256xf32>
      %53 = vector.shape_cast %52 : vector<256xf32> to vector<256x1xf32>
      %54 = math.sqrt %53 : vector<256x1xf32>
      %cst_33 = arith.constant 9.99999996E-13 : f32
      %55 = vector.broadcast %cst_33 : f32 to vector<256x1xf32>
      %56 = arith.maximumf %54, %55 : vector<256x1xf32>
      %57 = vector.broadcast %56 : vector<256x1xf32> to vector<256x128xf32>
      %58 = arith.divf %50, %57 : vector<256x128xf32>
      %c0_34 = arith.constant 0 : index
      %c0_35 = arith.constant 0 : index
      %59 = vector.load %arg9[%c0_34, %c0_35] : memref<256x128xf32, #tpu.memory_space<vmem>>, vector<256x128xf32>
      tpu.vector_store %arg9[%c0_34, %c0_35], %58 {strides = array<i32>} : memref<256x128xf32, #tpu.memory_space<vmem>>, vector<256x128xf32>,
    } else {
    }
    %c0 = arith.constant 0 : index
    %c0_1 = arith.constant 0 : index
    %3 = vector.load %arg9[%c0, %c0_1] : memref<256x128xf32, #tpu.memory_space<vmem>>, vector<256x128xf32>
    %4 = arith.truncf %3 : vector<256x128xf32> to vector<256x128xbf16>
    %c0_2 = arith.constant 0 : index
    %c0_3 = arith.constant 0 : index
    %5 = vector.load %arg3[%c0_2, %c0_3] : memref<128x64xbf16, #tpu.memory_space<vmem>>, vector<128x64xbf16>
    %cst = arith.constant dense<0.000000e+00> : vector<256x64xf32>
    %6 = tpu.matmul %4, %5, %cst {dimension_numbers = #tpu.dot_dimension_numbers<[1], [0], [0], [1], [0, 0, 1, 1], [], []>} : vector<256x128xbf16>, vector<128x64xbf16>, vector<256x64xf32> -> vector<256x64xf32>
    %7 = tpu.iota {dimensions = array<i32: 1>} : vector<256x64xi32>
    %cst_4 = arith.constant dense<0xFF800000> : vector<256xf32>
    %8 = vector.multi_reduction <maximumf>, %6, %cst_4 [1] : vector<256x64xf32> to vector<256xf32>
    %9 = vector.shape_cast %8 : vector<256xf32> to vector<256x1xf32>
    %10 = vector.broadcast %9 : vector<256x1xf32> to vector<256x64xf32>
    %11 = arith.cmpf oeq, %6, %10 : vector<256x64xf32>
    %c64_i32 = arith.constant 64 : i32
    %12 = vector.broadcast %c64_i32 : i32 to vector<256x64xi32>
    %13 = arith.select %11, %7, %12 : vector<256x64xi1>, vector<256x64xi32>
    %cst_5 = arith.constant dense<2147483647> : vector<256xi32>
    %14 = vector.multi_reduction <minsi>, %13, %cst_5 [1] : vector<256x64xi32> to vector<256xi32>
    %15 = vector.shape_cast %14 : vector<256xi32> to vector<256x1xi32>
    %c63_i32 = arith.constant 63 : i32
    %16 = vector.broadcast %c63_i32 : i32 to vector<256x1xi32>
    %17 = arith.minsi %15, %16 : vector<256x1xi32>
    %18 = vector.broadcast %17 : vector<256x1xi32> to vector<256x64xi32>
    %19 = arith.cmpi eq, %7, %18 : vector<256x64xi32>
    %20 = arith.extui %19 : vector<256x64xi1> to vector<256x64xi32>
    %21 = arith.sitofp %20 : vector<256x64xi32> to vector<256x64xf32>
    %22 = arith.truncf %21 : vector<256x64xf32> to vector<256x64xbf16>
    %c0_6 = arith.constant 0 : index
    %c0_7 = arith.constant 0 : index
    %23 = vector.load %arg4[%c0_6, %c0_7] : memref<64x128xbf16, #tpu.memory_space<vmem>>, vector<64x128xbf16>
    %cst_8 = arith.constant dense<0.000000e+00> : vector<256x128xf32>
    %24 = tpu.matmul %22, %23, %cst_8 {dimension_numbers = #tpu.dot_dimension_numbers<[1], [0], [0], [1], [0, 0, 1, 1], [], []>} : vector<256x64xbf16>, vector<64x128xbf16>, vector<256x128xf32> -> vector<256x128xf32>
    %c0_9 = arith.constant 0 : index
    %c0_10 = arith.constant 0 : index
    %25 = vector.load %arg5[%c0_9, %c0_10] : memref<64x128xbf16, #tpu.memory_space<vmem>>, vector<64x128xbf16>
    %cst_11 = arith.constant dense<0.000000e+00> : vector<256x128xf32>
    %26 = tpu.matmul %22, %25, %cst_11 {dimension_numbers = #tpu.dot_dimension_numbers<[1], [0], [0], [1], [0, 0, 1, 1], [], []>} : vector<256x64xbf16>, vector<64x128xbf16>, vector<256x128xf32> -> vector<256x128xf32>
    %27 = arith.addf %24, %26 : vector<256x128xf32>
    %c0_12 = arith.constant 0 : index
    %c0_13 = arith.constant 0 : index
    %28 = vector.load %arg10[%c0_12, %c0_13] : memref<256x1xf32, #tpu.memory_space<vmem>>, vector<256x1xf32>
    %29 = arith.cmpf ogt, %9, %28 : vector<256x1xf32>
    %c0_i32_14 = arith.constant 0 : i32
    %30 = arith.cmpi eq, %arg1, %c0_i32_14 : i32
    %31 = vector.broadcast %30 : i1 to vector<256x1xi1>
    %32 = arith.ori %29, %31 : vector<256x1xi1>
    %c0_15 = arith.constant 0 : index
    %c0_16 = arith.constant 0 : index
    %33 = vector.load %arg10[%c0_15, %c0_16] : memref<256x1xf32, #tpu.memory_space<vmem>>, vector<256x1xf32>
    %34 = arith.select %32, %9, %33 : vector<256x1xi1>, vector<256x1xf32>
    %c0_17 = arith.constant 0 : index
    %c0_18 = arith.constant 0 : index
    %35 = vector.load %arg10[%c0_17, %c0_18] : memref<256x1xf32, #tpu.memory_space<vmem>>, vector<256x1xf32>
    tpu.vector_store %arg10[%c0_17, %c0_18], %34 {strides = array<i32>} : memref<256x1xf32, #tpu.memory_space<vmem>>, vector<256x1xf32>,
    %c64_i32_19 = arith.constant 64 : i32
    %36 = arith.muli %arg1, %c64_i32_19 : i32
    %37 = vector.broadcast %36 : i32 to vector<256x1xi32>
    %38 = arith.addi %17, %37 : vector<256x1xi32>
    %c0_20 = arith.constant 0 : index
    %c0_21 = arith.constant 0 : index
    %39 = vector.load %arg7[%c0_20, %c0_21] : memref<256x1xi32, #tpu.memory_space<vmem>>, vector<256x1xi32>
    %40 = arith.select %32, %38, %39 : vector<256x1xi1>, vector<256x1xi32>
    %c0_22 = arith.constant 0 : index
    %c0_23 = arith.constant 0 : index
    %41 = vector.load %arg7[%c0_22, %c0_23] : memref<256x1xi32, #tpu.memory_space<vmem>>, vector<256x1xi32>
    tpu.vector_store %arg7[%c0_22, %c0_23], %40 {strides = array<i32>} : memref<256x1xi32, #tpu.memory_space<vmem>>, vector<256x1xi32>,
    %c0_24 = arith.constant 0 : index
    %c0_25 = arith.constant 0 : index
    %42 = vector.load %arg6[%c0_24, %c0_25] : memref<256x128xf32, #tpu.memory_space<vmem>>, vector<256x128xf32>
    %43 = vector.shape_cast %32 : vector<256x1xi1> to vector<256x1xi1>
    %44 = vector.broadcast %43 : vector<256x1xi1> to vector<256x128xi1>
    %45 = arith.select %44, %27, %42 : vector<256x128xi1>, vector<256x128xf32>
    %c0_26 = arith.constant 0 : index
    %c0_27 = arith.constant 0 : index
    %46 = vector.load %arg6[%c0_26, %c0_27] : memref<256x128xf32, #tpu.memory_space<vmem>>, vector<256x128xf32>
    tpu.vector_store %arg6[%c0_26, %c0_27], %45 {strides = array<i32>} : memref<256x128xf32, #tpu.memory_space<vmem>>, vector<256x128xf32>,
    %c0_i32_28 = arith.constant 0 : i32
    %47 = arith.cmpi eq, %arg1, %c0_i32_28 : i32
    %48 = arith.extui %47 : i1 to i32
    %c0_i32_29 = arith.constant 0 : i32
    %49 = arith.cmpi ne, %48, %c0_i32_29 : i32
    scf.if %49 {
      %c0_30 = arith.constant 0 : index
      %c0_31 = arith.constant 0 : index
      %50 = vector.load %arg6[%c0_30, %c0_31] : memref<256x128xf32, #tpu.memory_space<vmem>>, vector<256x128xf32>
      %51 = arith.subf %50, %3 : vector<256x128xf32>
      %52 = arith.mulf %51, %51 : vector<256x128xf32>
      %cst_32 = arith.constant dense<0.000000e+00> : vector<128xf32>
      %53 = vector.multi_reduction <add>, %52, %cst_32 [0] : vector<256x128xf32> to vector<128xf32>
      %54 = vector.shape_cast %53 : vector<128xf32> to vector<1x128xf32>
      %55 = vector.shape_cast %54 : vector<1x128xf32> to vector<1x1x128xf32>
      %c0_33 = arith.constant 0 : index
      %c0_34 = arith.constant 0 : index
      %c0_35 = arith.constant 0 : index
      %56 = vector.load %arg8[%c0_33, %c0_34, %c0_35] : memref<1x1x128xf32, #tpu.memory_space<vmem>>, vector<1x1x128xf32>
      tpu.vector_store %arg8[%c0_33, %c0_34, %c0_35], %55 {strides = array<i32>} : memref<1x1x128xf32, #tpu.memory_space<vmem>>, vector<1x1x128xf32>,
    } else {
    }
    return
  }
  func.func @transform_0(%arg0: i32, %arg1: i32) -> (i32, i32) {
    %c0_i32 = arith.constant 0 : i32
    %c0_i32_0 = arith.constant 0 : i32
    return %arg0, %c0_i32 : i32, i32
  }
  func.func @transform_1(%arg0: i32, %arg1: i32) -> (i32, i32) {
    %c0_i32 = arith.constant 0 : i32
    %c0_i32_0 = arith.constant 0 : i32
    return %c0_i32, %arg1 : i32, i32
  }
  func.func @transform_2(%arg0: i32, %arg1: i32) -> (i32, i32) {
    %c0_i32 = arith.constant 0 : i32
    %c0_i32_0 = arith.constant 0 : i32
    return %arg1, %c0_i32 : i32, i32
  }
  func.func @transform_3(%arg0: i32, %arg1: i32) -> (i32, i32) {
    %c0_i32 = arith.constant 0 : i32
    %c0_i32_0 = arith.constant 0 : i32
    return %arg1, %c0_i32 : i32, i32
  }
  func.func @transform_4(%arg0: i32, %arg1: i32) -> (i32, i32) {
    %c0_i32 = arith.constant 0 : i32
    %c0_i32_0 = arith.constant 0 : i32
    return %arg0, %c0_i32 : i32, i32
  }
  func.func @transform_5(%arg0: i32, %arg1: i32) -> (i32, i32) {
    %c0_i32 = arith.constant 0 : i32
    %c0_i32_0 = arith.constant 0 : i32
    return %arg0, %c0_i32 : i32, i32
  }
  func.func @transform_6(%arg0: i32, %arg1: i32) -> (i32, i32, i32) {
    %c0_i32 = arith.constant 0 : i32
    %c0_i32_0 = arith.constant 0 : i32
    %c0_i32_1 = arith.constant 0 : i32
    return %arg0, %c0_i32, %c0_i32_0 : i32, i32, i32
  }
}

</mosaic_0001>

<bundles_post_ra>
// kernel: tpu_custom_call.1
= control target key start
LH: loop header
LB: loop body
LE: loop exit
PB: predicated region body
PF: predicated region fallthrough
CT: control target
= control target key end

     0   :  { %12 = vsyncpa [#allocation5], 0  ;;  %s6032_s0 = inlined_call_operand.hbm [shape: f32[512,128], index: 0, kind: input, shape index: {}]   ;;  %s6033_s1 = inlined_call_operand.vmem [shape: bf16[128,64], index: 1, kind: input, shape index: {}]   ;;  %s6034_s2 = inlined_call_operand.vmem [shape: bf16[64,128], index: 2, kind: input, shape index: {}]   ;;  %s6035_s3 = inlined_call_operand.vmem [shape: bf16[64,128], index: 3, kind: input, shape index: {}]   ;;  %s6036_s4 = inlined_call_operand.hbm [shape: f32[512,128], index: 4, kind: output, shape index: {0}]   ;;  %s6037_s5 = inlined_call_operand.vmem [shape: s32[512,1], index: 5, kind: output, shape index: {1}]   ;;  %s6038_s6 = inlined_call_operand.hbm [shape: f32[2,1,128], index: 6, kind: output, shape index: {2}]  }
   0x1   :  { %14 = vsyncpa [#allocation5 + $0x1], 0 }
   0x2   :  { %15 = vsyncpa [#allocation6], 0 }
   0x3   :  { %17 = vsyncpa [#allocation6 + $0x1], 0 }
   0x4   :  { %18 = vsyncpa [#allocation9], 0 }
   0x5   :  { %20 = vsyncpa [#allocation9 + $0x1], 0  ;;  %s4031_s21 = smov 0   ;;  %s4033_s22 = smov 0  }
   0x6   :  { %s4035_s23 = smov 0   ;;  %s4037_s24 = smov 0  }
   0x7   :  { %s4039_s25 = smov 0   ;;  %s4041_s26 = smov 0  }
   0x8 LB: > { %s3285_s27 = sadd.s32 4294967295, %s3984_s26   ;;  %s3286_s28 = sadd.s32 4294967294, %s3984_s26   ;;  %s3984_s26 = sphi %s4041_s26, %s26_s26   ;;  %s3980_s25 = sphi %s4039_s25, %s6207_s25   ;;  %s3976_s24 = sphi %s4037_s24, %s6206_s24   ;;  %s3972_s23 = sphi %s4035_s23, %s6205_s23   ;;  %s3968_s22 = sphi %s4033_s22, %s6204_s22   ;;  %s3964_s21 = sphi %s4031_s21, %s6203_s21  }
   0x9   : > { %s38_s29 = sadd.s32 1, %s3980_s25  ;;  %s45_s30 = sadd.s32 1, %s3972_s23 }
   0xa   : > { %p40_p0 = scmp.ge.s32.totalorder %s38_s29, 2  ;;  %p52_p1 = scmp.ne.s32.totalorder %s3972_s23, %s3968_s22 }
   0xb   : > { %p53_p2 = scmp.eq.s32.totalorder %s3984_s26, 0  ;;  %p58_p3 = scmp.ne.s32.totalorder %s3968_s22, %s3964_s21 }
   0xc   : > { %s6209_s29 = smov (%p40_p0, %s38_s29), 0  ;;  %p59_p5 = scmp.eq.s32.totalorder %s3285_s27, 0 }
   0xd   : > { %p4072_p4 = por %p53_p2, %p52_p1  ;;  %s42_s8 = ssub.s32 %s3980_s25, %s6209_s29 }
   0xe   : > { %p160_p6 = scmp.eq.s32.totalorder %s3285_s27, 1  ;;  %p43_p7 = scmp.eq.s32.totalorder %s42_s8, 0 }
   0xf   : > { %p4078_p8 = por %p59_p5, %p58_p3  ;;  %p166_p10 = scmp.eq.s32.totalorder %s3286_s28, 1 }
  0x10   : > { %p4082_p9 = por %p160_p6, %p52_p1  ;;  %p3637_p13 = scmp.lt.s32.totalorder %s3984_s26, 2 }
  0x11   : > { %s4087_s11 = scalar_select %p43_p7, %s3972_s23, %s45_s30  }
  0x12   : > { %s6087_s10 = scalar_select %p4082_p9, 1, 0 }
  0x13   : > { %p4089_p11 = por %p166_p10, %p58_p3  ;;  %s263_s13 = sand.u32 1, %s3972_s23  }
  0x14   : > { %s3292_s14 = sshll.u32 %s263_s13, 8  ;;  %s3386_s15 = sshll.u32 %s3980_s25, 12 }
  0x15   : > { %s6088_s12 = scalar_select %p4089_p11, 1, 0 }
  0x16   : > { %s4100_s18 = scalar_lea.hbm %s6032_s0, %s3386_s15  ;;  %s267_s19 = scalar_lea.vmem [#allocation4], %s3292_s14 }
  0x17   : > { %s274_s20 = sshll.u32 %s267_s19, 4  ;;  %p4106_p0 = pnand %p3637_p13, %p4072_p4  ;;  %s4102_s20 = int_to_ptr.vmem [resolvable:$true] %s274_s20 }
  0x18   : > { %s4111_s28 = scalar_lea.sflag [#allocation5], %s263_s13  ;;  %s3840_s30 = scalar_lea.hbm %s4100_s18, 4096 }
  0x19   : > { %p3841_p2 = scmp.ne.s32.totalorder %s4100_s18, %s3840_s30  ;;  %p3842_p3 = pneg %p4106_p0 }
  0x1a   : > { %s3845_s7 = scalar_lea.hbm %s6032_s0, 8192  ;;  %p3846_p4 = scmp.lt.u32.totalorder %s4100_s18, %s6032_s0 }
  0x1b   : > { %p3843_p5 = pnand %p3842_p3, %p3841_p2  ;;  %p3847_p7 = scmp.lt.u32.totalorder %s3845_s7, %s3840_s30 }
  0x1c   : > { %p3849_p13 = scmp.lt.u32.totalorder %s3840_s30, %s4100_s18 }
  0x1d   : > { %p3844_p6 = pneg %p3843_p5  ;;  %p3848_p10 = por %p3847_p7, %p3846_p4 }
  0x1f   : > { %p3850_p12 = por %p3849_p13, %p3848_p10 }
  0x21   : > { %p3851_p1 = pnand %p3850_p12, %p3844_p6 }
  0x23   : > { %3854 = shalt.err (!%p3851_p1)
}
  0x24   : > { %s3855_s13 = scalar_lea.vmem %s4102_s20, 4096  ;;  %s3986_s17 = smov [#allocation4]  }
  0x25   : > { %p3856_p2 = scmp.ne.s32.totalorder %s4102_s20, %s3855_s13  ;;  %s3860_s19 = sshll.u32 %s3986_s17, 4  ;;  %s3861_s19 = int_to_ptr.vmem [resolvable:$false] %s3860_s19 }
  0x26   : > { %s3862_s8 = scalar_lea.vmem %s3861_s19, 8192  ;;  %p3863_p9 = scmp.lt.s32.totalorder %s4102_s20, %s3861_s19 }
  0x27   : > { %p3858_p5 = pnand %p3856_p2, %p3842_p3  ;;  %p3864_p4 = scmp.lt.s32.totalorder %s3862_s8, %s3855_s13 }
  0x29   : > { %p3859_p11 = pneg %p3858_p5  ;;  %p3865_p7 = por %p3864_p4, %p3863_p9 }
  0x2b   : > { %p3866_p10 = pnand %p3865_p7, %p3859_p11 }
  0x2d   : > { %3869 = shalt.err (!%p3866_p10)
}
  0x2e   : > { %s3987_s30 = smov 128   ;;  %s3988_s14 = smov 8  }
  0x2f   : > { %3629 = dma.hbm_to_vmem [thread:$0]  (!%p4106_p0), %s4100_s18, 4096, %s4102_s20, %s4111_s28, %s3987_s30, %s3987_s30, %s3988_s14  }
  0x30   : > { %p282_p12 = scmp.lt.s32.totalorder %s3984_s26, 3  ;;  %p6090_p1 = scmp.ge.s32.totalorder %s3984_s26, 1 }
  0x32   : > { %p283_p3 = pnand %p6090_p1, %p282_p12 }
  0x34   : > { %286 = sbr.rel (%p283_p3) target bundleno = 1326 (0x52e), region = 36 }
  0x3b   : > { %s4143_s7 = sand.u32 1, %s3968_s22  }
  0x3c   : > { %s3296_s15 = sshll.u32 %s4143_s7, 8  ;;  %s289_s16 = scalar_lea.sflag [#allocation5], %s4143_s7 }
  0x3d   : > { %s4149_s13 = scalar_lea.vmem [#allocation4], %s3296_s15 }
  0x3e   : > { %3951 = dma.done.wait (%p4078_p8), %s289_s16, 4096  }
  0x3f   : > { %3953 = vsyncadd (%p4078_p8), %s289_s16, 4294963200  ;;  %v4156_v0 = vld [vmem:[%s4149_s13 + $0x10] sm:$0xff]  ;;  %v4159_v1 = vld [vmem:[%s4149_s13] sm:$0xff]  ;;  %s3298_s27 = sshll.u32 %s3976_s24, 5  ;;  %s5796_s20 = scalar_lea.vmem [#allocation7], %s3296_s15 }
  0x40   : > { %v4162_v2 = vld [vmem:[%s4149_s13 + $0x18] sm:$0xff]  ;;  %v407_v3 = vmul.f32 %v4156_v0, %v4156_v0  ;;  %v405_v4 = vmul.f32 %v4159_v1, %v4159_v1  ;;  %v4169_v5 = vld [vmem:[%s4149_s13 + $0x8] sm:$0xff]  ;;  %v4179_v9 = vld [vmem:[%s4149_s13 + $0x20] sm:$0xff]  ;;  %p363_p8 = scmp.lt.s32.totalorder %s3298_s27, 63  ;;  %s3387_s15 = sshll.u32 %s3976_s24, 12 }
  0x41   : > { %v408_v6 = vmul.f32 %v4162_v2, %v4162_v2  ;;  %v406_v7 = vmul.f32 %v4169_v5, %v4169_v5  ;;  %v4176_v8 = vld [vmem:[%s4149_s13 + $0x28] sm:$0xff]  ;;  %v409_v11 = vmul.f32 %v4179_v9, %v4179_v9  ;;  %v4186_v12 = vld [vmem:[%s4149_s13 + $0x38] sm:$0xff]  ;;  %v4189_v13 = vld [vmem:[%s4149_s13 + $0x30] sm:$0xff]  ;;  %s5931_s17 = scalar_lea.hbm %s6036_s4, %s3387_s15  ;;  %p6195_p11 = scmp.ne.s32.totalorder %s6087_s10, 0 }
  0x42   : > { %441 = vadd.xlane.f32.xlu1 %v407_v3  ;;  %437 = vadd.xlane.f32.xlu0 %v405_v4  ;;  %v410_v10 = vmul.f32 %v4176_v8, %v4176_v8  ;;  %v4192_v14 = vld [vmem:[%s4149_s13 + $0x48] sm:$0xff]  ;;  %v4195_v15 = vld [vmem:[%s4149_s13 + $0x40] sm:$0xff]  ;;  %v412_v16 = vmul.f32 %v4186_v12, %v4186_v12  ;;  %v411_v17 = vmul.f32 %v4189_v13, %v4189_v13  ;;  %v4202_v18 = vld [vmem:[%s4149_s13 + $0x58] sm:$0xff]  ;;  %s6211_s27 = smov (!%p363_p8, %s3298_s27), 63  ;;  %s3992_s30 = smov [#allocation7]  }
  0x43   : > { %v4205_v19 = vld [vmem:[%s4149_s13 + $0x50] sm:$0xff]  ;;  %v414_v20 = vmul.f32 %v4192_v14, %v4192_v14  ;;  %v413_v21 = vmul.f32 %v4195_v15, %v4195_v15  ;;  %v4212_v22 = vld [vmem:[%s4149_s13 + $0x68] sm:$0xff]  ;;  %v4215_v23 = vld [vmem:[%s4149_s13 + $0x60] sm:$0xff]  ;;  %v416_v24 = vmul.f32 %v4202_v18, %v4202_v18  ;;  %s3299_s28 = sshll.u32 %s6211_s27, 3  ;;  %s3089_s27 = sshll.u32 %s5796_s20, 4  ;;  %s5933_s27 = int_to_ptr.vmem [resolvable:$true] %s3089_s27 }
  0x44   : > { %v415_v25 = vmul.f32 %v4205_v19, %v4205_v19  ;;  %v3696_v26 = vld [vmem:[%s6033_s1] sm:$0xff]   ;;  %v418_v27 = vmul.f32 %v4212_v22, %v4212_v22  ;;  %v417_v28 = vmul.f32 %v4215_v23, %v4215_v23  ;;  %v4229_v29 = vld [vmem:[%s4149_s13 + $0x78] sm:$0xff]  ;;  %v4232_v30 = vld [vmem:[%s4149_s13 + $0x70] sm:$0xff]  ;;  %s5482_s19 = scalar_lea.vmem %s6037_s5, %s3299_s28  ;;  %s3870_s8 = scalar_lea.vmem %s5933_s27, 4096 }
  0x45   : > { %3452 = vmatprep.subr.bf16.mxu0 %v3696_v26  ;;  %v3697_v31 = vld [vmem:[%s6033_s1 + $0x8] sm:$0xff]   ;;  %v420_v32 = vmul.f32 %v4229_v29, %v4229_v29  ;;  %v419_v33 = vmul.f32 %v4232_v30, %v4232_v30  ;;  %v4245_v35 = vld [vmem:[%s4149_s13 + $0x80] sm:$0xff]  ;;  %v3698_v36 = vld [vmem:[%s6033_s1 + $0x10] sm:$0xff]   ;;  %p3871_p9 = scmp.ne.s32.totalorder %s5933_s27, %s3870_s8  ;;  %s3874_s14 = sshll.u32 %s3992_s30, 4  ;;  %s3875_s14 = int_to_ptr.vmem [resolvable:$false] %s3874_s14 }
  0x46   : > { %443 = vadd.xlane.f32.xlu1 %v408_v6  ;;  %439 = vadd.xlane.f32.xlu0 %v406_v7  ;;  %v4242_v34 = vld [vmem:[%s4149_s13 + $0x88] sm:$0xff]  ;;  %v421_v38 = vmul.f32 %v4245_v35, %v4245_v35  ;;  %v4255_v39 = vld [vmem:[%s4149_s13 + $0x98] sm:$0xff]  ;;  %v4258_v40 = vld [vmem:[%s4149_s13 + $0x90] sm:$0xff]  ;;  %s3876_s16 = scalar_lea.vmem %s3875_s14, 8192  ;;  %p3877_p13 = scmp.lt.s32.totalorder %s5933_s27, %s3875_s14 }
  0x47   : > { %3453 = vmatpush3.bf16.msra.mxu0 %v3696_v26  ;;  %v422_v37 = vmul.f32 %v4242_v34, %v4242_v34  ;;  %v3699_v41 = vld [vmem:[%s6033_s1 + $0x18] sm:$0xff]   ;;  %v424_v42 = vmul.f32 %v4255_v39, %v4255_v39  ;;  %v423_v43 = vmul.f32 %v4258_v40, %v4258_v40  ;;  %v4268_v44 = vld [vmem:[%s4149_s13 + $0xa8] sm:$0xff]  ;;  %v4271_v45 = vld [vmem:[%s4149_s13 + $0xa0] sm:$0xff]  ;;  %p3872_p0 = pnand %p3871_p9, %p6195_p11  ;;  %p3878_p2 = scmp.lt.s32.totalorder %s3876_s16, %s3870_s8 }
  0x48   : > { %3454 = vmatprep.subr.bf16.mxu0 %v3697_v31  ;;  %v3700_v46 = vld [vmem:[%s6033_s1 + $0x20] sm:$0xff]   ;;  %v426_v47 = vmul.f32 %v4268_v44, %v4268_v44  ;;  %v425_v48 = vmul.f32 %v4271_v45, %v4271_v45  ;;  %v4281_v49 = vld [vmem:[%s4149_s13 + $0xb8] sm:$0xff]  ;;  %v4284_v50 = vld [vmem:[%s4149_s13 + $0xb0] sm:$0xff] }
  0x49   : > { %v3701_v51 = vld [vmem:[%s6033_s1 + $0x28] sm:$0xff]   ;;  %v428_v52 = vmul.f32 %v4281_v49, %v4281_v49  ;;  %v427_v53 = vmul.f32 %v4284_v50, %v4284_v50  ;;  %v4297_v55 = vld [vmem:[%s4149_s13 + $0xc0] sm:$0xff]  ;;  %v3702_v56 = vld [vmem:[%s6033_s1 + $0x30] sm:$0xff]   ;;  %p3873_p6 = pneg %p3872_p0  ;;  %p3879_p5 = por %p3878_p2, %p3877_p13 }
  0x4a   : > { %447 = vadd.xlane.f32.xlu1 %v410_v10  ;;  %445 = vadd.xlane.f32.xlu0 %v409_v11  ;;  %v4294_v54 = vld [vmem:[%s4149_s13 + $0xc8] sm:$0xff]  ;;  %v429_v58 = vmul.f32 %v4297_v55, %v4297_v55  ;;  %v4307_v59 = vld [vmem:[%s4149_s13 + $0xd8] sm:$0xff]  ;;  %v4310_v60 = vld [vmem:[%s4149_s13 + $0xd0] sm:$0xff] }
  0x4b   : > { %3455 = vmatpush3.bf16.msra.mxu0 %v3697_v31  ;;  %v430_v57 = vmul.f32 %v4294_v54, %v4294_v54  ;;  %v3703_v61 = vld [vmem:[%s6033_s1 + $0x38] sm:$0xff]   ;;  %v432_v62 = vmul.f32 %v4307_v59, %v4307_v59  ;;  %v431_v63 = vmul.f32 %v4310_v60, %v4310_v60  ;;  %v4320_v3 = vld [vmem:[%s4149_s13 + $0xe8] sm:$0xff]  ;;  %v4323_v4 = vld [vmem:[%s4149_s13 + $0xe0] sm:$0xff]  ;;  %p3880_p4 = pnand %p3879_p5, %p3873_p6 }
  0x4c   : > { %3456 = vmatprep.subr.bf16.mxu0 %v3698_v36  ;;  %v434_v6 = vmul.f32 %v4320_v3, %v4320_v3  ;;  %v433_v7 = vmul.f32 %v4323_v4, %v4323_v4  ;;  %v4330_v10 = vld [vmem:[%s4149_s13 + $0xf8] sm:$0xff]  ;;  %v4333_v11 = vld [vmem:[%s4149_s13 + $0xf0] sm:$0xff] }
  0x4d   : > { %6091 = vst [vmem:[#allocation13_spill] sm:$0xff] %v4330_v10 }
  0x4e   : > { %451 = vadd.xlane.f32.xlu1 %v412_v16  ;;  %449 = vadd.xlane.f32.xlu0 %v411_v17  ;;  %v436_v16 = vmul.f32 %v4330_v10, %v4330_v10  ;;  %v435_v17 = vmul.f32 %v4333_v11, %v4333_v11 }
  0x4f   : > { %3457 = vmatpush3.bf16.msra.mxu0 %v3698_v36 }
  0x50   : > { %3458 = vmatprep.subr.bf16.mxu0 %v3699_v41 }
  0x52   : > { %455 = vadd.xlane.f32.xlu1 %v414_v20  ;;  %453 = vadd.xlane.f32.xlu0 %v413_v21 }
  0x53   : > { %3459 = vmatpush3.bf16.msra.mxu0 %v3699_v41 }
  0x54   : > { %3460 = vmatprep.subr.bf16.mxu0 %v3700_v46 }
  0x56   : > { %459 = vadd.xlane.f32.xlu1 %v416_v24  ;;  %457 = vadd.xlane.f32.xlu0 %v415_v25 }
  0x57   : > { %3461 = vmatpush3.bf16.msra.mxu0 %v3700_v46 }
  0x58   : > { %3462 = vmatprep.subr.bf16.mxu0 %v3701_v51 }
  0x5a   : > { %463 = vadd.xlane.f32.xlu1 %v418_v27  ;;  %461 = vadd.xlane.f32.xlu0 %v417_v28 }
  0x5b   : > { %3463 = vmatpush3.bf16.msra.mxu0 %v3701_v51 }
  0x5c   : > { %3464 = vmatprep.subr.bf16.mxu0 %v3702_v56 }
  0x5e   : > { %467 = vadd.xlane.f32.xlu1 %v420_v32  ;;  %465 = vadd.xlane.f32.xlu0 %v419_v33 }
  0x5f   : > { %3465 = vmatpush3.bf16.msra.mxu0 %v3702_v56 }
  0x60   : > { %3466 = vmatprep.subr.bf16.mxu0 %v3703_v61 }
  0x62   : > { %471 = vadd.xlane.f32.xlu1 %v422_v37  ;;  %469 = vadd.xlane.f32.xlu0 %v421_v38 }
  0x63   : > { %3467 = vmatpush3.bf16.msra.mxu0 %v3703_v61 }
  0x66   : > { %475 = vadd.xlane.f32.xlu1 %v424_v42  ;;  %473 = vadd.xlane.f32.xlu0 %v423_v43 }
  0x6a   : > { %479 = vadd.xlane.f32.xlu1 %v426_v47  ;;  %477 = vadd.xlane.f32.xlu0 %v425_v48 }
  0x6e   : > { %483 = vadd.xlane.f32.xlu1 %v428_v52  ;;  %481 = vadd.xlane.f32.xlu0 %v427_v53 }
  0x72   : > { %487 = vadd.xlane.f32.xlu1 %v430_v57  ;;  %485 = vadd.xlane.f32.xlu0 %v429_v58 }
  0x76   : > { %491 = vadd.xlane.f32.xlu1 %v432_v62  ;;  %489 = vadd.xlane.f32.xlu0 %v431_v63 }
  0x7a   : > { %495 = vadd.xlane.f32.xlu1 %v434_v6  ;;  %493 = vadd.xlane.f32.xlu0 %v433_v7 }
  0x7e   : > { %499 = vadd.xlane.f32.xlu1 %v436_v16  ;;  %497 = vadd.xlane.f32.xlu0 %v435_v17 }
  0xcf   : > { %v442_v20 = vpop.xlane.xlu1 %441  ;;  %v438_v21 = vpop.xlane.xlu0 %437 }
  0xd0   : > { %3712 = vrsqrt.f32 %v442_v20  ;;  %vm517_vm0 = vcmp.eq.f32.partialorder %v442_v20, inf  ;;  %vm519_vm1 = vcmp.eq.f32.partialorder %v442_v20, 0.0  ;;  %vm503_vm2 = vcmp.eq.f32.partialorder %v438_v21, inf }
  0xd1   : > { %3714 = vrsqrt.f32 %v438_v21  ;;  %v520_v43 = vand.u32 2147483648, %v442_v20  ;;  %vm505_vm3 = vcmp.eq.f32.partialorder %v438_v21, 0.0  ;;  %v506_v52 = vand.u32 2147483648, %v438_v21 }
  0xd3   : > { %v444_v24 = vpop.xlane.xlu1 %443  ;;  %v440_v25 = vpop.xlane.xlu0 %439 }
  0xd4   : > { %3716 = vrsqrt.f32 %v444_v24  ;;  %vm524_vm4 = vcmp.eq.f32.partialorder %v444_v24, inf  ;;  %vm510_vm5 = vcmp.eq.f32.partialorder %v440_v25, inf  ;;  %v513_v57 = vand.u32 2147483648, %v440_v25 }
  0xd5   : > { %3718 = vrsqrt.f32 %v440_v25  ;;  %v527_v62 = vand.u32 2147483648, %v444_v24  ;;  %vm512_vm6 = vcmp.eq.f32.partialorder %v440_v25, 0.0  ;;  %vm526_vm7 = vcmp.eq.f32.partialorder %v444_v24, 0.0 }
  0xd7   : > { %v4339_v26 = vpop.xlane.xlu1 %447  ;;  %v446_v27 = vpop.xlane.xlu0 %445 }
  0xd8   : > { %3720 = vrsqrt.f32 %v4339_v26  ;;  %vm531_vm8 = vcmp.eq.f32.partialorder %v446_v27, inf  ;;  %vm533_vm9 = vcmp.eq.f32.partialorder %v446_v27, 0.0  ;;  %vm538_vm10 = vcmp.eq.f32.partialorder %v4339_v26, inf }
  0xd9   : > { %3722 = vrsqrt.f32 %v446_v27  ;;  %vm540_vm11 = vcmp.eq.f32.partialorder %v4339_v26, 0.0 }
  0xda   : > { %v3713_v28 = vpop.eup %3712 }
  0xdb   : > { %v3715_v31 = vpop.eup %3714  ;;  %v516_v32 = vmul.f32 %v3713_v28, %v442_v20  ;;  %v4342_v33 = vpop.xlane.xlu1 %451 }
  0xdc   : > { %v4344_v36 = vpop.xlane.xlu0 %449  ;;  %v502_v37 = vmul.f32 %v3715_v31, %v438_v21  ;;  %vm552_vm14 = vcmp.eq.f32.partialorder %v4342_v33, inf  ;;  %vm554_vm15 = vcmp.eq.f32.partialorder %v4342_v33, 0.0 }
  0xdd   : > { %3724 = vrsqrt.f32 %v4344_v36  ;;  %v518_v41 = vsel %vm517_vm0, %v442_v20, %v516_v32  ;;  %vm545_vm12 = vcmp.eq.f32.partialorder %v4344_v36, inf  ;;  %vm547_vm13 = vcmp.eq.f32.partialorder %v4344_v36, 0.0 }
  0xde   : > { %v3717_v38 = vpop.eup %3716  ;;  %v504_v46 = vsel %vm503_vm2, %v438_v21, %v502_v37  ;;  %3726 = vrsqrt.f32 %v4342_v33  ;;  %v521_v58 = vsel %vm519_vm1, %v520_v43, %v518_v41 }
  0xdf   : > { %v3719_v42 = vpop.eup %3718  ;;  %v523_v47 = vmul.f32 %v3717_v38, %v444_v24  ;;  %v4347_v48 = vpop.xlane.xlu1 %455  ;;  %v507_v6 = vsel %vm505_vm3, %v506_v52, %v504_v46  ;;  %v727_v37 = vmax.f32 %v521_v58, 1e-12 }
  0xe0   : > { %v4349_v51 = vpop.xlane.xlu0 %453  ;;  %v509_v53 = vmul.f32 %v3719_v42, %v440_v25  ;;  %v725_v20 = vmax.f32 %v507_v6, 1e-12  ;;  %v534_v42 = vand.u32 2147483648, %v446_v27  ;;  %3728 = vrsqrt.f32 %v4347_v48 }
  0xe1   : > { %v525_v56 = vsel %vm524_vm4, %v444_v24, %v523_v47  ;;  %3730 = vrsqrt.f32 %v4349_v51  ;;  %vm566_vm0 = vcmp.eq.f32.partialorder %v4347_v48, inf  ;;  %vm559_vm1 = vcmp.eq.f32.partialorder %v4349_v51, inf }
  0xe2   : > { %v3721_v61 = vpop.eup %3720  ;;  %v511_v63 = vsel %vm510_vm5, %v440_v25, %v509_v53  ;;  %v528_v32 = vsel %vm526_vm7, %v527_v62, %v525_v56  ;;  %3732 = vrcp.f32 %v727_v37  ;;  %vm568_vm3 = vcmp.eq.f32.partialorder %v4347_v48, 0.0 }
  0xe3   : > { %v3723_v7 = vpop.eup %3722  ;;  %v4354_v16 = vpop.xlane.xlu1 %459  ;;  %v514_v28 = vsel %vm512_vm6, %v513_v57, %v511_v63  ;;  %v537_v38 = vmul.f32 %v3721_v61, %v4339_v26  ;;  %v728_v46 = vmax.f32 %v528_v32, 1e-12  ;;  %3734 = vrcp.f32 %v725_v20 }
  0xe4   : > { %v4356_v17 = vpop.xlane.xlu0 %457  ;;  %v530_v31 = vmul.f32 %v3723_v7, %v446_v27  ;;  %v726_v21 = vmax.f32 %v514_v28, 1e-12  ;;  %v541_v57 = vand.u32 2147483648, %v4339_v26  ;;  %v548_v7 = vand.u32 2147483648, %v4344_v36 }
  0xe5   : > { %v539_v52 = vsel %vm538_vm10, %v4339_v26, %v537_v38  ;;  %vm580_vm2 = vcmp.eq.f32.partialorder %v4354_v16, inf  ;;  %vm561_vm4 = vcmp.eq.f32.partialorder %v4349_v51, 0.0  ;;  %vm573_vm5 = vcmp.eq.f32.partialorder %v4356_v17, inf }
  0xe6   : > { %v532_v41 = vsel %vm531_vm8, %v446_v27, %v530_v31  ;;  %3736 = vrcp.f32 %v726_v21  ;;  %v542_v62 = vsel %vm540_vm11, %v541_v57, %v539_v52  ;;  %vm582_vm11 = vcmp.eq.f32.partialorder %v4354_v16, 0.0 }
  0xe7   : > { %v3725_v25 = vpop.eup %3724  ;;  %v4361_v24 = vpop.xlane.xlu1 %463  ;;  %v535_v47 = vsel %vm533_vm9, %v534_v42, %v532_v41  ;;  %3738 = vrcp.f32 %v728_v46  ;;  %v730_v31 = vmax.f32 %v542_v62, 1e-12  ;;  %vm575_vm9 = vcmp.eq.f32.partialorder %v4356_v17, 0.0 }
  0xe8   : > { %v4363_v43 = vpop.xlane.xlu0 %461  ;;  %v544_v53 = vmul.f32 %v3725_v25, %v4344_v36  ;;  %v3727_v56 = vpop.eup %3726  ;;  %v729_v61 = vmax.f32 %v535_v47, 1e-12  ;;  %3740 = vrsqrt.f32 %v4354_v16  ;;  %vm594_vm6 = vcmp.eq.f32.partialorder %v4361_v24, inf }
  0xe9   : > { %v551_v63 = vmul.f32 %v3727_v56, %v4342_v33  ;;  %3742 = vrsqrt.f32 %v4356_v17  ;;  %vm587_vm7 = vcmp.eq.f32.partialorder %v4363_v43, inf }
  0xea   : > { %v546_v6 = vsel %vm545_vm12, %v4344_v36, %v544_v53  ;;  %3744 = vrsqrt.f32 %v4361_v24  ;;  %v3729_v32 = vpop.eup %3728  ;;  %v555_v36 = vand.u32 2147483648, %v4342_v33 }
  0xeb   : > { %v4370_v27 = vpop.xlane.xlu1 %467  ;;  %3746 = vrcp.f32 %v729_v61  ;;  %v549_v37 = vsel %vm547_vm13, %v548_v7, %v546_v6  ;;  %v3731_v38 = vpop.eup %3730  ;;  %v553_v20 = vsel %vm552_vm14, %v4342_v33, %v551_v63  ;;  %v565_v62 = vmul.f32 %v3729_v32, %v4347_v48 }
  0xec   : > { %v4372_v58 = vpop.xlane.xlu0 %465  ;;  %3748 = vrsqrt.f32 %v4363_v43  ;;  %v3733_v41 = vpop.eup %3732  ;;  %v731_v46 = vmax.f32 %v549_v37, 1e-12  ;;  %v556_v53 = vsel %vm554_vm15, %v555_v36, %v553_v20  ;;  %vm608_vm8 = vcmp.eq.f32.partialorder %v4370_v27, inf }
  0xed   : > { %3750 = vrsqrt.f32 %v4370_v27  ;;  %v3735_v42 = vpop.eup %3734  ;;  %vm601_vm10 = vcmp.eq.f32.partialorder %v4372_v58, inf  ;;  %vm596_vm15 = vcmp.eq.f32.partialorder %v4361_v24, 0.0 }
  0xee   : > { %3752 = vrsqrt.f32 %v4372_v58  ;;  %v4407_v63 = vmul.f32 %v3735_v42, %v4159_v1  ;;  %v732_v1 = vmax.f32 %v556_v53, 1e-12 }
  0xef   : > { %v4382_v26 = vpop.xlane.xlu1 %471  ;;  %3754 = vrcp.f32 %v730_v31  ;;  %v4415_v31 = vmul.f32 %v3733_v41, %v4156_v0 }
  0xf0   : > { %v4384_v28 = vpop.xlane.xlu0 %469  ;;  %v3737_v47 = vpop.eup %3736  ;;  %3756 = vrsqrt.f32 %v4382_v26  ;;  %6092 = vst [vmem:[#allocation14_spill] sm:$0xff] %v4407_v63  ;;  %vm622_vm12 = vcmp.eq.f32.partialorder %v4382_v26, inf }
  0xf1   : > { %v3739_v56 = vpop.eup %3738  ;;  %3758 = vrsqrt.f32 %v4384_v28  ;;  %v4410_v6 = vmul.f32 %v3737_v47, %v4169_v5  ;;  %6094 = vst [vmem:[#allocation16_spill] sm:$0xff] %v4415_v31  ;;  %vm615_vm13 = vcmp.eq.f32.partialorder %v4384_v28, inf }
  0xf2   : > { %v3741_v33 = vpop.eup %3740  ;;  %v4418_v32 = vmul.f32 %v3739_v56, %v4162_v2  ;;  %3760 = vrcp.f32 %v731_v46  ;;  %v558_v2 = vmul.f32 %v3731_v38, %v4349_v51  ;;  %v567_v38 = vsel %vm566_vm0, %v4347_v48, %v565_v62 }
  0xf3   : > { %v4393_v21 = vpop.xlane.xlu1 %475  ;;  %6093 = vst [vmem:[#allocation15_spill] sm:$0xff] %v4410_v6  ;;  %v3743_v7 = vpop.eup %3742  ;;  %v885_v0 = vpack.c.bf16 %v4410_v6, %v4407_v63  ;;  %v579_v61 = vmul.f32 %v3741_v33, %v4354_v16  ;;  %v6099_v6 = vand.u32 2147483648, %v4347_v48  ;;  %vm589_vm0 = vcmp.eq.f32.partialorder %v4363_v43, 0.0 }
  0xf4   : > { %v4395_v25 = vpop.xlane.xlu0 %473  ;;  %6095 = vst [vmem:[#allocation17_spill] sm:$0xff] %v4418_v32  ;;  %v3745_v36 = vpop.eup %3744  ;;  %3762 = vrsqrt.f32 %v4393_v21  ;;  %v886_v42 = vpack.c.bf16 %v4418_v32, %v4415_v31  ;;  %v572_v53 = vmul.f32 %v3743_v7, %v4356_v17  ;;  %vm636_vm14 = vcmp.eq.f32.partialorder %v4393_v21, inf }
  0xf5   : > { %v3747_v41 = vpop.eup %3746  ;;  %3764 = vrsqrt.f32 %v4395_v25  ;;  %3468 = vmatprep.mubr.bf16.mxu0 %v885_v0  ;;  %v581_v7 = vsel %vm580_vm2, %v4354_v16, %v579_v61  ;;  %v6098_v61 = vand.u32 2147483648, %v4349_v51 }
  0xf6   : > { %v3749_v46 = vpop.eup %3748  ;;  %3469 = vmatmul.mubr.bf16.vlgmr.msra.gmra.mrb[0].mxu0 %v886_v42  ;;  %v4452_v62 = vmul.f32 %v3747_v41, %v4179_v9  ;;  %v560_v42 = vsel %vm559_vm1, %v4349_v51, %v558_v2  ;;  %v570_v2 = vsel %vm568_vm3, %v6099_v6, %v567_v38  ;;  %vm629_vm1 = vcmp.eq.f32.partialorder %v4395_v25, inf }
  0xf7   : > { %v4420_v37 = vpop.xlane.xlu1 %479  ;;  %v3751_v56 = vpop.eup %3750  ;;  %v586_v0 = vmul.f32 %v3749_v46, %v4363_v43 }
  0xf8   : > { %v4422_v20 = vpop.xlane.xlu0 %477  ;;  %3766 = vrsqrt.f32 %v4420_v37  ;;  %v3753_v52 = vpop.eup %3752  ;;  %6096 = vst [vmem:[#allocation18_spill] sm:$0xff] %v4452_v62  ;;  %v607_v57 = vmul.f32 %v3751_v56, %v4370_v27  ;;  %vm650_vm2 = vcmp.eq.f32.partialorder %v4420_v37, inf }
  0xf9   : > { %3768 = vrcp.f32 %v732_v1  ;;  %v3755_v33 = vpop.eup %3754  ;;  %v593_v1 = vmul.f32 %v3745_v36, %v4361_v24  ;;  %v563_v36 = vsel %vm561_vm4, %v6098_v61, %v560_v42  ;;  %v4502_v48 = vsel %vm587_vm7, %v4363_v43, %v586_v0 }
  0xfa   : > { %3770 = vrsqrt.f32 %v4422_v20  ;;  %v4464_v9 = vmul.f32 %v3755_v33, %v4176_v8  ;;  %v3757_v41 = vpop.eup %3756  ;;  %v600_v8 = vmul.f32 %v3753_v52, %v4372_v58  ;;  %v574_v52 = vsel %vm573_vm5, %v4356_v17, %v572_v53 }
  0xfb   : > { %v4443_v5 = vpop.xlane.xlu1 %483  ;;  %v3759_v56 = vpop.eup %3758  ;;  %v4495_v63 = vsel %vm594_vm6, %v4361_v24, %v593_v1  ;;  %v4507_v6 = vsel %vm608_vm8, %v4370_v27, %v607_v57  ;;  %v621_v1 = vmul.f32 %v3757_v41, %v4382_v26  ;;  %v733_v0 = vmax.f32 %v563_v36, 1e-12 }
  0xfc   : > { %v4445_v47 = vpop.xlane.xlu0 %481  ;;  %3772 = vrsqrt.f32 %v4443_v5  ;;  %6097 = vst [vmem:[#allocation19_spill] sm:$0xff] %v4464_v9  ;;  %v887_v33 = vpack.c.bf16 %v4464_v9, %v4452_v62  ;;  %v3761_v31 = vpop.eup %3760  ;;  %v734_v61 = vmax.f32 %v570_v2, 1e-12  ;;  %v614_v36 = vmul.f32 %v3759_v56, %v4384_v28 }
  0xfd   : > { %3774 = vrsqrt.f32 %v4445_v47  ;;  %v4527_v41 = vmul.f32 %v3761_v31, %v4189_v13  ;;  %vm643_vm3 = vcmp.eq.f32.partialorder %v4422_v20, inf  ;;  %vm664_vm4 = vcmp.eq.f32.partialorder %v4443_v5, inf }
  0xfe   : > { %v3763_v51 = vpop.eup %3762  ;;  %3472 = vmatprep.mubr.bf16.mxu0 %v887_v33  ;;  %v4523_v33 = vsel %vm601_vm10, %v4372_v58, %v600_v8  ;;  %v6101_v8 = vand.u32 2147483648, %v4356_v17  ;;  %vm603_vm5 = vcmp.eq.f32.partialorder %v4372_v58, 0.0  ;;  %vm610_vm6 = vcmp.eq.f32.partialorder %v4370_v27, 0.0 }
  0xff   : > { %v4473_v32 = vpop.xlane.xlu1 %487  ;;  %v3765_v42 = vpop.eup %3764  ;;  %6100 = vst [vmem:[#allocation20_spill] sm:$0xff] %v4527_v41  ;;  %v635_v13 = vmul.f32 %v3763_v51, %v4393_v21  ;;  %v616_v17 = vsel %vm615_vm13, %v4384_v28, %v614_v36  ;;  %vm617_vm7 = vcmp.eq.f32.partialorder %v4384_v28, 0.0  ;;  %vm657_vm8 = vcmp.eq.f32.partialorder %v4445_v47, inf }
 0x100   : > { %v4475_v46 = vpop.xlane.xlu0 %485  ;;  %3776 = vrsqrt.f32 %v4473_v32  ;;  %v577_v38 = vsel %vm575_vm9, %v6101_v8, %v574_v52  ;;  %v6103_v52 = vand.u32 2147483648, %v4354_v16  ;;  %vm624_vm9 = vcmp.eq.f32.partialorder %v4382_v26, 0.0 }
 0x101   : > { %3778 = vrsqrt.f32 %v4475_v46  ;;  %v735_v8 = vmax.f32 %v577_v38, 1e-12  ;;  %v4574_v38 = vsel %vm636_vm14, %v4393_v21, %v635_v13  ;;  %vm631_vm10 = vcmp.eq.f32.partialorder %v4395_v25, 0.0 }
 0x102   : > { %v3767_v53 = vpop.eup %3766  ;;  %3780 = vrcp.f32 %v733_v0  ;;  %v4547_v0 = vsel %vm622_vm12, %v4382_v26, %v621_v1  ;;  %v584_v51 = vsel %vm582_vm11, %v6103_v52, %v581_v7  ;;  %vm678_vm11 = vcmp.eq.f32.partialorder %v4473_v32, inf }
 0x103   : > { %v4516_v57 = vpop.xlane.xlu1 %491  ;;  %v3769_v62 = vpop.eup %3768  ;;  %3782 = vrcp.f32 %v734_v61  ;;  %v736_v1 = vmax.f32 %v584_v51, 1e-12  ;;  %vm638_vm12 = vcmp.eq.f32.partialorder %v4393_v21, 0.0  ;;  %vm671_vm13 = vcmp.eq.f32.partialorder %v4475_v46, inf }
 0x104   : > { %v4518_v9 = vpop.xlane.xlu0 %489  ;;  %v3771_v10 = vpop.eup %3770  ;;  %v4541_v31 = vmul.f32 %v3769_v62, %v4186_v12  ;;  %v628_v62 = vmul.f32 %v3765_v42, %v4395_v25  ;;  %v649_v42 = vmul.f32 %v3767_v53, %v4420_v37  ;;  %vm652_vm14 = vcmp.eq.f32.partialorder %v4420_v37, 0.0 }
 0x105   : > { %3784 = vrsqrt.f32 %v4518_v9  ;;  %v642_v36 = vmul.f32 %v3771_v10, %v4422_v20  ;;  %v6104_v10 = vand.u32 2147483648, %v4363_v43 }
 0x106   : > { %6102 = vst [vmem:[#allocation21_spill] sm:$0xff] %v4541_v31  ;;  %v3773_v56 = vpop.eup %3772  ;;  %v888_v61 = vpack.c.bf16 %v4541_v31, %v4527_v41  ;;  %3786 = vrsqrt.f32 %v4516_v57  ;;  %v630_v13 = vsel %vm629_vm1, %v4395_v25, %v628_v62  ;;  %v4604_v43 = vsel %vm650_vm2, %v4420_v37, %v649_v42 }
 0x107   : > { %v3775_v12 = vpop.eup %3774  ;;  %v4559_v2 = vpop.xlane.xlu1 %495  ;;  %3788 = vrcp.f32 %v735_v8  ;;  %v663_v52 = vmul.f32 %v3773_v56, %v4443_v5  ;;  %v591_v53 = vsel %vm589_vm0, %v6104_v10, %v4502_v48  ;;  %v6105_v56 = vand.u32 2147483648, %v4361_v24 }
 0x108   : > { %v4568_v7 = vpop.xlane.xlu0 %493  ;;  %3473 = vmatmul.mubr.bf16.gmra.mrb[4].mxu0 %v888_v61  ;;  %v656_v51 = vmul.f32 %v3775_v12, %v4445_v47  ;;  %3790 = vrcp.f32 %v736_v1  ;;  %v737_v62 = vmax.f32 %v591_v53, 1e-12  ;;  %v644_v24 = vsel %vm643_vm3, %v4422_v20, %v642_v36 }
 0x109   : > { %3792 = vrsqrt.f32 %v4568_v7  ;;  %v598_v12 = vsel %vm596_vm15, %v6105_v56, %v4495_v63  ;;  %vm645_vm15 = vcmp.eq.f32.partialorder %v4422_v20, 0.0  ;;  %v4618_v42 = vsel %vm664_vm4, %v4443_v5, %v663_v52 }
 0x10a   : > { %v3777_v61 = vpop.eup %3776  ;;  %3794 = vrsqrt.f32 %v4559_v2  ;;  %v738_v1 = vmax.f32 %v598_v12, 1e-12  ;;  %v4623_v56 = vsel %vm657_vm8, %v4445_v47, %v656_v51  ;;  %vm659_vm0 = vcmp.eq.f32.partialorder %v4445_v47, 0.0 }
 0x10b   : > { %v3779_v16 = vpop.eup %3778  ;;  %v4613_v10 = vpop.xlane.xlu1 %499  ;;  %3796 = vrcp.f32 %v737_v62  ;;  %v677_v48 = vmul.f32 %v3777_v61, %v4473_v32  ;;  %vm685_vm1 = vcmp.eq.f32.partialorder %v4518_v9, inf  ;;  %v6107_v52 = vand.u32 2147483648, %v4372_v58 }
 0x10c   : > { %v3781_v53 = vpop.eup %3780  ;;  %v4626_v12 = vpop.xlane.xlu0 %497  ;;  %3798 = vrcp.f32 %v738_v1  ;;  %vm666_vm2 = vcmp.eq.f32.partialorder %v4443_v5, 0.0  ;;  %v670_v36 = vmul.f32 %v3779_v16, %v4475_v46  ;;  %v6110_v1 = vand.u32 2147483648, %v4384_v28 }
 0x10d   : > { %v3783_v63 = vpop.eup %3782  ;;  %v4631_v8 = vmul.f32 %v3781_v53, %v4195_v15  ;;  %v605_v51 = vsel %vm603_vm5, %v6107_v52, %v4523_v33  ;;  %3800 = vrsqrt.f32 %v4613_v10  ;;  %v6109_v15 = vand.u32 2147483648, %v4370_v27 }
 0x10e   : > { %v4642_v31 = vmul.f32 %v3783_v63, %v4192_v14  ;;  %3802 = vrsqrt.f32 %v4626_v12  ;;  %v739_v58 = vmax.f32 %v605_v51, 1e-12  ;;  %v619_v16 = vsel %vm617_vm7, %v6110_v1, %v616_v17 }
 0x10f   : > { %6106 = vst [vmem:[#allocation22_spill] sm:$0xff] %v4631_v8  ;;  %v3785_v62 = vpop.eup %3784  ;;  %v612_v61 = vsel %vm610_vm6, %v6109_v15, %v4507_v6  ;;  %vm680_vm3 = vcmp.eq.f32.partialorder %v4473_v32, 0.0  ;;  %vm673_vm4 = vcmp.eq.f32.partialorder %v4475_v46, 0.0  ;;  %vm692_vm5 = vcmp.eq.f32.partialorder %v4516_v57, inf }
 0x110   : > { %6108 = vst [vmem:[#allocation23_spill] sm:$0xff] %v4642_v31  ;;  %v740_v33 = vmax.f32 %v612_v61, 1e-12  ;;  %v3787_v53 = vpop.eup %3786  ;;  %v889_v14 = vpack.c.bf16 %v4642_v31, %v4631_v8  ;;  %vm699_vm6 = vcmp.eq.f32.partialorder %v4568_v7, inf  ;;  %v6111_v27 = vand.u32 2147483648, %v4382_v26 }
 0x111   : > { %v741_v28 = vmax.f32 %v619_v16, 1e-12  ;;  %v6112_v17 = vand.u32 2147483648, %v4395_v25  ;;  %v3789_v52 = vpop.eup %3788  ;;  %v679_v51 = vsel %vm678_vm11, %v4473_v32, %v677_v48  ;;  %v684_v15 = vmul.f32 %v3785_v62, %v4518_v9 }
 0x112   : > { %v626_v6 = vsel %vm624_vm9, %v6111_v27, %v4547_v0  ;;  %3804 = vrcp.f32 %v739_v58  ;;  %v3791_v1 = vpop.eup %3790  ;;  %3476 = vmatprep.mubr.bf16.mxu0 %v889_v14  ;;  %vm687_vm7 = vcmp.eq.f32.partialorder %v4518_v9, 0.0  ;;  %v4676_v26 = vmul.f32 %v3789_v52, %v4205_v19 }
 0x113   : > { %v633_v63 = vsel %vm631_vm10, %v6112_v17, %v630_v13  ;;  %v742_v61 = vmax.f32 %v626_v6, 1e-12  ;;  %vm706_vm8 = vcmp.eq.f32.partialorder %v4559_v2, inf  ;;  %3806 = vrcp.f32 %v740_v33  ;;  %v3793_v48 = vpop.eup %3792 }
 0x114   : > { %6113 = vst [vmem:[#allocation24_spill] sm:$0xff] %v4676_v26  ;;  %v6114_v25 = vand.u32 2147483648, %v4393_v21  ;;  %v743_v13 = vmax.f32 %v633_v63, 1e-12  ;;  %v672_v62 = vsel %vm671_vm13, %v4475_v46, %v670_v36  ;;  %vm694_vm9 = vcmp.eq.f32.partialorder %v4516_v57, 0.0  ;;  %v3795_v33 = vpop.eup %3794 }
 0x115   : > { %v4689_v19 = vmul.f32 %v3791_v1, %v4202_v18  ;;  %3808 = vrcp.f32 %v741_v28  ;;  %v691_v16 = vmul.f32 %v3787_v53, %v4516_v57  ;;  %vm701_vm10 = vcmp.eq.f32.partialorder %v4568_v7, 0.0  ;;  %v3797_v6 = vpop.eup %3796 }
 0x116   : > { %v640_v0 = vsel %vm638_vm12, %v6114_v25, %v4574_v38  ;;  %3810 = vrcp.f32 %v742_v61  ;;  %v6116_v21 = vand.u32 2147483648, %v4422_v20  ;;  %v6117_v36 = vand.u32 2147483648, %v4420_v37 }
 0x117   : > { %6115 = vst [vmem:[#allocation25_spill] sm:$0xff] %v4689_v19  ;;  %v744_v58 = vmax.f32 %v640_v0, 1e-12  ;;  %v890_v14 = vpack.c.bf16 %v4689_v19, %v4676_v26  ;;  %v698_v27 = vmul.f32 %v3793_v48, %v4568_v7  ;;  %3812 = vrcp.f32 %v743_v13 }
 0x118   : > { %v647_v38 = vsel %vm645_vm15, %v6116_v21, %v644_v24  ;;  %v654_v18 = vsel %vm652_vm14, %v6117_v36, %v4604_v43  ;;  %v686_v28 = vsel %vm685_vm1, %v4518_v9, %v684_v15  ;;  %v6118_v24 = vand.u32 2147483648, %v4445_v47  ;;  %v3799_v43 = vpop.eup %3798 }
 0x119   : > { %v745_v53 = vmax.f32 %v647_v38, 1e-12  ;;  %3814 = vrcp.f32 %v744_v58  ;;  %v746_v20 = vmax.f32 %v654_v18, 1e-12  ;;  %3477 = vmatmul.mubr.bf16.gmra.mrb[8].mxu0 %v890_v14  ;;  %v705_v17 = vmul.f32 %v3795_v33, %v4559_v2  ;;  %v3801_v61 = vpop.eup %3800 }
 0x11a   : > { %v661_v37 = vsel %vm659_vm0, %v6118_v24, %v4623_v56  ;;  %v4715_v63 = vmul.f32 %v3797_v6, %v4215_v23  ;;  %v6120_v52 = vand.u32 2147483648, %v4443_v5  ;;  %v4723_v1 = vmul.f32 %v3799_v43, %v4212_v22  ;;  %v3803_v25 = vpop.eup %3802 }
 0x11b   : > { %3816 = vrcp.f32 %v745_v53  ;;  %v747_v47 = vmax.f32 %v661_v37, 1e-12  ;;  %v693_v23 = vsel %vm692_vm5, %v4516_v57, %v691_v16  ;;  %v700_v0 = vsel %vm699_vm6, %v4568_v7, %v698_v27 }
 0x11c   : > { %6119 = vst [vmem:[#allocation26_spill] sm:$0xff] %v4715_v63  ;;  %v668_v15 = vsel %vm666_vm2, %v6120_v52, %v4618_v42  ;;  %6121 = vst [vmem:[#allocation27_spill] sm:$0xff] %v4723_v1  ;;  %3818 = vrcp.f32 %v746_v20  ;;  %v6122_v13 = vand.u32 2147483648, %v4475_v46  ;;  %v6123_v22 = vand.u32 2147483648, %v4473_v32  ;;  %v3805_v16 = vpop.eup %3804 }
 0x11d   : > { %v748_v56 = vmax.f32 %v668_v15, 1e-12  ;;  %v891_v48 = vpack.c.bf16 %v4723_v1, %v4715_v63  ;;  %3820 = vrcp.f32 %v747_v47  ;;  %v707_v21 = vsel %vm706_vm8, %v4559_v2, %v705_v17 }
 0x11e   : > { %v675_v5 = vsel %vm673_vm4, %v6122_v13, %v672_v62  ;;  %v682_v42 = vsel %vm680_vm3, %v6123_v22, %v679_v51  ;;  %v702_v38 = vand.u32 2147483648, %v4568_v7  ;;  %v6124_v46 = vand.u32 2147483648, %v4518_v9  ;;  %v3807_v51 = vpop.eup %3806 }
 0x11f   : > { %v749_v58 = vmax.f32 %v675_v5, 1e-12  ;;  %v750_v33 = vmax.f32 %v682_v42, 1e-12  ;;  %3822 = vrcp.f32 %v748_v56  ;;  %3480 = vmatprep.mubr.bf16.mxu0 %v891_v48  ;;  %v712_v62 = vmul.f32 %v3803_v25, %v4626_v12  ;;  %v3809_v27 = vpop.eup %3808 }
 0x120   : > { %v689_v32 = vsel %vm687_vm7, %v6124_v46, %v686_v28  ;;  %v4751_v36 = vmul.f32 %v3805_v16, %v4232_v30  ;;  %v6126_v18 = vand.u32 2147483648, %v4516_v57  ;;  %vm708_vm11 = vcmp.eq.f32.partialorder %v4559_v2, 0.0  ;;  %v3811_v6 = vpop.eup %3810 }
 0x121   : > { %3824 = vrcp.f32 %v749_v58  ;;  %v4759_v53 = vmul.f32 %v3807_v51, %v4229_v29  ;;  %v703_v9 = vsel %vm701_vm10, %v702_v38, %v700_v0  ;;  %v719_v30 = vmul.f32 %v3801_v61, %v4613_v10  ;;  %v3813_v37 = vpop.eup %3812 }
 0x122   : > { %6125 = vst [vmem:[#allocation28_spill] sm:$0xff] %v4751_v36  ;;  %v696_v14 = vsel %vm694_vm9, %v6126_v18, %v693_v23  ;;  %3826 = vrcp.f32 %v750_v33  ;;  %v4765_v28 = vmul.f32 %v3809_v27, %v4245_v35  ;;  %v751_v20 = vmax.f32 %v689_v32, 1e-12 }
 0x123   : > { %6127 = vst [vmem:[#allocation29_spill] sm:$0xff] %v4759_v53  ;;  %v6129_v57 = vand.u32 2147483648, %v4559_v2  ;;  %vm713_vm12 = vcmp.eq.f32.partialorder %v4626_v12, inf  ;;  %v892_v29 = vpack.c.bf16 %v4759_v53, %v4751_v36  ;;  %v4773_v43 = vmul.f32 %v3811_v6, %v4242_v34  ;;  %v3815_v17 = vpop.eup %3814 }
 0x124   : > { %6128 = vst [vmem:[#allocation30_spill] sm:$0xff] %v4765_v28  ;;  %v752_v7 = vmax.f32 %v696_v14, 1e-12  ;;  %vm720_vm13 = vcmp.eq.f32.partialorder %v4613_v10, inf  ;;  %v714_v35 = vsel %vm713_vm12, %v4626_v12, %v712_v62  ;;  %v753_v52 = vmax.f32 %v703_v9, 1e-12 }
 0x125   : > { %v710_v24 = vsel %vm708_vm11, %v6129_v57, %v707_v21  ;;  %6130 = vst [vmem:[#allocation31_spill] sm:$0xff] %v4773_v43  ;;  %v3817_v15 = vpop.eup %3816  ;;  %3481 = vmatmul.mubr.bf16.gmra.mrb[12].mxu0 %v892_v29  ;;  %v893_v2 = vpack.c.bf16 %v4773_v43, %v4765_v28  ;;  %v4780_v61 = vmul.f32 %v3813_v37, %v4258_v40  ;;  %v716_v23 = vand.u32 2147483648, %v4626_v12 }
 0x126   : > { %v4783_v47 = vmul.f32 %v3815_v17, %v4255_v39  ;;  %v754_v34 = vmax.f32 %v710_v24, 1e-12  ;;  %v3819_v56 = vpop.eup %3818  ;;  %v721_v25 = vsel %vm720_vm13, %v4613_v10, %v719_v30  ;;  %v4788_v0 = vmul.f32 %v3817_v15, %v4271_v45 }
 0x127   : > { %6131 = vst [vmem:[#allocation32_spill] sm:$0xff] %v4780_v61  ;;  %3828 = vrcp.f32 %v751_v20  ;;  %v723_v13 = vand.u32 2147483648, %v4613_v10  ;;  %vm715_vm14 = vcmp.eq.f32.partialorder %v4626_v12, 0.0  ;;  %3484 = vmatprep.mubr.bf16.mxu0 %v893_v2  ;;  %v4793_v40 = vmul.f32 %v3819_v56, %v4268_v44  ;;  %v3821_v39 = vpop.eup %3820 }
 0x128   : > { %6132 = vst [vmem:[#allocation33_spill] sm:$0xff] %v4783_v47  ;;  %6133 = vst [vmem:[#allocation34_spill] sm:$0xff] %v4788_v0  ;;  %3830 = vrcp.f32 %v752_v7  ;;  %vm722_vm15 = vcmp.eq.f32.partialorder %v4613_v10, 0.0  ;;  %v717_v5 = vsel %vm715_vm14, %v716_v23, %v714_v35  ;;  %v894_v45 = vpack.c.bf16 %v4783_v47, %v4780_v61 }
 0x129   : > { %6134 = vst [vmem:[#allocation35_spill] sm:$0xff] %v4793_v40  ;;  %3832 = vrcp.f32 %v753_v52  ;;  %v3823_v22 = vpop.eup %3822  ;;  %v724_v42 = vsel %vm722_vm15, %v723_v13, %v721_v25  ;;  %v895_v12 = vpack.c.bf16 %v4793_v40, %v4788_v0  ;;  %v755_v33 = vmax.f32 %v717_v5, 1e-12 }
 0x12a   : > { %3834 = vrcp.f32 %v754_v34  ;;  %v756_v44 = vmax.f32 %v724_v42, 1e-12  ;;  %v4801_v16 = vmul.f32 %v3821_v39, %v4284_v50  ;;  %v4804_v10 = vmul.f32 %v3823_v22, %v4281_v49 }
 0x12b   : > { %v3825_v48 = vpop.eup %3824  ;;  %3836 = vrcp.f32 %v755_v33  ;;  %vm1128_vm0 = vcmask 523264   ;;  %vm2510_vm1 = vcmask 7168  }
 0x12c   : > { %v3827_v58 = vpop.eup %3826  ;;  %6135 = vst [vmem:[#allocation36_spill] sm:$0xff] %v4801_v16  ;;  %6136 = vst [vmem:[#allocation37_spill] sm:$0xff] %v4804_v10  ;;  %v4807_v21 = vmul.f32 %v3825_v48, %v4297_v55  ;;  %3838 = vrcp.f32 %v756_v44  ;;  %v896_v51 = vpack.c.bf16 %v4804_v10, %v4801_v16 }
 0x12d   : > { %3485 = vmatmul.mubr.bf16.gmra.mrb[16].mxu0 %v894_v45  ;;  %v4810_v38 = vmul.f32 %v3827_v58, %v4294_v54 }
 0x12e   : > { %3488 = vmatprep.mubr.bf16.mxu0 %v895_v12  ;;  %6137 = vst [vmem:[#allocation38_spill] sm:$0xff] %v4807_v21 }
 0x12f   : > { %6138 = vst [vmem:[#allocation39_spill] sm:$0xff] %v4810_v38  ;;  %v897_v50 = vpack.c.bf16 %v4810_v38, %v4807_v21 }
 0x131   : > { %v3829_v46 = vpop.eup %3828 }
 0x132   : > { %v3831_v32 = vpop.eup %3830  ;;  %v4817_v18 = vmul.f32 %v3829_v46, %v4310_v60 }
 0x133   : > { %v3833_v62 = vpop.eup %3832  ;;  %v4820_v55 = vmul.f32 %v3831_v32, %v4307_v59  ;;  %v6144_v59 = vld [vmem:[#allocation13_spill] sm:$0xff] }
 0x134   : > { %v3835_v49 = vpop.eup %3834  ;;  %6139 = vst [vmem:[#allocation40_spill] sm:$0xff] %v4817_v18  ;;  %v4823_v54 = vmul.f32 %v3833_v62, %v4323_v4 }
 0x135   : > { %3489 = vmatmul.mubr.bf16.gmra.mrb[20].mxu0 %v896_v51  ;;  %6140 = vst [vmem:[#allocation41_spill] sm:$0xff] %v4820_v55  ;;  %v4826_v14 = vmul.f32 %v3835_v49, %v4320_v3  ;;  %v3837_v27 = vpop.eup %3836  ;;  %v898_v9 = vpack.c.bf16 %v4820_v55, %v4817_v18 }
 0x136   : > { %3492 = vmatprep.mubr.bf16.mxu0 %v897_v50  ;;  %6141 = vst [vmem:[#allocation42_spill] sm:$0xff] %v4823_v54  ;;  %v3839_v6 = vpop.eup %3838  ;;  %v4833_v60 = vmul.f32 %v3837_v27, %v4333_v11 }
 0x137   : > { %6142 = vst [vmem:[#allocation43_spill] sm:$0xff] %v4826_v14  ;;  %v899_v30 = vpack.c.bf16 %v4826_v14, %v4823_v54  ;;  %v4836_v20 = vmul.f32 %v3839_v6, %v6144_v59 }
 0x138   : > { %6143 = vst [vmem:[#allocation44_spill] sm:$0xff] %v4833_v60 }
 0x139   : > { %6145 = vst [vmem:[#allocation13_spill] sm:$0xff] %v4836_v20  ;;  %v900_v3 = vpack.c.bf16 %v4836_v20, %v4833_v60 }
 0x13d   : > { %3493 = vmatmul.mubr.bf16.gmra.mrb[24].mxu0 %v898_v9 }
 0x13e   : > { %3496 = vmatprep.mubr.bf16.mxu0 %v899_v30 }
 0x145   : > { %3497 = vmatmul.mubr.bf16.gmra.mrb[28].mxu0 %v900_v3 }
 0x1c9   : > { %v4840_v4 = vpop.f32.mrb[0].mxu0 }
 0x1ca   : > { %v4842_v57 = vpop.f32.mrb[1].mxu0 }
 0x1cb   : > { %v4844_v24 = vpop.f32.mrb[2].mxu0 }
 0x1cc   : > { %v4846_v37 = vpop.f32.mrb[3].mxu0 }
 0x1db   : > { %v4848_v29 = vpop.f32.mrb[4].mxu0 }
 0x1dc   : > { %v4850_v11 = vpop.f32.mrb[5].mxu0 }
 0x1dd   : > { %v4852_v7 = vpop.f32.mrb[6].mxu0 }
 0x1de   : > { %v4854_v17 = vpop.f32.mrb[7].mxu0 }
 0x1ec   : > { %v4856_v35 = vpop.f32.mrb[8].mxu0 }
 0x1ed   : > { %v4858_v52 = vpop.f32.mrb[9].mxu0 }
 0x1ee   : > { %v4860_v15 = vpop.f32.mrb[10].mxu0 }
 0x1ef   : > { %v4862_v2 = vpop.f32.mrb[11].mxu0 }
 0x1f8   : > { %v4864_v34 = vpop.f32.mrb[12].mxu0 }
 0x1f9   : > { %v4866_v56 = vpop.f32.mrb[13].mxu0  ;;  %v1171_v5 = vsel %vm1128_vm0, %v4864_v34, -inf }
 0x1fa   : > { %v4868_v25 = vpop.f32.mrb[14].mxu0  ;;  %v1165_v23 = vsel %vm1128_vm0, %v4866_v56, -inf }
 0x1fb   : > { %1166 = vmax.xlane.f32.xlu0 %v1165_v23  ;;  %v4872_v13 = vpop.f32.mrb[15].mxu0  ;;  %v1174_v45 = vsel %vm1128_vm0, %v4868_v25, -inf }
 0x1fc   : > { %v1168_v39 = vsel %vm1128_vm0, %v4872_v13, -inf }
 0x1fd   : > { %1169 = vmax.xlane.f32.xlu1 %v1168_v39 }
 0x1ff   : > { %1172 = vmax.xlane.f32.xlu0 %v1171_v5 }
 0x200   : > { %v4878_v22 = vpop.f32.mrb[16].mxu0 }
 0x201   : > { %1175 = vmax.xlane.f32.xlu1 %v1174_v45  ;;  %v4882_v42 = vpop.f32.mrb[17].mxu0  ;;  %v1183_v44 = vsel %vm1128_vm0, %v4878_v22, -inf }
 0x202   : > { %v4884_v48 = vpop.f32.mrb[18].mxu0  ;;  %v1177_v12 = vsel %vm1128_vm0, %v4882_v42, -inf }
 0x203   : > { %1178 = vmax.xlane.f32.xlu0 %v1177_v12  ;;  %v4888_v58 = vpop.f32.mrb[19].mxu0  ;;  %v1186_v32 = vsel %vm1128_vm0, %v4884_v48, -inf }
 0x204   : > { %v1180_v33 = vsel %vm1128_vm0, %v4888_v58, -inf }
 0x205   : > { %1181 = vmax.xlane.f32.xlu1 %v1180_v33 }
 0x207   : > { %1184 = vmax.xlane.f32.xlu0 %v1183_v44 }
 0x208   : > { %v4894_v46 = vpop.f32.mrb[20].mxu0 }
 0x209   : > { %1187 = vmax.xlane.f32.xlu1 %v1186_v32  ;;  %v4898_v51 = vpop.f32.mrb[21].mxu0  ;;  %v1195_v9 = vsel %vm1128_vm0, %v4894_v46, -inf }
 0x20a   : > { %v4900_v62 = vpop.f32.mrb[22].mxu0  ;;  %v1189_v50 = vsel %vm1128_vm0, %v4898_v51, -inf }
 0x20b   : > { %1190 = vmax.xlane.f32.xlu0 %v1189_v50  ;;  %v4904_v49 = vpop.f32.mrb[23].mxu0  ;;  %v1198_v30 = vsel %vm1128_vm0, %v4900_v62, -inf }
 0x20c   : > { %v1192_v27 = vsel %vm1128_vm0, %v4904_v49, -inf }
 0x20d   : > { %1193 = vmax.xlane.f32.xlu1 %v1192_v27 }
 0x20f   : > { %1196 = vmax.xlane.f32.xlu0 %v1195_v9 }
 0x210   : > { %v4910_v6 = vpop.f32.mrb[24].mxu0 }
 0x211   : > { %1199 = vmax.xlane.f32.xlu1 %v1198_v30  ;;  %v4914_v59 = vpop.f32.mrb[25].mxu0  ;;  %v1207_v45 = vsel %vm1128_vm0, %v4910_v6, -inf }
 0x212   : > { %v4916_v3 = vpop.f32.mrb[26].mxu0  ;;  %v1201_v23 = vsel %vm1128_vm0, %v4914_v59, -inf }
 0x213   : > { %1202 = vmax.xlane.f32.xlu0 %v1201_v23  ;;  %v4920_v39 = vpop.f32.mrb[27].mxu0  ;;  %v1210_v33 = vsel %vm1128_vm0, %v4916_v3, -inf }
 0x214   : > { %v1204_v5 = vsel %vm1128_vm0, %v4920_v39, -inf }
 0x215   : > { %1205 = vmax.xlane.f32.xlu1 %v1204_v5  ;;  %v1129_v5 = vsel %vm1128_vm0, %v4842_v57, -inf }
 0x217   : > { %1208 = vmax.xlane.f32.xlu0 %v1207_v45  ;;  %v1132_v45 = vsel %vm1128_vm0, %v4846_v37, -inf }
 0x218   : > { %v4926_v12 = vpop.f32.mrb[28].mxu0 }
 0x219   : > { %1211 = vmax.xlane.f32.xlu1 %v1210_v33  ;;  %v4930_v44 = vpop.f32.mrb[29].mxu0  ;;  %v1219_v30 = vsel %vm1128_vm0, %v4926_v12, -inf  ;;  %v1135_v33 = vsel %vm1128_vm0, %v4840_v4, -inf }
 0x21a   : > { %v4932_v32 = vpop.f32.mrb[30].mxu0  ;;  %v1213_v50 = vsel %vm1128_vm0, %v4930_v44, -inf }
 0x21b   : > { %1214 = vmax.xlane.f32.xlu0 %v1213_v50  ;;  %v4936_v27 = vpop.f32.mrb[31].mxu0  ;;  %v1222_v23 = vsel %vm1128_vm0, %v4932_v32, -inf  ;;  %v1138_v50 = vsel %vm1128_vm0, %v4844_v24, -inf }
 0x21c   : > { %v1216_v9 = vsel %vm1128_vm0, %v4936_v27, -inf }
 0x21d   : > { %1217 = vmax.xlane.f32.xlu1 %v1216_v9  ;;  %v1141_v9 = vsel %vm1128_vm0, %v4850_v11, -inf }
 0x21f   : > { %1220 = vmax.xlane.f32.xlu0 %v1219_v30  ;;  %v1144_v30 = vsel %vm1128_vm0, %v4854_v17, -inf }
 0x221   : > { %1223 = vmax.xlane.f32.xlu1 %v1222_v23  ;;  %v1147_v23 = vsel %vm1128_vm0, %v4848_v29, -inf }
 0x223   : > { %1130 = vmax.xlane.f32.xlu0 %v1129_v5  ;;  %v1150_v5 = vsel %vm1128_vm0, %v4852_v7, -inf }
 0x225   : > { %1133 = vmax.xlane.f32.xlu1 %v1132_v45  ;;  %v1153_v45 = vsel %vm1128_vm0, %v4858_v52, -inf }
 0x227   : > { %1136 = vmax.xlane.f32.xlu0 %v1135_v33  ;;  %v1156_v33 = vsel %vm1128_vm0, %v4862_v2, -inf }
 0x229   : > { %1139 = vmax.xlane.f32.xlu1 %v1138_v50  ;;  %v1159_v50 = vsel %vm1128_vm0, %v4856_v35, -inf }
 0x22b   : > { %1142 = vmax.xlane.f32.xlu0 %v1141_v9  ;;  %v1162_v9 = vsel %vm1128_vm0, %v4860_v15, -inf }
 0x22d   : > { %1145 = vmax.xlane.f32.xlu1 %v1144_v30  ;;  %v1126_v30 = vlaneseq }
 0x22f   : > { %1148 = vmax.xlane.f32.xlu0 %v1147_v23  ;;  %v4968_v23 = vand.u32 127, %v1126_v30 }
 0x231   : > { %1151 = vmax.xlane.f32.xlu1 %v1150_v5  ;;  %6146 = vst [vmem:[#allocation45_spill] sm:$0xff] %v4968_v23 }
 0x233   : > { %1154 = vmax.xlane.f32.xlu0 %v1153_v45 }
 0x235   : > { %1157 = vmax.xlane.f32.xlu1 %v1156_v33 }
 0x237   : > { %1160 = vmax.xlane.f32.xlu0 %v1159_v50 }
 0x239   : > { %1163 = vmax.xlane.f32.xlu1 %v1162_v9 }
 0x288   : > { %v1167_v5 = vpop.xlane.xlu0 %1166 }
 0x289   : > { %vm1237_vm2 = vcmp.eq.f32.partialorder %v4866_v56, %v1167_v5 }
 0x28a   : > { %v1170_v45 = vpop.xlane.xlu1 %1169  ;;  %v1269_v20 = vsel %vm1237_vm2, %v4968_v23, 64 }
 0x28b   : > { %vm1238_vm3 = vcmp.eq.f32.partialorder %v4872_v13, %v1170_v45  ;;  %v4974_v33 = vsel %vm1128_vm0, %v1269_v20, 2147483647 }
 0x28c   : > { %v1173_v50 = vpop.xlane.xlu0 %1172  ;;  %v1471_v60 = vshra.s32 %v4974_v33, 16  ;;  %v1270_v9 = vsel %vm1238_vm3, %v4968_v23, 64 }
 0x28d   : > { %vm1239_vm4 = vcmp.eq.f32.partialorder %v4864_v34, %v1173_v50  ;;  %v4980_v30 = vsel %vm1128_vm0, %v1270_v9, 2147483647 }
 0x28e   : > { %v1176_v14 = vpop.xlane.xlu1 %1175  ;;  %v4982_v56 = vcvt.s32.f32 %v1471_v60  ;;  %v1486_v5 = vshra.s32 %v4980_v30, 16  ;;  %v1271_v13 = vsel %vm1239_vm4, %v4968_v23, 64 }
 0x28f   : > { %vm1240_vm5 = vcmp.eq.f32.partialorder %v4868_v25, %v1176_v14  ;;  %v4988_v20 = vsel %vm1128_vm0, %v1271_v13, 2147483647 }
 0x290   : > { %1474 = vmin.xlane.f32.xlu0 %v4982_v56  ;;  %v1179_v45 = vpop.xlane.xlu0 %1178  ;;  %v4991_v54 = vcvt.s32.f32 %v1486_v5  ;;  %v1501_v34 = vshra.s32 %v4988_v20, 16  ;;  %v1272_v50 = vsel %vm1240_vm5, %v4968_v23, 64 }
 0x291   : > { %vm1241_vm6 = vcmp.eq.f32.partialorder %v4882_v42, %v1179_v45  ;;  %v4997_v60 = vsel %vm1128_vm0, %v1272_v50, 2147483647 }
 0x292   : > { %v1182_v9 = vpop.xlane.xlu1 %1181  ;;  %1489 = vmin.xlane.f32.xlu1 %v4991_v54  ;;  %v5000_v14 = vcvt.s32.f32 %v1501_v34  ;;  %v1516_v25 = vshra.s32 %v4997_v60, 16  ;;  %v1273_v13 = vsel %vm1241_vm6, %v4968_v23, 64 }
 0x293   : > { %vm1242_vm7 = vcmp.eq.f32.partialorder %v4888_v58, %v1182_v9  ;;  %v5006_v5 = vsel %vm1128_vm0, %v1273_v13, 2147483647 }
 0x294   : > { %1504 = vmin.xlane.f32.xlu0 %v5000_v14  ;;  %v1185_v42 = vpop.xlane.xlu0 %1184  ;;  %v5009_v45 = vcvt.s32.f32 %v1516_v25  ;;  %v1531_v50 = vshra.s32 %v5006_v5, 16  ;;  %v1274_v55 = vsel %vm1242_vm7, %v4968_v23, 64 }
 0x295   : > { %vm1243_vm8 = vcmp.eq.f32.partialorder %v4878_v22, %v1185_v42  ;;  %v5015_v34 = vsel %vm1128_vm0, %v1274_v55, 2147483647 }
 0x296   : > { %v1188_v18 = vpop.xlane.xlu1 %1187  ;;  %1519 = vmin.xlane.f32.xlu1 %v5009_v45  ;;  %v5018_v58 = vcvt.s32.f32 %v1531_v50  ;;  %v1546_v9 = vshra.s32 %v5015_v34, 16  ;;  %v1275_v13 = vsel %vm1243_vm8, %v4968_v23, 64 }
 0x297   : > { %vm1244_vm9 = vcmp.eq.f32.partialorder %v4884_v48, %v1188_v18  ;;  %v5024_v25 = vsel %vm1128_vm0, %v1275_v13, 2147483647 }
 0x298   : > { %1534 = vmin.xlane.f32.xlu0 %v5018_v58  ;;  %v1191_v22 = vpop.xlane.xlu0 %1190  ;;  %v5027_v42 = vcvt.s32.f32 %v1546_v9  ;;  %v1561_v55 = vshra.s32 %v5024_v25, 16  ;;  %v1276_v38 = vsel %vm1244_vm9, %v4968_v23, 64 }
 0x299   : > { %vm1245_vm10 = vcmp.eq.f32.partialorder %v4898_v51, %v1191_v22  ;;  %v5033_v50 = vsel %vm1128_vm0, %v1276_v38, 2147483647 }
 0x29a   : > { %v1194_v21 = vpop.xlane.xlu1 %1193  ;;  %1549 = vmin.xlane.f32.xlu1 %v5027_v42  ;;  %v5036_v18 = vcvt.s32.f32 %v1561_v55  ;;  %v1576_v48 = vshra.s32 %v5033_v50, 16  ;;  %v1277_v13 = vsel %vm1245_vm10, %v4968_v23, 64 }
 0x29b   : > { %vm1246_vm11 = vcmp.eq.f32.partialorder %v4904_v49, %v1194_v21  ;;  %v5042_v9 = vsel %vm1128_vm0, %v1277_v13, 2147483647 }
 0x29c   : > { %1564 = vmin.xlane.f32.xlu0 %v5036_v18  ;;  %v1197_v51 = vpop.xlane.xlu0 %1196  ;;  %v5045_v22 = vcvt.s32.f32 %v1576_v48  ;;  %v1591_v38 = vshra.s32 %v5042_v9, 16  ;;  %v1278_v10 = vsel %vm1246_vm11, %v4968_v23, 64 }
 0x29d   : > { %vm1247_vm12 = vcmp.eq.f32.partialorder %v4894_v46, %v1197_v51  ;;  %v5051_v55 = vsel %vm1128_vm0, %v1278_v10, 2147483647 }
 0x29e   : > { %v1200_v16 = vpop.xlane.xlu1 %1199  ;;  %1579 = vmin.xlane.f32.xlu1 %v5045_v22  ;;  %v5054_v21 = vcvt.s32.f32 %v1591_v38  ;;  %v1606_v49 = vshra.s32 %v5051_v55, 16  ;;  %v1279_v13 = vsel %vm1247_vm12, %v4968_v23, 64 }
 0x29f   : > { %vm1248_vm13 = vcmp.eq.f32.partialorder %v4900_v62, %v1200_v16  ;;  %v5060_v48 = vsel %vm1128_vm0, %v1279_v13, 2147483647 }
 0x2a0   : > { %1594 = vmin.xlane.f32.xlu0 %v5054_v21  ;;  %v1203_v46 = vpop.xlane.xlu0 %1202  ;;  %v5063_v51 = vcvt.s32.f32 %v1606_v49  ;;  %v1621_v10 = vshra.s32 %v5060_v48, 16  ;;  %v1280_v40 = vsel %vm1248_vm13, %v4968_v23, 64 }
 0x2a1   : > { %vm1249_vm14 = vcmp.eq.f32.partialorder %v4914_v59, %v1203_v46  ;;  %v5069_v38 = vsel %vm1128_vm0, %v1280_v40, 2147483647 }
 0x2a2   : > { %v1206_v0 = vpop.xlane.xlu1 %1205  ;;  %1609 = vmin.xlane.f32.xlu1 %v5063_v51  ;;  %v5072_v16 = vcvt.s32.f32 %v1621_v10  ;;  %v1636_v62 = vshra.s32 %v5069_v38, 16  ;;  %v1281_v13 = vsel %vm1249_vm14, %v4968_v23, 64 }
 0x2a3   : > { %vm1250_vm15 = vcmp.eq.f32.partialorder %v4920_v39, %v1206_v0  ;;  %v5078_v49 = vsel %vm1128_vm0, %v1281_v13, 2147483647 }
 0x2a4   : > { %1624 = vmin.xlane.f32.xlu0 %v5072_v16  ;;  %v1209_v59 = vpop.xlane.xlu0 %1208  ;;  %v5081_v46 = vcvt.s32.f32 %v1636_v62  ;;  %v1651_v40 = vshra.s32 %v5078_v49, 16  ;;  %v1282_v47 = vsel %vm1250_vm15, %v4968_v23, 64 }
 0x2a5   : > { %vm1251_vm2 = vcmp.eq.f32.partialorder %v4910_v6, %v1209_v59  ;;  %v5087_v10 = vsel %vm1128_vm0, %v1282_v47, 2147483647 }
 0x2a6   : > { %v1212_v61 = vpop.xlane.xlu1 %1211  ;;  %1639 = vmin.xlane.f32.xlu1 %v5081_v46  ;;  %v5090_v0 = vcvt.s32.f32 %v1651_v40  ;;  %v1666_v39 = vshra.s32 %v5087_v10, 16  ;;  %v1283_v13 = vsel %vm1251_vm2, %v4968_v23, 64 }
 0x2a7   : > { %vm1252_vm3 = vcmp.eq.f32.partialorder %v4916_v3, %v1212_v61  ;;  %v5096_v62 = vsel %vm1128_vm0, %v1283_v13, 2147483647 }
 0x2a8   : > { %1654 = vmin.xlane.f32.xlu0 %v5090_v0  ;;  %v1215_v6 = vpop.xlane.xlu0 %1214  ;;  %v5099_v59 = vcvt.s32.f32 %v1666_v39  ;;  %v1681_v47 = vshra.s32 %v5096_v62, 16  ;;  %v1284_v43 = vsel %vm1252_vm3, %v4968_v23, 64 }
 0x2a9   : > { %vm1253_vm4 = vcmp.eq.f32.partialorder %v4930_v44, %v1215_v6  ;;  %v5105_v40 = vsel %vm1128_vm0, %v1284_v43, 2147483647 }
 0x2aa   : > { %1669 = vmin.xlane.f32.xlu1 %v5099_v59  ;;  %v1218_v61 = vpop.xlane.xlu1 %1217  ;;  %v5108_v3 = vcvt.s32.f32 %v1681_v47  ;;  %v1696_v13 = vshra.s32 %v5105_v40, 16  ;;  %v1285_v28 = vsel %vm1253_vm4, %v4968_v23, 64 }
 0x2ab   : > { %vm1254_vm5 = vcmp.eq.f32.partialorder %v4936_v27, %v1218_v61  ;;  %v5114_v39 = vsel %vm1128_vm0, %v1285_v28, 2147483647 }
 0x2ac   : > { %1684 = vmin.xlane.f32.xlu0 %v5108_v3  ;;  %v1221_v44 = vpop.xlane.xlu0 %1220  ;;  %v5117_v6 = vcvt.s32.f32 %v1696_v13  ;;  %v1711_v43 = vshra.s32 %v5114_v39, 16  ;;  %v1286_v53 = vsel %vm1254_vm5, %v4968_v23, 64 }
 0x2ad   : > { %vm1255_vm6 = vcmp.eq.f32.partialorder %v4926_v12, %v1221_v44  ;;  %v5123_v47 = vsel %vm1128_vm0, %v1286_v53, 2147483647 }
 0x2ae   : > { %1699 = vmin.xlane.f32.xlu1 %v5117_v6  ;;  %v1224_v27 = vpop.xlane.xlu1 %1223  ;;  %v5126_v61 = vcvt.s32.f32 %v1711_v43  ;;  %v1726_v28 = vshra.s32 %v5123_v47, 16  ;;  %v1287_v36 = vsel %vm1255_vm6, %v4968_v23, 64 }
 0x2af   : > { %vm1256_vm7 = vcmp.eq.f32.partialorder %v4932_v32, %v1224_v27  ;;  %v5132_v13 = vsel %vm1128_vm0, %v1287_v36, 2147483647 }
 0x2b0   : > { %1714 = vmin.xlane.f32.xlu0 %v5126_v61  ;;  %v1131_v12 = vpop.xlane.xlu0 %1130  ;;  %v5135_v44 = vcvt.s32.f32 %v1726_v28  ;;  %v1741_v53 = vshra.s32 %v5132_v13, 16  ;;  %v1288_v1 = vsel %vm1256_vm7, %v4968_v23, 64 }
 0x2b1   : > { %vm1225_vm8 = vcmp.eq.f32.partialorder %v4842_v57, %v1131_v12  ;;  %v5141_v43 = vsel %vm1128_vm0, %v1288_v1, 2147483647 }
 0x2b2   : > { %1729 = vmin.xlane.f32.xlu1 %v5135_v44  ;;  %v1134_v32 = vpop.xlane.xlu1 %1133  ;;  %v5144_v27 = vcvt.s32.f32 %v1741_v53  ;;  %v1756_v36 = vshra.s32 %v5141_v43, 16  ;;  %v1257_v63 = vsel %vm1225_vm8, %v4968_v23, 64 }
 0x2b3   : > { %vm1226_vm9 = vcmp.eq.f32.partialorder %v4846_v37, %v1134_v32  ;;  %v5150_v28 = vsel %vm1128_vm0, %v1257_v63, 2147483647 }
 0x2b4   : > { %1744 = vmin.xlane.f32.xlu0 %v5144_v27  ;;  %v1137_v57 = vpop.xlane.xlu0 %1136  ;;  %v5153_v12 = vcvt.s32.f32 %v1756_v36  ;;  %v1291_v1 = vshra.s32 %v5150_v28, 16  ;;  %v1258_v19 = vsel %vm1226_vm9, %v4968_v23, 64 }
 0x2b5   : > { %vm1227_vm10 = vcmp.eq.f32.partialorder %v4840_v4, %v1137_v57  ;;  %v5159_v53 = vsel %vm1128_vm0, %v1258_v19, 2147483647 }
 0x2b6   : > { %1759 = vmin.xlane.f32.xlu1 %v5153_v12  ;;  %v1140_v37 = vpop.xlane.xlu1 %1139  ;;  %v5162_v32 = vcvt.s32.f32 %v1291_v1  ;;  %v1306_v63 = vshra.s32 %v5159_v53, 16  ;;  %v1259_v31 = vsel %vm1227_vm10, %v4968_v23, 64 }
 0x2b7   : > { %vm1228_vm11 = vcmp.eq.f32.partialorder %v4844_v24, %v1140_v37  ;;  %v5168_v36 = vsel %vm1128_vm0, %v1259_v31, 2147483647 }
 0x2b8   : > { %1294 = vmin.xlane.f32.xlu0 %v5162_v32  ;;  %v1143_v4 = vpop.xlane.xlu0 %1142  ;;  %v5171_v57 = vcvt.s32.f32 %v1306_v63  ;;  %v1321_v19 = vshra.s32 %v5168_v36, 16  ;;  %v1260_v26 = vsel %vm1228_vm11, %v4968_v23, 64 }
 0x2b9   : > { %vm1229_vm12 = vcmp.eq.f32.partialorder %v4850_v11, %v1143_v4  ;;  %v5177_v1 = vsel %vm1128_vm0, %v1260_v26, 2147483647 }
 0x2ba   : > { %6147 = vst [vmem:[#allocation46_spill] sm:$0xff] %v5171_v57  ;;  %v1261_v8 = vsel %vm1229_vm12, %v4968_v23, 64  ;;  %1309 = vmin.xlane.f32.xlu1 %v5171_v57  ;;  %v1146_v31 = vpop.xlane.xlu1 %1145  ;;  %v5181_v24 = vcvt.s32.f32 %v1321_v19  ;;  %v1336_v37 = vshra.s32 %v5177_v1, 16 }
 0x2bb   : > { %vm1230_vm13 = vcmp.eq.f32.partialorder %v4854_v17, %v1146_v31  ;;  %v5186_v63 = vsel %vm1128_vm0, %v1261_v8, 2147483647 }
 0x2bc   : > { %6148 = vst [vmem:[#allocation47_spill] sm:$0xff] %v5181_v24  ;;  %1324 = vmin.xlane.f32.xlu0 %v5181_v24  ;;  %v1149_v11 = vpop.xlane.xlu0 %1148  ;;  %v5189_v4 = vcvt.s32.f32 %v1336_v37  ;;  %v1351_v26 = vshra.s32 %v5186_v63, 16  ;;  %v1262_v41 = vsel %vm1230_vm13, %v4968_v23, 64 }
 0x2bd   : > { %vm1231_vm14 = vcmp.eq.f32.partialorder %v4848_v29, %v1149_v11  ;;  %v5195_v19 = vsel %vm1128_vm0, %v1262_v41, 2147483647 }
 0x2be   : > { %6149 = vst [vmem:[#allocation48_spill] sm:$0xff] %v5189_v4  ;;  %v1263_v57 = vsel %vm1231_vm14, %v4968_v23, 64  ;;  %1339 = vmin.xlane.f32.xlu1 %v5189_v4  ;;  %v1152_v8 = vpop.xlane.xlu1 %1151  ;;  %v5199_v17 = vcvt.s32.f32 %v1351_v26  ;;  %v1366_v31 = vshra.s32 %v5195_v19, 16 }
 0x2bf   : > { %vm1232_vm15 = vcmp.eq.f32.partialorder %v4852_v7, %v1152_v8  ;;  %v5204_v37 = vsel %vm1128_vm0, %v1263_v57, 2147483647 }
 0x2c0   : > { %6150 = vst [vmem:[#allocation49_spill] sm:$0xff] %v5199_v17  ;;  %1354 = vmin.xlane.f32.xlu0 %v5199_v17  ;;  %v1155_v29 = vpop.xlane.xlu0 %1154  ;;  %v5207_v11 = vcvt.s32.f32 %v1366_v31  ;;  %v1381_v41 = vshra.s32 %v5204_v37, 16  ;;  %v1264_v24 = vsel %vm1232_vm15, %v4968_v23, 64 }
 0x2c1   : > { %vm1233_vm2 = vcmp.eq.f32.partialorder %v4858_v52, %v1155_v29  ;;  %v5213_v26 = vsel %vm1128_vm0, %v1264_v24, 2147483647 }
 0x2c2   : > { %6151 = vst [vmem:[#allocation50_spill] sm:$0xff] %v5207_v11  ;;  %v1265_v4 = vsel %vm1233_vm2, %v4968_v23, 64  ;;  %1369 = vmin.xlane.f32.xlu1 %v5207_v11  ;;  %v1158_v7 = vpop.xlane.xlu1 %1157  ;;  %v5217_v57 = vcvt.s32.f32 %v1381_v41  ;;  %v1396_v8 = vshra.s32 %v5213_v26, 16 }
 0x2c3   : > { %vm1234_vm3 = vcmp.eq.f32.partialorder %v4862_v2, %v1158_v7  ;;  %v5222_v31 = vsel %vm1128_vm0, %v1265_v4, 2147483647 }
 0x2c4   : > { %1384 = vmin.xlane.f32.xlu0 %v5217_v57  ;;  %v1161_v52 = vpop.xlane.xlu0 %1160  ;;  %v5225_v29 = vcvt.s32.f32 %v1396_v8  ;;  %v1411_v24 = vshra.s32 %v5222_v31, 16  ;;  %v1266_v17 = vsel %vm1234_vm3, %v4968_v23, 64 }
 0x2c5   : > { %vm1235_vm4 = vcmp.eq.f32.partialorder %v4856_v35, %v1161_v52  ;;  %v5231_v41 = vsel %vm1128_vm0, %v1266_v17, 2147483647 }
 0x2c6   : > { %6152 = vst [vmem:[#allocation51_spill] sm:$0xff] %v5225_v29  ;;  %v1267_v11 = vsel %vm1235_vm4, %v4968_v23, 64  ;;  %1399 = vmin.xlane.f32.xlu1 %v5225_v29  ;;  %v1164_v2 = vpop.xlane.xlu1 %1163  ;;  %v5235_v4 = vcvt.s32.f32 %v1411_v24  ;;  %v1426_v7 = vshra.s32 %v5231_v41, 16 }
 0x2c7   : > { %vm1236_vm5 = vcmp.eq.f32.partialorder %v4860_v15, %v1164_v2  ;;  %v5240_v8 = vsel %vm1128_vm0, %v1267_v11, 2147483647  ;;  %v3704_v2 = vld [vmem:[%s6035_s3] sm:$0xff]  }
 0x2c8   : > { %1414 = vmin.xlane.f32.xlu0 %v5235_v4  ;;  %v5243_v35 = vcvt.s32.f32 %v1426_v7  ;;  %v1441_v17 = vshra.s32 %v5240_v8, 16  ;;  %v1268_v52 = vsel %vm1236_vm5, %v4968_v23, 64  ;;  %3500 = vmatprep.subr.bf16.mxu0 %v3704_v2  ;;  %v1470_v7 = vand.u32 65535, %v4974_v33 }
 0x2c9   : > { %v5248_v29 = vsel %vm1128_vm0, %v1268_v52, 2147483647  ;;  %3580 = vmatprep.subr.bf16.mxu1 %v3704_v2  ;;  %3501 = vmatpush3.bf16.msra.mxu0 %v3704_v2  ;;  %v1500_v52 = vand.u32 65535, %v4988_v20  ;;  %v1530_v33 = vand.u32 65535, %v5006_v5 }
 0x2ca   : > { %6153 = vst [vmem:[#allocation52_spill] sm:$0xff] %v5243_v35  ;;  %6154 = vst [vmem:[#allocation53_spill] sm:$0xff] %v5248_v29  ;;  %1429 = vmin.xlane.f32.xlu1 %v5243_v35  ;;  %v5251_v24 = vcvt.s32.f32 %v1441_v17  ;;  %v1456_v15 = vshra.s32 %v5248_v29, 16  ;;  %3584 = vmatpush3.bf16.msra.mxu1 %v3704_v2  ;;  %v1485_v17 = vand.u32 65535, %v4980_v30 }
 0x2cb   : > { %v1502_v2 = vcvt.s32.f32 %v1500_v52 }
 0x2cc   : > { %6155 = vst [vmem:[#allocation54_spill] sm:$0xff] %v5251_v24  ;;  %1444 = vmin.xlane.f32.xlu0 %v5251_v24  ;;  %v5255_v11 = vcvt.s32.f32 %v1456_v15  ;;  %v1472_v15 = vcvt.s32.f32 %v1470_v7  ;;  %v1487_v29 = vcvt.s32.f32 %v1485_v17 }
 0x2ce   : > { %6156 = vst [vmem:[#allocation55_spill] sm:$0xff] %v5255_v11  ;;  %1459 = vmin.xlane.f32.xlu1 %v5255_v11  ;;  %v1515_v11 = vand.u32 65535, %v4997_v60 }
 0x2d0   : > { %v1517_v17 = vcvt.s32.f32 %v1515_v11 }
 0x31d   : > { %v5264_v23 = vpop.xlane.xlu0 %1474 }
 0x31e   : > { %vm1476_vm6 = vcmp.eq.f32.partialorder %v4982_v56, %v5264_v23  ;;  %v1545_v56 = vand.u32 65535, %v5015_v34 }
 0x31f   : > { %v5269_v24 = vpop.xlane.xlu1 %1489  ;;  %v1477_v35 = vsel %vm1476_vm6, %v1472_v15, inf }
 0x320   : > { %1478 = vmin.xlane.f32.xlu0 %v1477_v35  ;;  %vm1491_vm7 = vcmp.eq.f32.partialorder %v4991_v54, %v5269_v24  ;;  %v1560_v54 = vand.u32 65535, %v5024_v25  ;;  %v1532_v35 = vcvt.s32.f32 %v1530_v33  ;;  %v1547_v11 = vcvt.s32.f32 %v1545_v56 }
 0x321   : > { %v5274_v30 = vpop.xlane.xlu0 %1504  ;;  %v1492_v20 = vsel %vm1491_vm7, %v1487_v29, inf }
 0x322   : > { %vm1506_vm8 = vcmp.eq.f32.partialorder %v5000_v14, %v5274_v30  ;;  %1493 = vmin.xlane.f32.xlu1 %v1492_v20  ;;  %v1575_v14 = vand.u32 65535, %v5033_v50  ;;  %v1562_v33 = vcvt.s32.f32 %v1560_v54 }
 0x323   : > { %v5279_v60 = vpop.xlane.xlu1 %1519  ;;  %v1507_v7 = vsel %vm1506_vm8, %v1502_v2, inf }
 0x324   : > { %1508 = vmin.xlane.f32.xlu0 %v1507_v7  ;;  %vm1521_vm9 = vcmp.eq.f32.partialorder %v5009_v45, %v5279_v60  ;;  %v1590_v45 = vand.u32 65535, %v5042_v9  ;;  %v1577_v2 = vcvt.s32.f32 %v1575_v14 }
 0x325   : > { %v5284_v5 = vpop.xlane.xlu0 %1534  ;;  %v1522_v29 = vsel %vm1521_vm9, %v1517_v17, inf }
 0x326   : > { %vm1536_vm10 = vcmp.eq.f32.partialorder %v5018_v58, %v5284_v5  ;;  %1523 = vmin.xlane.f32.xlu1 %v1522_v29  ;;  %v1605_v58 = vand.u32 65535, %v5051_v55  ;;  %v1592_v7 = vcvt.s32.f32 %v1590_v45 }
 0x327   : > { %v5289_v34 = vpop.xlane.xlu1 %1549  ;;  %v1537_v52 = vsel %vm1536_vm10, %v1532_v35, inf }
 0x328   : > { %vm1551_vm11 = vcmp.eq.f32.partialorder %v5027_v42, %v5289_v34  ;;  %1538 = vmin.xlane.f32.xlu0 %v1537_v52  ;;  %v1620_v42 = vand.u32 65535, %v5060_v48  ;;  %v1607_v54 = vcvt.s32.f32 %v1605_v58 }
 0x329   : > { %v5294_v25 = vpop.xlane.xlu0 %1564  ;;  %v1552_v15 = vsel %vm1551_vm11, %v1547_v11, inf }
 0x32a   : > { %vm1566_vm12 = vcmp.eq.f32.partialorder %v5036_v18, %v5294_v25  ;;  %1553 = vmin.xlane.f32.xlu1 %v1552_v15  ;;  %v1635_v18 = vand.u32 65535, %v5069_v38  ;;  %v1622_v35 = vcvt.s32.f32 %v1620_v42  ;;  %v1665_v38 = vand.u32 65535, %v5087_v10  ;;  %v3706_v10 = vld [vmem:[%s6035_s3 + $0x10] sm:$0xff]  }
 0x32b   : > { %v5299_v50 = vpop.xlane.xlu1 %1579  ;;  %v1567_v20 = vsel %vm1566_vm12, %v1562_v33, inf  ;;  %v1695_v15 = vand.u32 65535, %v5105_v40  ;;  %v3707_v40 = vld [vmem:[%s6035_s3 + $0x18] sm:$0xff]   ;;  %v1725_v42 = vand.u32 65535, %v5123_v47  ;;  %v1755_v47 = vand.u32 65535, %v5141_v43 }
 0x32c   : > { %vm1581_vm13 = vcmp.eq.f32.partialorder %v5045_v22, %v5299_v50  ;;  %1568 = vmin.xlane.f32.xlu0 %v1567_v20  ;;  %v1650_v22 = vand.u32 65535, %v5078_v49  ;;  %v1637_v52 = vcvt.s32.f32 %v1635_v18  ;;  %v1680_v49 = vand.u32 65535, %v5096_v62 }
 0x32d   : > { %v5304_v9 = vpop.xlane.xlu0 %1594  ;;  %v1582_v56 = vsel %vm1581_vm13, %v1577_v2, inf  ;;  %v1667_v58 = vcvt.s32.f32 %v1665_v38  ;;  %v1710_v62 = vand.u32 65535, %v5114_v39  ;;  %v1740_v39 = vand.u32 65535, %v5132_v13 }
 0x32e   : > { %vm1596_vm14 = vcmp.eq.f32.partialorder %v5054_v21, %v5304_v9  ;;  %1583 = vmin.xlane.f32.xlu1 %v1582_v56  ;;  %v3705_v21 = vld [vmem:[%s6035_s3 + $0x8] sm:$0xff]  }
 0x32f   : > { %v5309_v55 = vpop.xlane.xlu1 %1609  ;;  %v1597_v17 = vsel %vm1596_vm14, %v1592_v7, inf  ;;  %3581 = vmatprep.subr.bf16.mxu1 %v3705_v21  ;;  %3502 = vmatprep.subr.bf16.mxu0 %v3705_v21  ;;  %v1697_v7 = vcvt.s32.f32 %v1695_v15 }
 0x330   : > { %vm1611_vm15 = vcmp.eq.f32.partialorder %v5063_v51, %v5309_v55  ;;  %1598 = vmin.xlane.f32.xlu0 %v1597_v17  ;;  %3585 = vmatpush3.bf16.msra.mxu1 %v3705_v21 }
 0x331   : > { %v5314_v48 = vpop.xlane.xlu0 %1624  ;;  %v1612_v29 = vsel %vm1611_vm15, %v1607_v54, inf  ;;  %3503 = vmatpush3.bf16.msra.mxu0 %v3705_v21  ;;  %3582 = vmatprep.subr.bf16.mxu1 %v3706_v10  ;;  %v1742_v21 = vcvt.s32.f32 %v1740_v39  ;;  %v6160_v39 = vld [vmem:[#allocation49_spill] sm:$0xff] }
 0x332   : > { %vm1626_vm2 = vcmp.eq.f32.partialorder %v5072_v16, %v5314_v48  ;;  %1613 = vmin.xlane.f32.xlu1 %v1612_v29  ;;  %v1652_v16 = vcvt.s32.f32 %v1650_v22  ;;  %3504 = vmatprep.subr.bf16.mxu0 %v3706_v10  ;;  %v1727_v29 = vcvt.s32.f32 %v1725_v42 }
 0x333   : > { %v5322_v14 = vpop.xlane.xlu1 %1639  ;;  %v1627_v51 = vsel %vm1626_vm2, %v1622_v35, inf }
 0x334   : > { %vm1641_vm3 = vcmp.eq.f32.partialorder %v5081_v46, %v5322_v14  ;;  %1628 = vmin.xlane.f32.xlu0 %v1627_v51  ;;  %3586 = vmatpush3.bf16.msra.mxu1 %v3706_v10  ;;  %v1757_v51 = vcvt.s32.f32 %v1755_v47 }
 0x335   : > { %v5327_v11 = vpop.xlane.xlu0 %1654  ;;  %v1642_v45 = vsel %vm1641_vm3, %v1637_v52, inf  ;;  %3505 = vmatpush3.bf16.msra.mxu0 %v3706_v10  ;;  %3583 = vmatprep.subr.bf16.mxu1 %v3707_v40 }
 0x336   : > { %vm1656_vm4 = vcmp.eq.f32.partialorder %v5090_v0, %v5327_v11  ;;  %1643 = vmin.xlane.f32.xlu1 %v1642_v45  ;;  %v1682_v0 = vcvt.s32.f32 %v1680_v49  ;;  %3506 = vmatprep.subr.bf16.mxu0 %v3707_v40 }
 0x337   : > { %v5335_v46 = vpop.xlane.xlu1 %1669  ;;  %v1657_v33 = vsel %vm1656_vm4, %v1652_v16, inf }
 0x338   : > { %vm1671_vm5 = vcmp.eq.f32.partialorder %v5099_v59, %v5335_v46  ;;  %1658 = vmin.xlane.f32.xlu0 %v1657_v33  ;;  %3587 = vmatpush3.bf16.msra.mxu1 %v3707_v40 }
 0x339   : > { %v5340_v20 = vpop.xlane.xlu0 %1684  ;;  %v1672_v2 = vsel %vm1671_vm5, %v1667_v58, inf  ;;  %3507 = vmatpush3.bf16.msra.mxu0 %v3707_v40  ;;  %v6159_v40 = vld [vmem:[#allocation48_spill] sm:$0xff] }
 0x33a   : > { %vm1686_vm6 = vcmp.eq.f32.partialorder %v5108_v3, %v5340_v20  ;;  %1673 = vmin.xlane.f32.xlu1 %v1672_v2  ;;  %v1712_v3 = vcvt.s32.f32 %v1710_v62  ;;  %v6158_v62 = vld [vmem:[#allocation47_spill] sm:$0xff] }
 0x33b   : > { %v5348_v59 = vpop.xlane.xlu1 %1699  ;;  %v1687_v56 = vsel %vm1686_vm6, %v1682_v0, inf }
 0x33c   : > { %vm1701_vm7 = vcmp.eq.f32.partialorder %v5117_v6, %v5348_v59  ;;  %1688 = vmin.xlane.f32.xlu0 %v1687_v56  ;;  %v1290_v6 = vand.u32 65535, %v5150_v28  ;;  %v1320_v28 = vand.u32 65535, %v5168_v36  ;;  %v1350_v36 = vand.u32 65535, %v5186_v63 }
 0x33d   : > { %v5353_v18 = vpop.xlane.xlu0 %1714  ;;  %v1702_v17 = vsel %vm1701_vm7, %v1697_v7, inf  ;;  %v1380_v63 = vand.u32 65535, %v5204_v37  ;;  %v1410_v37 = vand.u32 65535, %v5222_v31  ;;  %v1440_v31 = vand.u32 65535, %v5240_v8 }
 0x33e   : > { %vm1716_vm8 = vcmp.eq.f32.partialorder %v5126_v61, %v5353_v18  ;;  %1703 = vmin.xlane.f32.xlu1 %v1702_v17  ;;  %v1305_v61 = vand.u32 65535, %v5159_v53  ;;  %v1292_v49 = vcvt.s32.f32 %v1290_v6  ;;  %v1335_v53 = vand.u32 65535, %v5177_v1 }
 0x33f   : > { %v5358_v54 = vpop.xlane.xlu1 %1729  ;;  %v1717_v22 = vsel %vm1716_vm8, %v1712_v3, inf  ;;  %v1322_v58 = vcvt.s32.f32 %v1320_v28  ;;  %v1352_v7 = vcvt.s32.f32 %v1350_v36 }
 0x340   : > { %vm1731_vm9 = vcmp.eq.f32.partialorder %v5135_v44, %v5358_v54  ;;  %1718 = vmin.xlane.f32.xlu0 %v1717_v22  ;;  %v5373_v44 = vld [vmem:[%s6034_s2] sm:$0xff]   ;;  %v1307_v10 = vcvt.s32.f32 %v1305_v61  ;;  %v1337_v0 = vcvt.s32.f32 %v1335_v53  ;;  %v6161_v22 = vld [vmem:[#allocation50_spill] sm:$0xff] }
 0x341   : > { %v5363_v13 = vpop.xlane.xlu0 %1744  ;;  %v1732_v35 = vsel %vm1731_vm9, %v1727_v29, inf  ;;  %3540 = vmatprep.subr.bf16.mxu1 %v5373_v44 }
 0x342   : > { %vm1746_vm10 = vcmp.eq.f32.partialorder %v5144_v27, %v5363_v13  ;;  %1733 = vmin.xlane.f32.xlu1 %v1732_v35  ;;  %v1382_v35 = vcvt.s32.f32 %v1380_v63  ;;  %v3990_v63 = vmov 1  }
 0x343   : > { %v5368_v43 = vpop.xlane.xlu1 %1759  ;;  %v1747_v38 = vsel %vm1746_vm10, %v1742_v21, inf }
 0x344   : > { %vm1761_vm11 = vcmp.eq.f32.partialorder %v5153_v12, %v5368_v43  ;;  %1748 = vmin.xlane.f32.xlu0 %v1747_v38  ;;  %v6157_v12 = vld [vmem:[#allocation46_spill] sm:$0xff] }
 0x345   : > { %v5378_v52 = vpop.xlane.xlu0 %1294  ;;  %v1762_v27 = vsel %vm1761_vm11, %v1757_v51, inf  ;;  %v6162_v51 = vld [vmem:[#allocation51_spill] sm:$0xff] }
 0x346   : > { %vm1296_vm12 = vcmp.eq.f32.partialorder %v5162_v32, %v5378_v52  ;;  %1763 = vmin.xlane.f32.xlu1 %v1762_v27  ;;  %v1365_v32 = vand.u32 65535, %v5195_v19  ;;  %v1395_v19 = vand.u32 65535, %v5213_v26  ;;  %v1425_v26 = vand.u32 65535, %v5231_v41 }
 0x347   : > { %v5384_v45 = vpop.xlane.xlu1 %1309  ;;  %v1297_v16 = vsel %vm1296_vm12, %v1292_v49, inf  ;;  %v1412_v49 = vcvt.s32.f32 %v1410_v37 }
 0x348   : > { %vm1311_vm13 = vcmp.eq.f32.partialorder %v6157_v12, %v5384_v45  ;;  %1298 = vmin.xlane.f32.xlu0 %v1297_v16  ;;  %v1367_v47 = vcvt.s32.f32 %v1365_v32  ;;  %v1397_v38 = vcvt.s32.f32 %v1395_v19  ;;  %v6164_v12 = vld [vmem:[#allocation52_spill] sm:$0xff]  ;;  %v1526_v19 = vcvt.f32.s32 %v5279_v60 }
 0x349   : > { %v5389_v15 = vpop.xlane.xlu0 %1324  ;;  %v1312_v33 = vsel %vm1311_vm13, %v1307_v10, inf  ;;  %v1427_v10 = vcvt.s32.f32 %v1425_v26 }
 0x34a   : > { %vm1326_vm14 = vcmp.eq.f32.partialorder %v6158_v62, %v5389_v15  ;;  %1313 = vmin.xlane.f32.xlu1 %v1312_v33  ;;  %v1442_v33 = vcvt.s32.f32 %v1440_v31  ;;  %v1527_v60 = vshll.u32 %v1526_v19, 16  ;;  %v1616_v31 = vcvt.f32.s32 %v5309_v55 }
 0x34b   : > { %v5394_v1 = vpop.xlane.xlu1 %1339  ;;  %v1327_v2 = vsel %vm1326_vm14, %v1322_v58, inf  ;;  %v6165_v58 = vld [vmem:[#allocation54_spill] sm:$0xff] }
 0x34c   : > { %vm1341_vm15 = vcmp.eq.f32.partialorder %v6159_v40, %v5394_v1  ;;  %1328 = vmin.xlane.f32.xlu0 %v1327_v2  ;;  %v6166_v2 = vld [vmem:[#allocation55_spill] sm:$0xff]  ;;  %v3989_v40 = vmov 0  }
 0x34d   : > { %v5399_v42 = vpop.xlane.xlu0 %1354  ;;  %v1342_v56 = vsel %vm1341_vm15, %v1337_v0, inf  ;;  %3695 = vset.pattern.permute.xlu1 %v3989_v40  ;;  %3694 = vset.pattern.permute.xlu0 %v3989_v40  ;;  %v1661_v40 = vcvt.f32.s32 %v5327_v11  ;;  %v1676_v11 = vcvt.f32.s32 %v5335_v46 }
 0x34e   : > { %vm1356_vm2 = vcmp.eq.f32.partialorder %v6160_v39, %v5399_v42  ;;  %1343 = vmin.xlane.f32.xlu1 %v1342_v56  ;;  %v1481_v56 = vcvt.f32.s32 %v5264_v23  ;;  %v1511_v39 = vcvt.f32.s32 %v5274_v30  ;;  %v1601_v30 = vcvt.f32.s32 %v5304_v9 }
 0x34f   : > { %v5404_v17 = vpop.xlane.xlu1 %1369  ;;  %v1357_v3 = vsel %vm1356_vm2, %v1352_v7, inf  ;;  %v1496_v7 = vcvt.f32.s32 %v5269_v24  ;;  %v1586_v24 = vcvt.f32.s32 %v5299_v50 }
 0x350   : > { %vm1371_vm3 = vcmp.eq.f32.partialorder %v6161_v22, %v5404_v17  ;;  %1358 = vmin.xlane.f32.xlu0 %v1357_v3  ;;  %v1541_v3 = vcvt.f32.s32 %v5284_v5  ;;  %v1482_v37 = vshll.u32 %v1481_v56, 16  ;;  %v1512_v26 = vshll.u32 %v1511_v39, 16 }
 0x351   : > { %v5409_v29 = vpop.xlane.xlu0 %1384  ;;  %v1372_v6 = vsel %vm1371_vm3, %v1367_v47, inf  ;;  %v1556_v47 = vcvt.f32.s32 %v5289_v34  ;;  %v1497_v23 = vshll.u32 %v1496_v7, 16  ;;  %v3991_v39 = vmov 0.0  }
 0x352   : > { %vm1386_vm4 = vcmp.eq.f32.partialorder %v5217_v57, %v5409_v29  ;;  %1373 = vmin.xlane.f32.xlu1 %v1372_v6  ;;  %v6163_v57 = vld [vmem:[#allocation53_spill] sm:$0xff]  ;;  %v1571_v6 = vcvt.f32.s32 %v5294_v25  ;;  %v1631_v25 = vcvt.f32.s32 %v5314_v48 }
 0x353   : > { %v5414_v21 = vpop.xlane.xlu1 %1399  ;;  %v1387_v61 = vsel %vm1386_vm4, %v1382_v35, inf  ;;  %v1455_v41 = vand.u32 65535, %v6163_v57  ;;  %v1557_v34 = vshll.u32 %v1556_v47, 16 }
 0x354   : > { %vm1401_vm5 = vcmp.eq.f32.partialorder %v6162_v51, %v5414_v21  ;;  %1388 = vmin.xlane.f32.xlu0 %v1387_v61  ;;  %v1572_v9 = vshll.u32 %v1571_v6, 16 }
 0x355   : > { %v5419_v28 = vpop.xlane.xlu0 %1414  ;;  %v1402_v27 = vsel %vm1401_vm5, %v1397_v38, inf  ;;  %v1457_v32 = vcvt.s32.f32 %v1455_v41  ;;  %v1542_v38 = vshll.u32 %v1541_v3, 16  ;;  %v1587_v41 = vshll.u32 %v1586_v24, 16 }
 0x356   : > { %vm1416_vm6 = vcmp.eq.f32.partialorder %v5235_v4, %v5419_v28  ;;  %1403 = vmin.xlane.f32.xlu1 %v1402_v27  ;;  %v1646_v27 = vcvt.f32.s32 %v5322_v14  ;;  %v5515_v24 = vshll.u32 %v1661_v40, 16  ;;  %v3710_v40 = vld [vmem:[%s6034_s2 + $0x10] sm:$0xff]  }
 0x357   : > { %v5424_v53 = vpop.xlane.xlu1 %1429  ;;  %v1417_v16 = vsel %vm1416_vm6, %v1412_v49, inf }
 0x358   : > { %vm1431_vm7 = vcmp.eq.f32.partialorder %v6164_v12, %v5424_v53  ;;  %1418 = vmin.xlane.f32.xlu0 %v1417_v16  ;;  %v5484_v16 = vshll.u32 %v1601_v30, 16  ;;  %v6167_v12 = vld [vmem:[#allocation45_spill] sm:$0xff] }
 0x359   : > { %v5428_v36 = vpop.xlane.xlu0 %1444  ;;  %v1432_v8 = vsel %vm1431_vm7, %v1427_v10, inf }
 0x35a   : > { %vm1446_vm8 = vcmp.eq.f32.partialorder %v6165_v58, %v5428_v36  ;;  %1433 = vmin.xlane.f32.xlu1 %v1432_v8  ;;  %v5490_v8 = vshll.u32 %v1616_v31, 16  ;;  %v5494_v58 = vshll.u32 %v1646_v27, 16  ;;  %v3709_v27 = vld [vmem:[%s6034_s2 + $0x8] sm:$0xff]  }
 0x35b   : > { %v5432_v4 = vpop.xlane.xlu1 %1459  ;;  %v1447_v62 = vsel %vm1446_vm8, %v1442_v33, inf  ;;  %v5492_v33 = vshll.u32 %v1631_v25, 16 }
 0x35c   : > { %vm1461_vm9 = vcmp.eq.f32.partialorder %v6166_v2, %v5432_v4  ;;  %1448 = vmin.xlane.f32.xlu0 %v1447_v62 }
 0x35d   : > { %v1462_v0 = vsel %vm1461_vm9, %v1457_v32, inf }
 0x35e   : > { %1463 = vmin.xlane.f32.xlu1 %v1462_v0 }
 0x36f   : > { %2741 = vperm.xlu1 %3695, %v3990_v63  }
 0x372   : > { %2738 = vperm.xlu0 %3694, %v3990_v63  }
 0x373   : > { %2744 = vperm.xlu1 %3695, %v3990_v63  }
 0x376   : > { %2765 = vperm.xlu0 %3694, %v3990_v63  }
 0x377   : > { %2747 = vperm.xlu1 %3695, %v3990_v63  }
 0x37a   : > { %2771 = vperm.xlu0 %3694, %v3990_v63  }
 0x37b   : > { %2750 = vperm.xlu1 %3695, %v3990_v63  }
 0x37e   : > { %2777 = vperm.xlu0 %3694, %v3990_v63  }
 0x37f   : > { %2753 = vperm.xlu1 %3695, %v3990_v63  }
 0x382   : > { %2783 = vperm.xlu0 %3694, %v3990_v63  }
 0x383   : > { %2756 = vperm.xlu1 %3695, %v3990_v63  }
 0x386   : > { %2789 = vperm.xlu0 %3694, %v3990_v63  }
 0x387   : > { %2759 = vperm.xlu1 %3695, %v3990_v63  }
 0x38a   : > { %2795 = vperm.xlu0 %3694, %v3990_v63  }
 0x38b   : > { %2762 = vperm.xlu1 %3695, %v3990_v63  }
 0x38e   : > { %2801 = vperm.xlu0 %3694, %v3990_v63  }
 0x38f   : > { %2768 = vperm.xlu1 %3695, %v3990_v63  }
 0x392   : > { %2807 = vperm.xlu0 %3694, %v3990_v63  }
 0x393   : > { %2774 = vperm.xlu1 %3695, %v3990_v63  }
 0x396   : > { %2813 = vperm.xlu0 %3694, %v3990_v63  }
 0x397   : > { %2780 = vperm.xlu1 %3695, %v3990_v63  }
 0x39a   : > { %2819 = vperm.xlu0 %3694, %v3990_v63  }
 0x39b   : > { %2786 = vperm.xlu1 %3695, %v3990_v63  }
 0x39e   : > { %2825 = vperm.xlu0 %3694, %v3990_v63  }
 0x39f   : > { %2792 = vperm.xlu1 %3695, %v3990_v63  }
 0x3a2   : > { %2831 = vperm.xlu0 %3694, %v3990_v63  }
 0x3a3   : > { %2798 = vperm.xlu1 %3695, %v3990_v63  }
 0x3a7   : > { %2804 = vperm.xlu1 %3695, %v3990_v63  }
 0x3ab   : > { %2810 = vperm.xlu1 %3695, %v3990_v63  }
 0x3ad   : > { %v1479_v22 = vpop.xlane.xlu0 %1478 }
 0x3ae   : > { %v1480_v35 = vcvt.f32.s32 %v1479_v22 }
 0x3af   : > { %v1494_v61 = vpop.xlane.xlu1 %1493  ;;  %2816 = vperm.xlu1 %3695, %v3990_v63  }
 0x3b0   : > { %v1483_v5 = vadd.s32 %v1482_v37, %v1480_v35  ;;  %v1495_v51 = vcvt.f32.s32 %v1494_v61  ;;  %v1691_v37 = vcvt.f32.s32 %v5340_v20 }
 0x3b1   : > { %v1509_v50 = vpop.xlane.xlu0 %1508 }
 0x3b2   : > { %vm1793_vm10 = vcmp.lt.s32.totalorder %v1483_v5, 63  ;;  %v1498_v49 = vadd.s32 %v1497_v23, %v1495_v51  ;;  %v1510_v57 = vcvt.f32.s32 %v1509_v50  ;;  %v5528_v51 = vshll.u32 %v1691_v37, 16 }
 0x3b3   : > { %v1524_v10 = vpop.xlane.xlu1 %1523  ;;  %v1794_v55 = vsel %vm1793_vm10, %v1483_v5, 63  ;;  %2822 = vperm.xlu1 %3695, %v3990_v63   ;;  %v5526_v5 = vshll.u32 %v1676_v11, 16 }
 0x3b4   : > { %vm1795_vm11 = vcmp.lt.s32.totalorder %v1498_v49, 63  ;;  %v1513_v48 = vadd.s32 %v1512_v26, %v1510_v57  ;;  %v1525_v14 = vcvt.f32.s32 %v1524_v10  ;;  %vm1845_vm12 = vcmp.eq.s32.totalorder %v6167_v12, %v1794_v55  ;;  %2653 = vst.msk [vmem:[%s5482_s19 + $0x60] sm:$0xff] %vm2510_vm1, %v1794_v55 }
 0x3b5   : > { %v1539_v62 = vpop.xlane.xlu0 %1538  ;;  %v1796_v32 = vsel %vm1795_vm11, %v1498_v49, 63  ;;  %v3320_v19 = vsel %vm1845_vm12, 1.0, %v3991_v39  ;;  %v1706_v49 = vcvt.f32.s32 %v5348_v59 }
 0x3b6   : > { %vm1797_vm13 = vcmp.lt.s32.totalorder %v1513_v48, 63  ;;  %v1528_v2 = vadd.s32 %v1527_v60, %v1525_v14  ;;  %v1540_v0 = vcvt.f32.s32 %v1539_v62  ;;  %vm1846_vm14 = vcmp.eq.s32.totalorder %v6167_v12, %v1796_v32  ;;  %2654 = vst.msk [vmem:[%s5482_s19 + $0x68] sm:$0xff] %vm2510_vm1, %v1796_v32 }
 0x3b7   : > { %v1798_v56 = vsel %vm1797_vm13, %v1513_v48, 63  ;;  %v1554_v7 = vpop.xlane.xlu1 %1553  ;;  %v3321_v3 = vsel %vm1846_vm14, 1.0, %v3991_v39  ;;  %2828 = vperm.xlu1 %3695, %v3990_v63   ;;  %v1721_v14 = vcvt.f32.s32 %v5353_v18  ;;  %v1736_v62 = vcvt.f32.s32 %v5358_v54 }
 0x3b8   : > { %vm1847_vm15 = vcmp.eq.s32.totalorder %v6167_v12, %v1798_v56  ;;  %2655 = vst.msk [vmem:[%s5482_s19 + $0x70] sm:$0xff] %vm2510_vm1, %v1798_v56  ;;  %vm1799_vm2 = vcmp.lt.s32.totalorder %v1528_v2, 63  ;;  %v1543_v47 = vadd.s32 %v1542_v38, %v1540_v0  ;;  %v1555_v22 = vcvt.f32.s32 %v1554_v7 }
 0x3b9   : > { %v1800_v6 = vsel %vm1799_vm2, %v1528_v2, 63  ;;  %v1569_v35 = vpop.xlane.xlu0 %1568  ;;  %v5510_v23 = vpack.c.bf16 %v3321_v3, %v3320_v19  ;;  %v3322_v46 = vsel %vm1847_vm15, 1.0, %v3991_v39 }
 0x3ba   : > { %vm1848_vm3 = vcmp.eq.s32.totalorder %v6167_v12, %v1800_v6  ;;  %2656 = vst.msk [vmem:[%s5482_s19 + $0x78] sm:$0xff] %vm2510_vm1, %v1800_v6  ;;  %vm1801_vm4 = vcmp.lt.s32.totalorder %v1543_v47, 63  ;;  %v1558_v63 = vadd.s32 %v1557_v34, %v1555_v22  ;;  %v1570_v26 = vcvt.f32.s32 %v1569_v35  ;;  %v3711_v35 = vld [vmem:[%s6034_s2 + $0x18] sm:$0xff]  }
 0x3bb   : > { %v3323_v20 = vsel %vm1848_vm3, 1.0, %v3991_v39  ;;  %v1802_v30 = vsel %vm1801_vm4, %v1543_v47, 63  ;;  %3520 = vmatprep.mubr.msk.bf16.mxu1 %vm1128_vm0, %v5510_v23  ;;  %v1584_v61 = vpop.xlane.xlu1 %1583  ;;  %v5573_v47 = vshll.u32 %v1721_v14, 16  ;;  %v5575_v22 = vshll.u32 %v1736_v62, 16 }
 0x3bc   : > { %vm1849_vm5 = vcmp.eq.s32.totalorder %v6167_v12, %v1802_v30  ;;  %2657 = vst.msk [vmem:[%s5482_s19 + $0x80] sm:$0xff] %vm2510_vm1, %v1802_v30  ;;  %vm1803_vm6 = vcmp.lt.s32.totalorder %v1558_v63, 63  ;;  %v1573_v60 = vadd.s32 %v1572_v9, %v1570_v26  ;;  %v1585_v38 = vcvt.f32.s32 %v1584_v61 }
 0x3bd   : > { %v1804_v34 = vsel %vm1803_vm6, %v1558_v63, 63  ;;  %v1599_v31 = vpop.xlane.xlu0 %1598  ;;  %v5530_v25 = vpack.c.bf16 %v3323_v20, %v3322_v46  ;;  %v3324_v57 = vsel %vm1849_vm5, 1.0, %v3991_v39  ;;  %v1751_v26 = vcvt.f32.s32 %v5363_v13 }
 0x3be   : > { %vm1850_vm7 = vcmp.eq.s32.totalorder %v6167_v12, %v1804_v34  ;;  %2658 = vst.msk [vmem:[%s5482_s19 + $0x88] sm:$0xff] %vm2510_vm1, %v1804_v34  ;;  %vm1805_vm8 = vcmp.lt.s32.totalorder %v1573_v60, 63  ;;  %v1588_v50 = vadd.s32 %v1587_v41, %v1585_v38  ;;  %v1600_v9 = vcvt.f32.s32 %v1599_v31 }
 0x3bf   : > { %v3325_v10 = vsel %vm1850_vm7, 1.0, %v3991_v39  ;;  %v1806_v55 = vsel %vm1805_vm8, %v1573_v60, 63  ;;  %3521 = vmatmul.mubr.msk.bf16.vlgmr.msra.gmra.mrb[0].mxu1 %vm1128_vm0, %v5530_v25  ;;  %v1614_v48 = vpop.xlane.xlu1 %1613  ;;  %v1766_v60 = vcvt.f32.s32 %v5368_v43  ;;  %v1301_v38 = vcvt.f32.s32 %v5378_v52 }
 0x3c0   : > { %vm1851_vm9 = vcmp.eq.s32.totalorder %v6167_v12, %v1806_v55  ;;  %2659 = vst.msk [vmem:[%s5482_s19 + $0x90] sm:$0xff] %vm2510_vm1, %v1806_v55  ;;  %vm1807_vm10 = vcmp.lt.s32.totalorder %v1588_v50, 63  ;;  %v1603_v41 = vadd.s32 %v5484_v16, %v1600_v9  ;;  %3541 = vmatpush3.bf16.msra.mxu1 %v5373_v44  ;;  %v1615_v59 = vcvt.f32.s32 %v1614_v48 }
 0x3c1   : > { %v1808_v32 = vsel %vm1807_vm10, %v1588_v50, 63  ;;  %v1629_v2 = vpop.xlane.xlu0 %1628  ;;  %v5552_v0 = vpack.c.bf16 %v3325_v10, %v3324_v57  ;;  %3542 = vmatprep.subr.bf16.mxu1 %v3709_v27  ;;  %v5561_v16 = vshll.u32 %v1706_v49, 16  ;;  %v3326_v54 = vsel %vm1851_vm9, 1.0, %v3991_v39 }
 0x3c2   : > { %vm1852_vm11 = vcmp.eq.s32.totalorder %v6167_v12, %v1808_v32  ;;  %2660 = vst.msk [vmem:[%s5482_s19 + $0x98] sm:$0xff] %vm2510_vm1, %v1808_v32  ;;  %vm1809_vm12 = vcmp.lt.s32.totalorder %v1603_v41, 63  ;;  %v1618_v44 = vadd.s32 %v5490_v8, %v1615_v59  ;;  %v1630_v18 = vcvt.f32.s32 %v1629_v2 }
 0x3c3   : > { %v3327_v56 = vsel %vm1852_vm11, 1.0, %v3991_v39  ;;  %v1810_v7 = vsel %vm1809_vm12, %v1603_v41, 63  ;;  %3524 = vmatprep.mubr.msk.bf16.mxu1 %vm1128_vm0, %v5552_v0  ;;  %v1644_v19 = vpop.xlane.xlu1 %1643  ;;  %v1752_v9 = vshll.u32 %v1751_v26, 16  ;;  %v1767_v55 = vshll.u32 %v1766_v60, 16 }
 0x3c4   : > { %vm1853_vm13 = vcmp.eq.s32.totalorder %v6167_v12, %v1810_v7  ;;  %2661 = vst.msk [vmem:[%s5482_s19 + $0xa0] sm:$0xff] %vm2510_vm1, %v1810_v7  ;;  %vm1811_vm14 = vcmp.lt.s32.totalorder %v1618_v44, 63  ;;  %v1633_v8 = vadd.s32 %v5492_v33, %v1630_v18  ;;  %v1645_v3 = vcvt.f32.s32 %v1644_v19  ;;  %3543 = vmatpush3.bf16.msra.mxu1 %v3709_v27 }
 0x3c5   : > { %v1812_v11 = vsel %vm1811_vm14, %v1618_v44, 63  ;;  %v1659_v37 = vpop.xlane.xlu0 %1658  ;;  %v5577_v6 = vpack.c.bf16 %v3327_v56, %v3326_v54  ;;  %3544 = vmatprep.subr.bf16.mxu1 %v3710_v40  ;;  %v3328_v46 = vsel %vm1853_vm13, 1.0, %v3991_v39  ;;  %v1302_v48 = vshll.u32 %v1301_v38, 16 }
 0x3c6   : > { %vm1854_vm15 = vcmp.eq.s32.totalorder %v6167_v12, %v1812_v11  ;;  %2662 = vst.msk [vmem:[%s5482_s19 + $0xa8] sm:$0xff] %vm2510_vm1, %v1812_v11  ;;  %vm1813_vm2 = vcmp.lt.s32.totalorder %v1633_v8, 63  ;;  %v1648_v33 = vadd.s32 %v5494_v58, %v1645_v3  ;;  %v1660_v63 = vcvt.f32.s32 %v1659_v37 }
 0x3c7   : > { %v3329_v20 = vsel %vm1854_vm15, 1.0, %v3991_v39  ;;  %v1814_v30 = vsel %vm1813_vm2, %v1633_v8, 63  ;;  %3525 = vmatmul.mubr.msk.bf16.gmra.mrb[4].mxu1 %vm1128_vm0, %v5577_v6  ;;  %v1674_v61 = vpop.xlane.xlu1 %1673  ;;  %v1316_v2 = vcvt.f32.s32 %v5384_v45  ;;  %v1331_v54 = vcvt.f32.s32 %v5389_v15 }
 0x3c8   : > { %vm1855_vm3 = vcmp.eq.s32.totalorder %v6167_v12, %v1814_v30  ;;  %2663 = vst.msk [vmem:[%s5482_s19 + $0xb0] sm:$0xff] %vm2510_vm1, %v1814_v30  ;;  %vm1815_vm4 = vcmp.lt.s32.totalorder %v1648_v33, 63  ;;  %v1663_v58 = vadd.s32 %v5515_v24, %v1660_v63  ;;  %v1675_v13 = vcvt.f32.s32 %v1674_v61  ;;  %3545 = vmatpush3.bf16.msra.mxu1 %v3710_v40 }
 0x3c9   : > { %v1816_v34 = vsel %vm1815_vm4, %v1648_v33, 63  ;;  %v1689_v31 = vpop.xlane.xlu0 %1688  ;;  %v5599_v27 = vpack.c.bf16 %v3329_v20, %v3328_v46  ;;  %3546 = vmatprep.subr.bf16.mxu1 %v3711_v35  ;;  %v3330_v43 = vsel %vm1855_vm3, 1.0, %v3991_v39  ;;  %v1346_v56 = vcvt.f32.s32 %v5394_v1 }
 0x3ca   : > { %vm1856_vm5 = vcmp.eq.s32.totalorder %v6167_v12, %v1816_v34  ;;  %2664 = vst.msk [vmem:[%s5482_s19 + $0xb8] sm:$0xff] %vm2510_vm1, %v1816_v34  ;;  %vm1817_vm6 = vcmp.lt.s32.totalorder %v1663_v58, 63  ;;  %v1678_v50 = vadd.s32 %v5526_v5, %v1675_v13  ;;  %v1690_v24 = vcvt.f32.s32 %v1689_v31 }
 0x3cb   : > { %v3331_v52 = vsel %vm1856_vm5, 1.0, %v3991_v39  ;;  %v1818_v49 = vsel %vm1817_vm6, %v1663_v58, 63  ;;  %3528 = vmatprep.mubr.msk.bf16.mxu1 %vm1128_vm0, %v5599_v27  ;;  %v1704_v57 = vpop.xlane.xlu1 %1703  ;;  %v1317_v37 = vshll.u32 %v1316_v2, 16  ;;  %v1332_v63 = vshll.u32 %v1331_v54, 16 }
 0x3cc   : > { %vm1857_vm7 = vcmp.eq.s32.totalorder %v6167_v12, %v1818_v49  ;;  %2665 = vst.msk [vmem:[%s5482_s19 + $0xc0] sm:$0xff] %vm2510_vm1, %v1818_v49  ;;  %vm1819_vm8 = vcmp.lt.s32.totalorder %v1678_v50, 63  ;;  %v1693_v5 = vadd.s32 %v5528_v51, %v1690_v24  ;;  %v1705_v10 = vcvt.f32.s32 %v1704_v57  ;;  %3547 = vmatpush3.bf16.msra.mxu1 %v3711_v35 }
 0x3cd   : > { %v1820_v41 = vsel %vm1819_vm8, %v1678_v50, 63  ;;  %v1719_v59 = vpop.xlane.xlu0 %1718  ;;  %v5615_v14 = vpack.c.bf16 %v3331_v52, %v3330_v43  ;;  %v3332_v51 = vsel %vm1857_vm7, 1.0, %v3991_v39  ;;  %v1347_v26 = vshll.u32 %v1346_v56, 16 }
 0x3ce   : > { %vm1858_vm9 = vcmp.eq.s32.totalorder %v6167_v12, %v1820_v41  ;;  %2666 = vst.msk [vmem:[%s5482_s19 + $0xc8] sm:$0xff] %vm2510_vm1, %v1820_v41  ;;  %vm1821_vm10 = vcmp.lt.s32.totalorder %v1693_v5, 63  ;;  %v1708_v62 = vadd.s32 %v5561_v16, %v1705_v10  ;;  %v1720_v32 = vcvt.f32.s32 %v1719_v59 }
 0x3cf   : > { %v3333_v40 = vsel %vm1858_vm9, 1.0, %v3991_v39  ;;  %v1822_v44 = vsel %vm1821_vm10, %v1693_v5, 63  ;;  %3529 = vmatmul.mubr.msk.bf16.gmra.mrb[8].mxu1 %vm1128_vm0, %v5615_v14  ;;  %v1734_v18 = vpop.xlane.xlu1 %1733  ;;  %v1361_v13 = vcvt.f32.s32 %v5399_v42  ;;  %v1376_v42 = vcvt.f32.s32 %v5404_v17 }
 0x3d0   : > { %vm1859_vm11 = vcmp.eq.s32.totalorder %v6167_v12, %v1822_v44  ;;  %2667 = vst.msk [vmem:[%s5482_s19 + $0xd0] sm:$0xff] %vm2510_vm1, %v1822_v44  ;;  %vm1823_vm12 = vcmp.lt.s32.totalorder %v1708_v62, 63  ;;  %v1723_v16 = vadd.s32 %v5573_v47, %v1720_v32  ;;  %v1735_v45 = vcvt.f32.s32 %v1734_v18 }
 0x3d1   : > { %v1824_v7 = vsel %vm1823_vm12, %v1708_v62, 63  ;;  %v1749_v19 = vpop.xlane.xlu0 %1748  ;;  %v5634_v8 = vpack.c.bf16 %v3333_v40, %v3332_v51  ;;  %v3334_v15 = vsel %vm1859_vm11, 1.0, %v3991_v39  ;;  %v1362_v10 = vshll.u32 %v1361_v13, 16 }
 0x3d2   : > { %vm1860_vm13 = vcmp.eq.s32.totalorder %v6167_v12, %v1824_v7  ;;  %2668 = vst.msk [vmem:[%s5482_s19 + $0xd8] sm:$0xff] %vm2510_vm1, %v1824_v7  ;;  %vm1825_vm14 = vcmp.lt.s32.totalorder %v1723_v16, 63  ;;  %v1738_v3 = vadd.s32 %v5575_v22, %v1735_v45  ;;  %v1750_v11 = vcvt.f32.s32 %v1749_v19 }
 0x3d3   : > { %v3335_v1 = vsel %vm1860_vm13, 1.0, %v3991_v39  ;;  %v1826_v47 = vsel %vm1825_vm14, %v1723_v16, 63  ;;  %3532 = vmatprep.mubr.msk.bf16.mxu1 %vm1128_vm0, %v5634_v8  ;;  %v1764_v35 = vpop.xlane.xlu1 %1763  ;;  %v1377_v62 = vshll.u32 %v1376_v42, 16  ;;  %v1406_v16 = vcvt.f32.s32 %v5414_v21 }
 0x3d4   : > { %vm1861_vm15 = vcmp.eq.s32.totalorder %v6167_v12, %v1826_v47  ;;  %2669 = vst.msk [vmem:[%s5482_s19 + $0xe0] sm:$0xff] %vm2510_vm1, %v1826_v47  ;;  %vm1827_vm2 = vcmp.lt.s32.totalorder %v1738_v3, 63  ;;  %v1753_v22 = vadd.s32 %v1752_v9, %v1750_v11  ;;  %v1765_v33 = vcvt.f32.s32 %v1764_v35 }
 0x3d5   : > { %v1828_v46 = vsel %vm1827_vm2, %v1738_v3, 63  ;;  %v1299_v20 = vpop.xlane.xlu0 %1298  ;;  %v5649_v30 = vpack.c.bf16 %v3335_v1, %v3334_v15  ;;  %v3336_v60 = vsel %vm1861_vm15, 1.0, %v3991_v39  ;;  %v1391_v9 = vcvt.f32.s32 %v5409_v29 }
 0x3d6   : > { %vm1862_vm3 = vcmp.eq.s32.totalorder %v6167_v12, %v1828_v46  ;;  %2670 = vst.msk [vmem:[%s5482_s19 + $0xe8] sm:$0xff] %vm2510_vm1, %v1828_v46  ;;  %vm1829_vm4 = vcmp.lt.s32.totalorder %v1753_v22, 63  ;;  %v1768_v61 = vadd.s32 %v1767_v55, %v1765_v33  ;;  %v1300_v58 = vcvt.f32.s32 %v1299_v20 }
 0x3d7   : > { %v3337_v38 = vsel %vm1862_vm3, 1.0, %v3991_v39  ;;  %v1830_v34 = vsel %vm1829_vm4, %v1753_v22, 63  ;;  %3533 = vmatmul.mubr.msk.bf16.gmra.mrb[12].mxu1 %vm1128_vm0, %v5649_v30  ;;  %v1314_v31 = vpop.xlane.xlu1 %1313  ;;  %v1392_v32 = vshll.u32 %v1391_v9, 16  ;;  %v1421_v21 = vcvt.f32.s32 %v5419_v28 }
 0x3d8   : > { %vm1863_vm5 = vcmp.eq.s32.totalorder %v6167_v12, %v1830_v34  ;;  %2671 = vst.msk [vmem:[%s5482_s19 + $0xf0] sm:$0xff] %vm2510_vm1, %v1830_v34  ;;  %vm1831_vm6 = vcmp.lt.s32.totalorder %v1768_v61, 63  ;;  %v1303_v50 = vadd.s32 %v1302_v48, %v1300_v58  ;;  %v1315_v24 = vcvt.f32.s32 %v1314_v31 }
 0x3d9   : > { %v1832_v43 = vsel %vm1831_vm6, %v1768_v61, 63  ;;  %v1329_v52 = vpop.xlane.xlu0 %1328  ;;  %v5666_v49 = vpack.c.bf16 %v3337_v38, %v3336_v60  ;;  %v3338_v55 = vsel %vm1863_vm5, 1.0, %v3991_v39  ;;  %v1436_v11 = vcvt.f32.s32 %v5424_v53 }
 0x3da   : > { %vm1864_vm7 = vcmp.eq.s32.totalorder %v6167_v12, %v1832_v43  ;;  %2672 = vst.msk [vmem:[%s5482_s19 + $0xf8] sm:$0xff] %vm2510_vm1, %v1832_v43  ;;  %vm1769_vm8 = vcmp.lt.s32.totalorder %v1303_v50, 63  ;;  %v1318_v57 = vadd.s32 %v1317_v37, %v1315_v24  ;;  %v1330_v5 = vcvt.f32.s32 %v1329_v52 }
 0x3db   : > { %v3339_v17 = vsel %vm1864_vm7, 1.0, %v3991_v39  ;;  %v1770_v29 = vsel %vm1769_vm8, %v1303_v50, 63  ;;  %3536 = vmatprep.mubr.msk.bf16.mxu1 %vm1128_vm0, %v5666_v49  ;;  %v1344_v48 = vpop.xlane.xlu1 %1343  ;;  %v1407_v22 = vshll.u32 %v1406_v16, 16  ;;  %v1422_v20 = vshll.u32 %v1421_v21, 16 }
 0x3dc   : > { %vm1833_vm9 = vcmp.eq.s32.totalorder %v6167_v12, %v1770_v29  ;;  %2641 = vst.msk [vmem:[%s5482_s19] sm:$0xff] %vm2510_vm1, %v1770_v29  ;;  %vm1771_vm10 = vcmp.lt.s32.totalorder %v1318_v57, 63  ;;  %v1333_v41 = vadd.s32 %v1332_v63, %v1330_v5  ;;  %v1345_v59 = vcvt.f32.s32 %v1344_v48 }
 0x3dd   : > { %v1772_v2 = vsel %vm1771_vm10, %v1318_v57, 63  ;;  %v1359_v51 = vpop.xlane.xlu0 %1358  ;;  %v5680_v40 = vpack.c.bf16 %v3339_v17, %v3338_v55  ;;  %v3308_v45 = vsel %vm1833_vm9, 1.0, %v3991_v39  ;;  %v1451_v61 = vcvt.f32.s32 %v5428_v36 }
 0x3de   : > { %vm1834_vm11 = vcmp.eq.s32.totalorder %v6167_v12, %v1772_v2  ;;  %2642 = vst.msk [vmem:[%s5482_s19 + $0x8] sm:$0xff] %vm2510_vm1, %v1772_v2  ;;  %vm1773_vm12 = vcmp.lt.s32.totalorder %v1333_v41, 63  ;;  %v1348_v44 = vadd.s32 %v1347_v26, %v1345_v59  ;;  %v1360_v18 = vcvt.f32.s32 %v1359_v51 }
 0x3df   : > { %v3309_v54 = vsel %vm1834_vm11, 1.0, %v3991_v39  ;;  %v1774_v56 = vsel %vm1773_vm12, %v1333_v41, 63  ;;  %3537 = vmatmul.mubr.msk.bf16.gmra.mrb[16].mxu1 %vm1128_vm0, %v5680_v40  ;;  %v1374_v7 = vpop.xlane.xlu1 %1373  ;;  %v1437_v38 = vshll.u32 %v1436_v11, 16  ;;  %v1452_v57 = vshll.u32 %v1451_v61, 16  ;;  %v2676_v61 = vld [vmem:[%s5796_s20 + $0x18] sm:$0xff] }
 0x3e0   : > { %vm1835_vm13 = vcmp.eq.s32.totalorder %v6167_v12, %v1774_v56  ;;  %2643 = vst.msk [vmem:[%s5482_s19 + $0x10] sm:$0xff] %vm2510_vm1, %v1774_v56  ;;  %vm1775_vm14 = vcmp.lt.s32.totalorder %v1348_v44, 63  ;;  %v1363_v19 = vadd.s32 %v1362_v10, %v1360_v18  ;;  %v1375_v3 = vcvt.f32.s32 %v1374_v7 }
 0x3e1   : > { %v1776_v37 = vsel %vm1775_vm14, %v1348_v44, 63  ;;  %v1389_v15 = vpop.xlane.xlu0 %1388  ;;  %v1929_v1 = vpack.c.bf16 %v3309_v54, %v3308_v45  ;;  %v3310_v33 = vsel %vm1835_vm13, 1.0, %v3991_v39  ;;  %v1466_v5 = vcvt.f32.s32 %v5432_v4 }
 0x3e2   : > { %vm1836_vm15 = vcmp.eq.s32.totalorder %v6167_v12, %v1776_v37  ;;  %2644 = vst.msk [vmem:[%s5482_s19 + $0x18] sm:$0xff] %vm2510_vm1, %v1776_v37  ;;  %vm1777_vm2 = vcmp.lt.s32.totalorder %v1363_v19, 63  ;;  %v1378_v47 = vadd.s32 %v1377_v62, %v1375_v3  ;;  %v1390_v35 = vcvt.f32.s32 %v1389_v15 }
 0x3e3   : > { %v3311_v28 = vsel %vm1836_vm15, 1.0, %v3991_v39  ;;  %v1778_v63 = vsel %vm1777_vm2, %v1363_v19, 63  ;;  %3508 = vmatprep.mubr.msk.bf16.mxu0 %vm1128_vm0, %v1929_v1  ;;  %3548 = vmatprep.mubr.msk.bf16.mxu1 %vm1128_vm0, %v1929_v1  ;;  %v1404_v53 = vpop.xlane.xlu1 %1403 }
 0x3e4   : > { %v1930_v26 = vpack.c.bf16 %v3311_v28, %v3310_v33  ;;  %vm1837_vm3 = vcmp.eq.s32.totalorder %v6167_v12, %v1778_v63  ;;  %2645 = vst.msk [vmem:[%s5482_s19 + $0x20] sm:$0xff] %vm2510_vm1, %v1778_v63  ;;  %vm1779_vm4 = vcmp.lt.s32.totalorder %v1378_v47, 63  ;;  %v1393_v46 = vadd.s32 %v1392_v32, %v1390_v35 }
 0x3e5   : > { %v1780_v58 = vsel %vm1779_vm4, %v1378_v47, 63  ;;  %v1405_v13 = vcvt.f32.s32 %v1404_v53  ;;  %v1419_v60 = vpop.xlane.xlu0 %1418  ;;  %v3312_v31 = vsel %vm1837_vm3, 1.0, %v3991_v39  ;;  %v1467_v32 = vshll.u32 %v1466_v5, 16  ;;  %v2673_v53 = vld [vmem:[%s5796_s20] sm:$0xff] }
 0x3e6   : > { %vm1838_vm5 = vcmp.eq.s32.totalorder %v6167_v12, %v1780_v58  ;;  %2646 = vst.msk [vmem:[%s5482_s19 + $0x28] sm:$0xff] %vm2510_vm1, %v1780_v58  ;;  %vm1781_vm6 = vcmp.lt.s32.totalorder %v1393_v46, 63  ;;  %v1420_v34 = vcvt.f32.s32 %v1419_v60  ;;  %3509 = vmatmul.mubr.msk.bf16.vlgmr.msra.gmra.mrb[32].mxu0 %vm1128_vm0, %v1930_v26 }
 0x3e7   : > { %v3313_v50 = vsel %vm1838_vm5, 1.0, %v3991_v39  ;;  %v1782_v24 = vsel %vm1781_vm6, %v1393_v46, 63  ;;  %v1408_v42 = vadd.s32 %v1407_v22, %v1405_v13  ;;  %3549 = vmatmul.mubr.msk.bf16.vlgmr.msra.gmra.mrb[20].mxu1 %vm1128_vm0, %v1930_v26  ;;  %v1434_v36 = vpop.xlane.xlu1 %1433  ;;  %v2675_v22 = vld [vmem:[%s5796_s20 + $0x10] sm:$0xff] }
 0x3e8   : > { %vm1839_vm7 = vcmp.eq.s32.totalorder %v6167_v12, %v1782_v24  ;;  %2647 = vst.msk [vmem:[%s5482_s19 + $0x30] sm:$0xff] %vm2510_vm1, %v1782_v24  ;;  %v1423_v9 = vadd.s32 %v1422_v20, %v1420_v34  ;;  %v1435_v43 = vcvt.f32.s32 %v1434_v36  ;;  %v1931_v52 = vpack.c.bf16 %v3313_v50, %v3312_v31  ;;  %v2674_v34 = vld [vmem:[%s5796_s20 + $0x8] sm:$0xff] }
 0x3e9   : > { %vm1783_vm8 = vcmp.lt.s32.totalorder %v1408_v42, 63  ;;  %v1449_v10 = vpop.xlane.xlu0 %1448  ;;  %v3314_v48 = vsel %vm1839_vm7, 1.0, %v3991_v39  ;;  %v6168_v24 = vld [vmem:[#allocation14_spill] sm:$0xff] }
 0x3ea   : > { %v1784_v55 = vsel %vm1783_vm8, %v1408_v42, 63  ;;  %vm1785_vm9 = vcmp.lt.s32.totalorder %v1423_v9, 63  ;;  %v1438_v17 = vadd.s32 %v1437_v38, %v1435_v43  ;;  %v1450_v29 = vcvt.f32.s32 %v1449_v10  ;;  %3512 = vmatprep.mubr.msk.bf16.mxu0 %vm1128_vm0, %v1931_v52  ;;  %3552 = vmatprep.mubr.msk.bf16.mxu1 %vm1128_vm0, %v1931_v52  ;;  %v6170_v10 = vld [vmem:[#allocation15_spill] sm:$0xff] }
 0x3eb   : > { %vm1840_vm10 = vcmp.eq.s32.totalorder %v6167_v12, %v1784_v55  ;;  %2648 = vst.msk [vmem:[%s5482_s19 + $0x38] sm:$0xff] %vm2510_vm1, %v1784_v55  ;;  %v1786_v41 = vsel %vm1785_vm9, %v1423_v9, 63  ;;  %v1464_v4 = vpop.xlane.xlu1 %1463 }
 0x3ec   : > { %v3315_v59 = vsel %vm1840_vm10, 1.0, %v3991_v39  ;;  %vm1841_vm11 = vcmp.eq.s32.totalorder %v6167_v12, %v1786_v41  ;;  %2649 = vst.msk [vmem:[%s5482_s19 + $0x40] sm:$0xff] %vm2510_vm1, %v1786_v41  ;;  %vm1787_vm12 = vcmp.lt.s32.totalorder %v1438_v17, 63  ;;  %v1453_v62 = vadd.s32 %v1452_v57, %v1450_v29  ;;  %v6169_v57 = vld [vmem:[#allocation16_spill] sm:$0xff] }
 0x3ed   : > { %v1788_v2 = vsel %vm1787_vm12, %v1438_v17, 63  ;;  %v1465_v51 = vcvt.f32.s32 %v1464_v4  ;;  %v1932_v44 = vpack.c.bf16 %v3315_v59, %v3314_v48  ;;  %v3316_v18 = vsel %vm1841_vm11, 1.0, %v3991_v39  ;;  %v2679_v48 = vld [vmem:[%s5796_s20 + $0x30] sm:$0xff]  ;;  %v6171_v4 = vld [vmem:[#allocation17_spill] sm:$0xff] }
 0x3ee   : > { %vm1842_vm13 = vcmp.eq.s32.totalorder %v6167_v12, %v1788_v2  ;;  %2650 = vst.msk [vmem:[%s5482_s19 + $0x48] sm:$0xff] %vm2510_vm1, %v1788_v2  ;;  %vm1789_vm14 = vcmp.lt.s32.totalorder %v1453_v62, 63 }
 0x3ef   : > { %v3317_v16 = vsel %vm1842_vm13, 1.0, %v3991_v39  ;;  %v1790_v45 = vsel %vm1789_vm14, %v1453_v62, 63  ;;  %v1468_v54 = vadd.s32 %v1467_v32, %v1465_v51  ;;  %3513 = vmatmul.mubr.msk.bf16.gmra.mrb[36].mxu0 %vm1128_vm0, %v1932_v44  ;;  %3553 = vmatmul.mubr.msk.bf16.gmra.mrb[24].mxu1 %vm1128_vm0, %v1932_v44  ;;  %v2677_v44 = vld [vmem:[%s5796_s20 + $0x20] sm:$0xff] }
 0x3f0   : > { %2651 = vst.msk [vmem:[%s5482_s19 + $0x50] sm:$0xff] %vm2510_vm1, %v1790_v45  ;;  %v1933_v56 = vpack.c.bf16 %v3317_v16, %v3316_v18  ;;  %vm1843_vm15 = vcmp.eq.s32.totalorder %v6167_v12, %v1790_v45 }
 0x3f1   : > { %vm1791_vm2 = vcmp.lt.s32.totalorder %v1468_v54, 63  ;;  %v3318_v19 = vsel %vm1843_vm15, 1.0, %v3991_v39 }
 0x3f2   : > { %v1792_v7 = vsel %vm1791_vm2, %v1468_v54, 63  ;;  %3516 = vmatprep.mubr.msk.bf16.mxu0 %vm1128_vm0, %v1933_v56  ;;  %3556 = vmatprep.mubr.msk.bf16.mxu1 %vm1128_vm0, %v1933_v56  ;;  %v2680_v54 = vld [vmem:[%s5796_s20 + $0x38] sm:$0xff] }
 0x3f3   : > { %vm1844_vm3 = vcmp.eq.s32.totalorder %v6167_v12, %v1792_v7  ;;  %2652 = vst.msk [vmem:[%s5482_s19 + $0x58] sm:$0xff] %vm2510_vm1, %v1792_v7  ;;  %v2742_v12 = vpop.permute.xlu1 %2741  ;;  %s3067_s19 = scalar_lea.sflag [#allocation6], %s4143_s7 }
 0x3f4   : > { %v3319_v3 = vsel %vm1844_vm3, 1.0, %v3991_v39  ;;  %vm2834_vm5 = vcmp.eq.s32.totalorder %v2742_v12, 1 }
 0x3f5   : > { %v1934_v21 = vpack.c.bf16 %v3319_v3, %v3318_v19 }
 0x3f7   : > { %3517 = vmatmul.mubr.msk.bf16.gmra.mrb[40].mxu0 %vm1128_vm0, %v1934_v21  ;;  %3557 = vmatmul.mubr.msk.bf16.gmra.mrb[28].mxu1 %vm1128_vm0, %v1934_v21  ;;  %v2745_v39 = vpop.permute.xlu1 %2744 }
 0x3f8   : > { %3560 = vmatprep.mubr.msk.bf16.mxu1 %vm1128_vm0, %v5510_v23  ;;  %vm2835_vm1 = vcmp.eq.s32.totalorder %v2745_v39, 1  ;;  %v2678_v39 = vld [vmem:[%s5796_s20 + $0x28] sm:$0xff] }
 0x3fb   : > { %v2748_v23 = vpop.permute.xlu1 %2747 }
 0x3fc   : > { %vm2836_vm4 = vcmp.eq.s32.totalorder %v2748_v23, 1 }
 0x3ff   : > { %3561 = vmatmul.mubr.msk.bf16.gmra.mrb[0].mxu1 %vm1128_vm0, %v5530_v25  ;;  %v5770_v25 = vpop.permute.xlu1 %2750 }
 0x400   : > { %3564 = vmatprep.mubr.msk.bf16.mxu1 %vm1128_vm0, %v5552_v0  ;;  %vm2837_vm6 = vcmp.eq.s32.totalorder %v5770_v25, 1 }
 0x403   : > { %v5772_v0 = vpop.permute.xlu1 %2753 }
 0x404   : > { %vm2838_vm8 = vcmp.eq.s32.totalorder %v5772_v0, 1 }
 0x407   : > { %3565 = vmatmul.mubr.msk.bf16.gmra.mrb[4].mxu1 %vm1128_vm0, %v5577_v6  ;;  %v5774_v6 = vpop.permute.xlu1 %2756 }
 0x408   : > { %3568 = vmatprep.mubr.msk.bf16.mxu1 %vm1128_vm0, %v5599_v27  ;;  %v2739_v27 = vpop.permute.xlu0 %2738  ;;  %vm2839_vm7 = vcmp.eq.s32.totalorder %v5774_v6, 1 }
 0x40f   : > { %3569 = vmatmul.mubr.msk.bf16.gmra.mrb[8].mxu1 %vm1128_vm0, %v5615_v14  ;;  %v5776_v14 = vpop.permute.xlu1 %2759 }
 0x410   : > { %3572 = vmatprep.mubr.msk.bf16.mxu1 %vm1128_vm0, %v5634_v8  ;;  %v5778_v8 = vpop.permute.xlu0 %2765  ;;  %vm2840_vm9 = vcmp.eq.s32.totalorder %v5776_v14, 1  ;;  %v6173_v14 = vld [vmem:[#allocation20_spill] sm:$0xff] }
 0x411   : > { %vm2842_vm12 = vcmp.eq.s32.totalorder %v5778_v8, 1 }
 0x417   : > { %3573 = vmatmul.mubr.msk.bf16.gmra.mrb[12].mxu1 %vm1128_vm0, %v5649_v30  ;;  %v5780_v30 = vpop.permute.xlu1 %2762 }
 0x418   : > { %3576 = vmatprep.mubr.msk.bf16.mxu1 %vm1128_vm0, %v5666_v49  ;;  %v5782_v49 = vpop.permute.xlu0 %2771  ;;  %vm2841_vm10 = vcmp.eq.s32.totalorder %v5780_v30, 1 }
 0x419   : > { %vm2844_vm13 = vcmp.eq.s32.totalorder %v5782_v49, 1  ;;  %v6177_v49 = vld [vmem:[#allocation24_spill] sm:$0xff] }
 0x41c   : > { %v5786_v11 = vpop.permute.xlu0 %2777 }
 0x41d   : > { %vm2846_vm2 = vcmp.eq.s32.totalorder %v5786_v11, 1 }
 0x41f   : > { %3577 = vmatmul.mubr.msk.bf16.gmra.mrb[16].mxu1 %vm1128_vm0, %v5680_v40  ;;  %v5784_v40 = vpop.permute.xlu1 %2768  ;;  %vm2833_vm0 = vcmp.eq.s32.totalorder %v2739_v27, 1 }
 0x420   : > { %v5790_v15 = vpop.permute.xlu0 %2783  ;;  %vm2843_vm11 = vcmp.eq.s32.totalorder %v5784_v40, 1 }
 0x421   : > { %vm2848_vm3 = vcmp.eq.s32.totalorder %v5790_v15, 1  ;;  %v6181_v15 = vld [vmem:[#allocation27_spill] sm:$0xff] }
 0x423   : > { %v5788_v37 = vpop.permute.xlu1 %2774 }
 0x424   : > { %v5809_v52 = vpop.permute.xlu0 %2789  ;;  %vm2845_vm14 = vcmp.eq.s32.totalorder %v5788_v37, 1 }
 0x427   : > { %v5792_v1 = vpop.permute.xlu1 %2780 }
 0x428   : > { %v5831_v0 = vpop.permute.xlu0 %2795  ;;  %vm2847_vm15 = vcmp.eq.s32.totalorder %v5792_v1, 1 }
 0x42b   : > { %v5807_v43 = vpop.permute.xlu1 %2786 }
 0x4b9   : > { %v3510_v47 = vpop.f32.mrb[32].mxu0 }
 0x4ba   : > { %v3550_v35 = vpop.f32.mrb[20].mxu1  ;;  %v2067_v33 = vpop.f32.mrb[33].mxu0 }
 0x4bb   : > { %v2261_v28 = vadd.f32 %v3550_v35, %v3510_v47  ;;  %v2252_v63 = vpop.f32.mrb[21].mxu1  ;;  %v3511_v26 = vpop.f32.mrb[34].mxu0  ;;  %v6172_v35 = vld [vmem:[#allocation18_spill] sm:$0xff] }
 0x4bc   : > { %v2253_v46 = vadd.f32 %v2252_v63, %v2067_v33  ;;  %v3551_v20 = vpop.f32.mrb[22].mxu1  ;;  %v2070_v58 = vpop.f32.mrb[35].mxu0 }
 0x4bd   : > { %v2867_v13 = vsel %vm2835_vm1, %v2261_v28, %v2675_v22  ;;  %v2264_v60 = vadd.f32 %v3551_v20, %v3511_v26  ;;  %v2255_v38 = vpop.f32.mrb[23].mxu1  ;;  %v5829_v63 = vpop.permute.xlu1 %2792 }
 0x4be   : > { %2899 = vst [vmem:[%s5796_s20 + $0x10] sm:$0xff] %v2867_v13  ;;  %v2865_v31 = vsel %vm2833_vm0, %v2253_v46, %v2673_v53  ;;  %v2256_v50 = vadd.f32 %v2255_v38, %v2070_v58  ;;  %v2966_v5 = vsub.f32 %v2867_v13, %v6169_v57  ;;  %v6174_v46 = vld [vmem:[#allocation19_spill] sm:$0xff]  ;;  %v6175_v38 = vld [vmem:[#allocation21_spill] sm:$0xff]  ;;  %vm2849_vm0 = vcmp.eq.s32.totalorder %v5807_v43, 1 }
 0x4bf   : > { %2897 = vst [vmem:[%s5796_s20] sm:$0xff] %v2865_v31  ;;  %v2964_v42 = vsub.f32 %v2865_v31, %v6168_v24  ;;  %v2868_v36 = vsel %vm2836_vm4, %v2264_v60, %v2676_v61  ;;  %v2683_v13 = vld [vmem:[%s5796_s20 + $0x50] sm:$0xff]  ;;  %vm2851_vm1 = vcmp.eq.s32.totalorder %v5829_v63, 1  ;;  %vm2850_vm4 = vcmp.eq.s32.totalorder %v5809_v52, 1 }
 0x4c0   : > { %2900 = vst [vmem:[%s5796_s20 + $0x18] sm:$0xff] %v2868_v36  ;;  %v2866_v9 = vsel %vm2834_vm5, %v2256_v50, %v2674_v34  ;;  %v2967_v59 = vsub.f32 %v2868_v36, %v6171_v4  ;;  %v2998_v56 = vmul.f32 %v2966_v5, %v2966_v5  ;;  %v2681_v36 = vld [vmem:[%s5796_s20 + $0x40] sm:$0xff]  ;;  %vm2852_vm5 = vcmp.eq.s32.totalorder %v5831_v0, 1 }
 0x4c1   : > { %2898 = vst [vmem:[%s5796_s20 + $0x8] sm:$0xff] %v2866_v9  ;;  %v2965_v55 = vsub.f32 %v2866_v9, %v6170_v10  ;;  %v2996_v41 = vmul.f32 %v2964_v42, %v2964_v42  ;;  %v2684_v10 = vld [vmem:[%s5796_s20 + $0x58] sm:$0xff]  ;;  %v5852_v8 = vpop.permute.xlu1 %2798 }
 0x4c2   : > { %v3514_v17 = vpop.f32.mrb[36].mxu0  ;;  %v3554_v29 = vpop.f32.mrb[24].mxu1  ;;  %v2999_v27 = vmul.f32 %v2967_v59, %v2967_v59  ;;  %v2682_v59 = vld [vmem:[%s5796_s20 + $0x48] sm:$0xff] }
 0x4c3   : > { %v2997_v62 = vmul.f32 %v2965_v55, %v2965_v55  ;;  %v2277_v32 = vadd.f32 %v3554_v29, %v3514_v17  ;;  %v2083_v2 = vpop.f32.mrb[37].mxu0  ;;  %v2268_v51 = vpop.f32.mrb[25].mxu1 }
 0x4c4   : > { %v2269_v18 = vadd.f32 %v2268_v51, %v2083_v2  ;;  %v3515_v16 = vpop.f32.mrb[38].mxu0  ;;  %v3555_v45 = vpop.f32.mrb[26].mxu1  ;;  %v6176_v51 = vld [vmem:[#allocation22_spill] sm:$0xff] }
 0x4c5   : > { %v3028_v7 = vadd.f32 %v2997_v62, %v2996_v41  ;;  %v2871_v19 = vsel %vm2839_vm7, %v2277_v32, %v2679_v48  ;;  %v2280_v3 = vadd.f32 %v3555_v45, %v3515_v16  ;;  %v2086_v21 = vpop.f32.mrb[39].mxu0  ;;  %v2271_v12 = vpop.f32.mrb[27].mxu1  ;;  %v2687_v45 = vld [vmem:[%s5796_s20 + $0x70] sm:$0xff] }
 0x4c6   : > { %2903 = vst [vmem:[%s5796_s20 + $0x30] sm:$0xff] %v2871_v19  ;;  %v2869_v23 = vsel %vm2837_vm6, %v2269_v18, %v2677_v44  ;;  %v2272_v6 = vadd.f32 %v2271_v12, %v2086_v21  ;;  %v2970_v53 = vsub.f32 %v2871_v19, %v6173_v14  ;;  %v2688_v12 = vld [vmem:[%s5796_s20 + $0x78] sm:$0xff]  ;;  %vm2853_vm6 = vcmp.eq.s32.totalorder %v5852_v8, 1 }
 0x4c7   : > { %v3029_v47 = vadd.f32 %v3028_v7, %v2998_v56  ;;  %2901 = vst [vmem:[%s5796_s20 + $0x20] sm:$0xff] %v2869_v23  ;;  %v2968_v22 = vsub.f32 %v2869_v23, %v6172_v35  ;;  %v2872_v33 = vsel %vm2840_vm9, %v2280_v3, %v2680_v54  ;;  %v6178_v7 = vld [vmem:[#allocation23_spill] sm:$0xff]  ;;  %v2685_v3 = vld [vmem:[%s5796_s20 + $0x60] sm:$0xff] }
 0x4c8   : > { %2904 = vst [vmem:[%s5796_s20 + $0x38] sm:$0xff] %v2872_v33  ;;  %v2870_v28 = vsel %vm2838_vm8, %v2272_v6, %v2678_v39  ;;  %v2971_v34 = vsub.f32 %v2872_v33, %v6175_v38  ;;  %v3002_v55 = vmul.f32 %v2970_v53, %v2970_v53  ;;  %v5861_v39 = vpop.permute.xlu0 %2801  ;;  %v6179_v6 = vld [vmem:[#allocation25_spill] sm:$0xff]  ;;  %v6180_v53 = vld [vmem:[#allocation26_spill] sm:$0xff] }
 0x4c9   : > { %v3000_v26 = vmul.f32 %v2968_v22, %v2968_v22  ;;  %v3030_v25 = vadd.f32 %v3029_v47, %v2999_v27  ;;  %2902 = vst [vmem:[%s5796_s20 + $0x28] sm:$0xff] %v2870_v28  ;;  %v2969_v20 = vsub.f32 %v2870_v28, %v6174_v46  ;;  %v2686_v33 = vld [vmem:[%s5796_s20 + $0x68] sm:$0xff]  ;;  %vm2854_vm8 = vcmp.eq.s32.totalorder %v5861_v39, 1  ;;  %v6189_v39 = vld [vmem:[#allocation35_spill] sm:$0xff] }
 0x4ca   : > { %v3518_v61 = vpop.f32.mrb[40].mxu0  ;;  %v3558_v58 = vpop.f32.mrb[28].mxu1  ;;  %v3003_v32 = vmul.f32 %v2971_v34, %v2971_v34  ;;  %v6182_v34 = vld [vmem:[#allocation28_spill] sm:$0xff] }
 0x4cb   : > { %v3031_v60 = vadd.f32 %v3030_v25, %v3000_v26  ;;  %v3001_v31 = vmul.f32 %v2969_v20, %v2969_v20  ;;  %v2293_v50 = vadd.f32 %v3558_v58, %v3518_v61  ;;  %v2099_v24 = vpop.f32.mrb[41].mxu0  ;;  %v2284_v42 = vpop.f32.mrb[29].mxu1 }
 0x4cc   : > { %v2285_v9 = vadd.f32 %v2284_v42, %v2099_v24  ;;  %v3519_v57 = vpop.f32.mrb[42].mxu0  ;;  %v3559_v5 = vpop.f32.mrb[30].mxu1  ;;  %v2689_v42 = vld [vmem:[%s5796_s20 + $0x80] sm:$0xff] }
 0x4cd   : > { %v3032_v17 = vadd.f32 %v3031_v60, %v3001_v31  ;;  %v2875_v29 = vsel %vm2843_vm11, %v2293_v50, %v2683_v13  ;;  %v2296_v48 = vadd.f32 %v3559_v5, %v3519_v57  ;;  %v2102_v41 = vpop.f32.mrb[43].mxu0  ;;  %v2287_v4 = vpop.f32.mrb[31].mxu1  ;;  %v2691_v60 = vld [vmem:[%s5796_s20 + $0x90] sm:$0xff]  ;;  %v6183_v5 = vld [vmem:[#allocation29_spill] sm:$0xff] }
 0x4ce   : > { %2907 = vst [vmem:[%s5796_s20 + $0x50] sm:$0xff] %v2875_v29  ;;  %v2873_v40 = vsel %vm2841_vm10, %v2285_v9, %v2681_v36  ;;  %v2288_v62 = vadd.f32 %v2287_v4, %v2102_v41  ;;  %v2974_v54 = vsub.f32 %v2875_v29, %v6177_v49  ;;  %v2805_v61 = vpop.permute.xlu1 %2804  ;;  %v2808_v38 = vpop.permute.xlu0 %2807  ;;  %v2692_v9 = vld [vmem:[%s5796_s20 + $0x98] sm:$0xff] }
 0x4cf   : > { %v3033_v2 = vadd.f32 %v3032_v17, %v3002_v55  ;;  %2905 = vst [vmem:[%s5796_s20 + $0x40] sm:$0xff] %v2873_v40  ;;  %v2972_v44 = vsub.f32 %v2873_v40, %v6176_v51  ;;  %v2876_v18 = vsel %vm2844_vm13, %v2296_v48, %v2684_v10  ;;  %v2690_v48 = vld [vmem:[%s5796_s20 + $0x88] sm:$0xff]  ;;  %v6186_v49 = vld [vmem:[#allocation32_spill] sm:$0xff]  ;;  %vm2855_vm7 = vcmp.eq.s32.totalorder %v2805_v61, 1 }
 0x4d0   : > { %2908 = vst [vmem:[%s5796_s20 + $0x58] sm:$0xff] %v2876_v18  ;;  %v2874_v16 = vsel %vm2842_vm12, %v2288_v62, %v2682_v59  ;;  %v2975_v27 = vsub.f32 %v2876_v18, %v6179_v6  ;;  %v3006_v28 = vmul.f32 %v2974_v54, %v2974_v54  ;;  %v6184_v40 = vld [vmem:[#allocation30_spill] sm:$0xff]  ;;  %v6185_v18 = vld [vmem:[#allocation31_spill] sm:$0xff]  ;;  %vm2856_vm9 = vcmp.eq.s32.totalorder %v2808_v38, 1 }
 0x4d1   : > { %v3004_v56 = vmul.f32 %v2972_v44, %v2972_v44  ;;  %v3034_v30 = vadd.f32 %v3033_v2, %v3003_v32  ;;  %2906 = vst [vmem:[%s5796_s20 + $0x48] sm:$0xff] %v2874_v16  ;;  %v2973_v19 = vsub.f32 %v2874_v16, %v6178_v7  ;;  %v2693_v7 = vld [vmem:[%s5796_s20 + $0xa0] sm:$0xff] }
 0x4d2   : > { %v3562_v21 = vpop.f32.mrb[0].mxu1  ;;  %v3007_v11 = vmul.f32 %v2975_v27, %v2975_v27  ;;  %v5884_v41 = vpop.permute.xlu1 %2810 }
 0x4d3   : > { %v3035_v23 = vadd.f32 %v3034_v30, %v3004_v56  ;;  %v3005_v47 = vmul.f32 %v2973_v19, %v2973_v19  ;;  %v2879_v35 = vsel %vm2847_vm15, %v3562_v21, %v2687_v45  ;;  %v2300_v22 = vpop.f32.mrb[1].mxu1  ;;  %v5889_v51 = vpop.permute.xlu0 %2813  ;;  %v2695_v45 = vld [vmem:[%s5796_s20 + $0xb0] sm:$0xff]  ;;  %vm2857_vm11 = vcmp.eq.s32.totalorder %v5884_v41, 1 }
 0x4d4   : > { %2911 = vst [vmem:[%s5796_s20 + $0x70] sm:$0xff] %v2879_v35  ;;  %v2877_v37 = vsel %vm2845_vm14, %v2300_v22, %v2685_v3  ;;  %v3563_v1 = vpop.f32.mrb[2].mxu1  ;;  %v2978_v31 = vsub.f32 %v2879_v35, %v6182_v34  ;;  %v2696_v3 = vld [vmem:[%s5796_s20 + $0xb8] sm:$0xff]  ;;  %v2694_v22 = vld [vmem:[%s5796_s20 + $0xa8] sm:$0xff]  ;;  %vm2858_vm13 = vcmp.eq.s32.totalorder %v5889_v51, 1 }
 0x4d5   : > { %v3036_v14 = vadd.f32 %v3035_v23, %v3005_v47  ;;  %2909 = vst [vmem:[%s5796_s20 + $0x60] sm:$0xff] %v2877_v37  ;;  %v2976_v26 = vsub.f32 %v2877_v37, %v6180_v53  ;;  %v2880_v25 = vsel %vm2848_vm3, %v3563_v1, %v2688_v12  ;;  %v2303_v46 = vpop.f32.mrb[3].mxu1  ;;  %v6187_v23 = vld [vmem:[#allocation33_spill] sm:$0xff] }
 0x4d6   : > { %2912 = vst [vmem:[%s5796_s20 + $0x78] sm:$0xff] %v2880_v25  ;;  %v2878_v20 = vsel %vm2846_vm2, %v2303_v46, %v2686_v33  ;;  %v2979_v10 = vsub.f32 %v2880_v25, %v6183_v5  ;;  %v3010_v4 = vmul.f32 %v2978_v31, %v2978_v31  ;;  %v2817_v21 = vpop.permute.xlu1 %2816  ;;  %v2700_v31 = vld [vmem:[%s5796_s20 + $0xd8] sm:$0xff] }
 0x4d7   : > { %v3037_v58 = vadd.f32 %v3036_v14, %v3006_v28  ;;  %2910 = vst [vmem:[%s5796_s20 + $0x68] sm:$0xff] %v2878_v20  ;;  %v2977_v13 = vsub.f32 %v2878_v20, %v6181_v15  ;;  %v3008_v50 = vmul.f32 %v2976_v26, %v2976_v26  ;;  %v2820_v37 = vpop.permute.xlu0 %2819  ;;  %v6188_v14 = vld [vmem:[#allocation34_spill] sm:$0xff]  ;;  %vm2859_vm10 = vcmp.eq.s32.totalorder %v2817_v21, 1 }
 0x4d8   : > { %v3011_v0 = vmul.f32 %v2979_v10, %v2979_v10  ;;  %vm2860_vm12 = vcmp.eq.s32.totalorder %v2820_v37, 1 }
 0x4d9   : > { %v3038_v24 = vadd.f32 %v3037_v58, %v3007_v11  ;;  %v3009_v55 = vmul.f32 %v2977_v13, %v2977_v13  ;;  %v2699_v58 = vld [vmem:[%s5796_s20 + $0xd0] sm:$0xff] }
 0x4da   : > { %v3566_v36 = vpop.f32.mrb[4].mxu1  ;;  %v2823_v15 = vpop.permute.xlu1 %2822 }
 0x4db   : > { %v3039_v57 = vadd.f32 %v3038_v24, %v3008_v50  ;;  %v2883_v17 = vsel %vm2851_vm1, %v3566_v36, %v2691_v60  ;;  %v2316_v29 = vpop.f32.mrb[5].mxu1  ;;  %v2697_v60 = vld [vmem:[%s5796_s20 + $0xc0] sm:$0xff]  ;;  %v2826_v50 = vpop.permute.xlu0 %2825  ;;  %v2698_v36 = vld [vmem:[%s5796_s20 + $0xc8] sm:$0xff]  ;;  %vm2861_vm15 = vcmp.eq.s32.totalorder %v2823_v15, 1 }
 0x4dc   : > { %2915 = vst [vmem:[%s5796_s20 + $0x90] sm:$0xff] %v2883_v17  ;;  %v2881_v43 = vsel %vm2849_vm0, %v2316_v29, %v2689_v42  ;;  %v3567_v63 = vpop.f32.mrb[6].mxu1  ;;  %v2982_v54 = vsub.f32 %v2883_v17, %v6186_v49  ;;  %v6190_v17 = vld [vmem:[#allocation36_spill] sm:$0xff]  ;;  %vm2862_vm3 = vcmp.eq.s32.totalorder %v2826_v50, 1 }
 0x4dd   : > { %v3040_v59 = vadd.f32 %v3039_v57, %v3009_v55  ;;  %2913 = vst [vmem:[%s5796_s20 + $0x80] sm:$0xff] %v2881_v43  ;;  %v2980_v62 = vsub.f32 %v2881_v43, %v6184_v40  ;;  %v2884_v32 = vsel %vm2852_vm5, %v3567_v63, %v2692_v9  ;;  %v2319_v2 = vpop.f32.mrb[7].mxu1  ;;  %v6191_v40 = vld [vmem:[#allocation37_spill] sm:$0xff] }
 0x4de   : > { %2916 = vst [vmem:[%s5796_s20 + $0x98] sm:$0xff] %v2884_v32  ;;  %v2882_v52 = vsel %vm2850_vm4, %v2319_v2, %v2690_v48  ;;  %v2983_v6 = vsub.f32 %v2884_v32, %v6187_v23  ;;  %v3014_v1 = vmul.f32 %v2982_v54, %v2982_v54  ;;  %v2703_v2 = vld [vmem:[%s5796_s20 + $0xf0] sm:$0xff] }
 0x4df   : > { %v3041_v44 = vadd.f32 %v3040_v59, %v3010_v4  ;;  %2914 = vst [vmem:[%s5796_s20 + $0x88] sm:$0xff] %v2882_v52  ;;  %v2981_v16 = vsub.f32 %v2882_v52, %v6185_v18  ;;  %v3012_v56 = vmul.f32 %v2980_v62, %v2980_v62  ;;  %v2829_v59 = vpop.permute.xlu1 %2828  ;;  %v2832_v52 = vpop.permute.xlu0 %2831 }
 0x4e0   : > { %v3015_v20 = vmul.f32 %v2983_v6, %v2983_v6  ;;  %vm2863_vm14 = vcmp.eq.s32.totalorder %v2829_v59, 1  ;;  %vm2864_vm2 = vcmp.eq.s32.totalorder %v2832_v52, 1 }
 0x4e1   : > { %v3042_v30 = vadd.f32 %v3041_v44, %v3011_v0  ;;  %v3013_v27 = vmul.f32 %v2981_v16, %v2981_v16  ;;  %v2701_v0 = vld [vmem:[%s5796_s20 + $0xe0] sm:$0xff]  ;;  %v2704_v44 = vld [vmem:[%s5796_s20 + $0xf8] sm:$0xff] }
 0x4e2   : > { %v3570_v19 = vpop.f32.mrb[8].mxu1 }
 0x4e3   : > { %v3043_v12 = vadd.f32 %v3042_v30, %v3012_v56  ;;  %v2887_v47 = vsel %vm2855_vm7, %v3570_v19, %v2695_v45  ;;  %v2332_v35 = vpop.f32.mrb[9].mxu1  ;;  %v2702_v45 = vld [vmem:[%s5796_s20 + $0xe8] sm:$0xff] }
 0x4e4   : > { %2919 = vst [vmem:[%s5796_s20 + $0xb0] sm:$0xff] %v2887_v47  ;;  %v2885_v8 = vsel %vm2853_vm6, %v2332_v35, %v2693_v7  ;;  %v3571_v33 = vpop.f32.mrb[10].mxu1  ;;  %v6193_v35 = vld [vmem:[#allocation39_spill] sm:$0xff] }
 0x4e5   : > { %v3044_v28 = vadd.f32 %v3043_v12, %v3013_v27  ;;  %2917 = vst [vmem:[%s5796_s20 + $0xa0] sm:$0xff] %v2885_v8  ;;  %v2984_v53 = vsub.f32 %v2885_v8, %v6188_v14  ;;  %v2888_v26 = vsel %vm2856_vm9, %v3571_v33, %v2696_v3  ;;  %v2335_v25 = vpop.f32.mrb[11].mxu1  ;;  %v6192_v12 = vld [vmem:[#allocation38_spill] sm:$0xff]  ;;  %v6194_v8 = vld [vmem:[#allocation40_spill] sm:$0xff] }
 0x4e6   : > { %2920 = vst [vmem:[%s5796_s20 + $0xb8] sm:$0xff] %v2888_v26  ;;  %v2886_v46 = vsel %vm2854_vm8, %v2335_v25, %v2694_v22 }
 0x4e7   : > { %2918 = vst [vmem:[%s5796_s20 + $0xa8] sm:$0xff] %v2886_v46  ;;  %v2985_v61 = vsub.f32 %v2886_v46, %v6189_v39  ;;  %v3045_v11 = vadd.f32 %v3044_v28, %v3014_v1  ;;  %v3016_v13 = vmul.f32 %v2984_v53, %v2984_v53 }
 0x4e9   : > { %v3046_v38 = vadd.f32 %v3045_v11, %v3015_v20  ;;  %v3017_v57 = vmul.f32 %v2985_v61, %v2985_v61 }
 0x4ea   : > { %v3574_v34 = vpop.f32.mrb[12].mxu1 }
 0x4eb   : > { %v2891_v24 = vsel %vm2859_vm10, %v3574_v34, %v2699_v58  ;;  %v2348_v42 = vpop.f32.mrb[13].mxu1  ;;  %v2954_v9 = vld [vmem:[%s5796_s20 + $0xb0] sm:$0xff]  ;;  %v3047_v5 = vadd.f32 %v3046_v38, %v3016_v13 }
 0x4ec   : > { %2923 = vst [vmem:[%s5796_s20 + $0xd0] sm:$0xff] %v2891_v24  ;;  %v2889_v10 = vsel %vm2857_vm11, %v2348_v42, %v2697_v60  ;;  %v3575_v55 = vpop.f32.mrb[14].mxu1  ;;  %v2986_v29 = vsub.f32 %v2954_v9, %v6190_v17 }
 0x4ed   : > { %2921 = vst [vmem:[%s5796_s20 + $0xc0] sm:$0xff] %v2889_v10  ;;  %v2892_v48 = vsel %vm2860_vm12, %v3575_v55, %v2700_v31  ;;  %v2351_v43 = vpop.f32.mrb[15].mxu1  ;;  %v2955_v63 = vld [vmem:[%s5796_s20 + $0xb8] sm:$0xff]  ;;  %v3048_v41 = vadd.f32 %v3047_v5, %v3017_v57 }
 0x4ee   : > { %2924 = vst [vmem:[%s5796_s20 + $0xd8] sm:$0xff] %v2892_v48  ;;  %v2890_v4 = vsel %vm2858_vm13, %v2351_v43, %v2698_v36  ;;  %v2987_v62 = vsub.f32 %v2955_v63, %v6191_v40  ;;  %v3018_v32 = vmul.f32 %v2986_v29, %v2986_v29 }
 0x4ef   : > { %2922 = vst [vmem:[%s5796_s20 + $0xc8] sm:$0xff] %v2890_v4 }
 0x4f0   : > { %v3019_v49 = vmul.f32 %v2987_v62, %v2987_v62  ;;  %v3049_v54 = vadd.f32 %v3048_v41, %v3018_v32 }
 0x4f2   : > { %v3578_v51 = vpop.f32.mrb[16].mxu1  ;;  %v3050_v1 = vadd.f32 %v3049_v54, %v3019_v49 }
 0x4f3   : > { %v2895_v18 = vsel %vm2863_vm14, %v3578_v51, %v2703_v2  ;;  %v2364_v16 = vpop.f32.mrb[17].mxu1  ;;  %v2958_v19 = vld [vmem:[%s5796_s20 + $0xd0] sm:$0xff] }
 0x4f4   : > { %2927 = vst [vmem:[%s5796_s20 + $0xf0] sm:$0xff] %v2895_v18  ;;  %v2893_v56 = vsel %vm2861_vm15, %v2364_v16, %v2701_v0  ;;  %v3579_v30 = vpop.f32.mrb[18].mxu1  ;;  %v2956_v7 = vld [vmem:[%s5796_s20 + $0xc0] sm:$0xff]  ;;  %v2990_v33 = vsub.f32 %v2958_v19, %v6194_v8 }
 0x4f5   : > { %2925 = vst [vmem:[%s5796_s20 + $0xe0] sm:$0xff] %v2893_v56  ;;  %v2896_v3 = vsel %vm2864_vm2, %v3579_v30, %v2704_v44  ;;  %v2367_v21 = vpop.f32.mrb[19].mxu1  ;;  %v2988_v23 = vsub.f32 %v2956_v7, %v6192_v12  ;;  %v2959_v47 = vld [vmem:[%s5796_s20 + $0xd8] sm:$0xff] }
 0x4f6   : > { %2928 = vst [vmem:[%s5796_s20 + $0xf8] sm:$0xff] %v2896_v3  ;;  %v2894_v6 = vsel %vm2862_vm3, %v2367_v21, %v2702_v45  ;;  %v2957_v27 = vld [vmem:[%s5796_s20 + $0xc8] sm:$0xff] }
 0x4f7   : > { %2926 = vst [vmem:[%s5796_s20 + $0xe8] sm:$0xff] %v2894_v6  ;;  %v2989_v22 = vsub.f32 %v2957_v27, %v6193_v35  ;;  %v3020_v37 = vmul.f32 %v2988_v23, %v2988_v23 }
 0x4f8   : > { %3883 = shalt.err (!%p3880_p4)
}
 0x4f9   : > { %s3884_s9 = scalar_lea.hbm %s5931_s17, 4096  ;;  %s3888_s28 = scalar_lea.hbm %s6036_s4, 8192 }
 0x4fa   : > { %p3885_p7 = scmp.ne.s32.totalorder %s5931_s17, %s3884_s9  ;;  %p3889_p1 = scmp.lt.u32.totalorder %s5931_s17, %s6036_s4 }
 0x4fb   : > { %p3890_p3 = scmp.lt.u32.totalorder %s3888_s28, %s3884_s9  ;;  %p3892_p9 = scmp.lt.u32.totalorder %s3884_s9, %s5931_s17 }
 0x4fc   : > { %p3886_p10 = pnand %p3885_p7, %p6195_p11 }
 0x4fd   : > { %p3891_p8 = por %p3890_p3, %p3889_p1 }
 0x4fe   : > { %p3887_p12 = pneg %p3886_p10 }
 0x4ff   : > { %p3893_p0 = por %p3892_p9, %p3891_p8 }
 0x501   : > { %p3894_p6 = pnand %p3893_p0, %p3887_p12 }
 0x503   : > { %3897 = shalt.err (!%p3894_p6)
}
 0x504   : > { %s3993_s8 = smov 128   ;;  %s3994_s14 = smov 8   ;;  %v6196_v28 = vld [vmem:[#allocation41_spill] sm:$0xff]  ;;  %v3021_v53 = vmul.f32 %v2989_v22, %v2989_v22  ;;  %v3051_v26 = vadd.f32 %v3050_v1, %v3020_v37  ;;  %v3022_v25 = vmul.f32 %v2990_v33, %v2990_v33  ;;  %v2962_v39 = vld [vmem:[%s5796_s20 + $0xf0] sm:$0xff]  ;;  %v2963_v60 = vld [vmem:[%s5796_s20 + $0xf8] sm:$0xff] }
 0x505   : > { %3622 = dma.vmem_to_hbm [thread:$0]  (%p6195_p11), %s5933_s27, 4096, %s5931_s17, %s3067_s19, %s3993_s8, %s3993_s8, %s3994_s14   ;;  %v2991_v14 = vsub.f32 %v2959_v47, %v6196_v28  ;;  %v6197_v61 = vld [vmem:[#allocation42_spill] sm:$0xff]  ;;  %v6198_v38 = vld [vmem:[#allocation43_spill] sm:$0xff]  ;;  %v6199_v31 = vld [vmem:[#allocation44_spill] sm:$0xff] }
 0x506   : > { %v3052_v46 = vadd.f32 %v3051_v26, %v3021_v53  ;;  %v2960_v20 = vld [vmem:[%s5796_s20 + $0xe0] sm:$0xff]  ;;  %v2961_v13 = vld [vmem:[%s5796_s20 + $0xe8] sm:$0xff]  ;;  %v2994_v50 = vsub.f32 %v2962_v39, %v6199_v31  ;;  %s3383_s20 = sshll.u32 %s3976_s24, 4  ;;  %s343_s27 = scalar_lea.vmem [#allocation8], %s4143_s7 }
 0x507   : > { %v2992_v11 = vsub.f32 %v2960_v20, %v6197_v61  ;;  %v3023_v58 = vmul.f32 %v2991_v14, %v2991_v14  ;;  %v2993_v34 = vsub.f32 %v2961_v13, %v6198_v38  ;;  %v6200_v36 = vld [vmem:[#allocation13_spill] sm:$0xff]  ;;  %s3109_s17 = sshll.u32 %s343_s27, 4  ;;  %s5983_s9 = scalar_lea.hbm %s6038_s6, %s3383_s20  ;;  %s5985_s17 = int_to_ptr.vmem [resolvable:$true] %s3109_s17 }
 0x508   : > { %v3053_v15 = vadd.f32 %v3052_v46, %v3022_v25  ;;  %v2995_v9 = vsub.f32 %v2963_v60, %v6200_v36  ;;  %v3026_v10 = vmul.f32 %v2994_v50, %v2994_v50  ;;  %s3077_s18 = scalar_lea.sflag [#allocation9], %s4143_s7  ;;  %s3898_s15 = scalar_lea.vmem %s5985_s17, 16 }
 0x509   : > { %v3024_v24 = vmul.f32 %v2992_v11, %v2992_v11  ;;  %v3025_v57 = vmul.f32 %v2993_v34, %v2993_v34  ;;  %p3899_p13 = scmp.ne.s32.totalorder %s5985_s17, %s3898_s15  ;;  %s3995_s24 = smov [#allocation8]  }
 0x50a   : > { %v3054_v42 = vadd.f32 %v3053_v15, %v3023_v58  ;;  %v3027_v17 = vmul.f32 %v2995_v9, %v2995_v9  ;;  %s3902_s28 = sshll.u32 %s3995_s24, 4  ;;  %s3903_s28 = int_to_ptr.vmem [resolvable:$false] %s3902_s28 }
 0x50b   : > { %p3900_p2 = pnand %p3899_p13, %p6195_p11  ;;  %s3904_s13 = scalar_lea.vmem %s3903_s28, 32 }
 0x50c   : > { %v3055_v5 = vadd.f32 %v3054_v42, %v3024_v24  ;;  %p3905_p4 = scmp.lt.s32.totalorder %s5985_s17, %s3903_s28  ;;  %p3906_p7 = scmp.lt.s32.totalorder %s3904_s13, %s3898_s15 }
 0x50d   : > { %p3901_p5 = pneg %p3900_p2 }
 0x50e   : > { %v3056_v55 = vadd.f32 %v3055_v5, %v3025_v57  ;;  %p3907_p10 = por %p3906_p7, %p3905_p4 }
 0x510   : > { %v3057_v29 = vadd.f32 %v3056_v55, %v3026_v10  ;;  %p3908_p12 = pnand %p3907_p10, %p3901_p5 }
 0x512   : > { %v3058_v48 = vadd.f32 %v3057_v29, %v3027_v17 }
 0x514   : > { %v3059_v43 = vrot.slane %v3058_v48, 4 }
 0x516   : > { %v3060_v63 = vadd.f32 %v3059_v43, %v3058_v48 }
 0x518   : > { %v3061_v41 = vrot.slane %v3060_v63, 2 }
 0x51a   : > { %v3062_v4 = vadd.f32 %v3061_v41, %v3060_v63 }
 0x51c   : > { %v3063_v59 = vrot.slane %v3062_v4, 1 }
 0x51e   : > { %v3064_v40 = vadd.f32 %v3063_v59, %v3062_v4 }
 0x520   : > { %3065 = vst [vmem:[%s343_s27] sm:$0x1] %v3064_v40 }
 0x521   : > { %3911 = shalt.err (!%p3908_p12)
}
 0x522   : > { %s3912_s7 = scalar_lea.hbm %s5983_s9, 16  ;;  %s3916_s14 = scalar_lea.hbm %s6038_s6, 32 }
 0x523   : > { %p3913_p1 = scmp.ne.s32.totalorder %s5983_s9, %s3912_s7  ;;  %p3917_p9 = scmp.lt.u32.totalorder %s5983_s9, %s6038_s6 }
 0x524   : > { %p3918_p0 = scmp.lt.u32.totalorder %s3916_s14, %s3912_s7  ;;  %p3920_p13 = scmp.lt.u32.totalorder %s3912_s7, %s5983_s9 }
 0x525   : > { %p3914_p3 = pnand %p3913_p1, %p6195_p11 }
 0x526   : > { %p3919_p6 = por %p3918_p0, %p3917_p9 }
 0x527   : > { %p3915_p8 = pneg %p3914_p3 }
 0x528   : > { %p3921_p2 = por %p3920_p13, %p3919_p6 }
 0x52a   : > { %p3922_p5 = pnand %p3921_p2, %p3915_p8 }
 0x52c   : > { %3925 = shalt.err (!%p3922_p5)
}
 0x52d   : > { %3623 = dma.vmem_to_hbm [thread:$0]  (%p6195_p11), %s5985_s17, 16, %s5983_s9, %s3077_s18  }
 0x52e PF: > { %s3121_s19 = sand.u32 1, %s3964_s21   ;;  %p6201_p4 = scmp.ne.s32.totalorder %s6088_s12, 0 }
 0x52f   : > { %p6202_p7 = scmp.ge.s32.totalorder %s3984_s26, 2  ;;  %s3122_s16 = scalar_lea.sflag [#allocation6], %s3121_s19 }
 0x531   : > { %p3631_p10 = pnand %p6202_p7, %p6201_p4 }
 0x533   : > { %3955 = dma.done.wait (!%p3631_p10), %s3122_s16, 4096  }
 0x534   : > { %3957 = vsyncadd (!%p3631_p10), %s3122_s16, 4294963200  ;;  %s3139_s15 = scalar_lea.sflag [#allocation9], %s3121_s19 }
 0x535   : > { %3959 = dma.done.wait (!%p3631_p10), %s3139_s15, 16  }
 0x536   : > { %3961 = vsyncadd (!%p3631_p10), %s3139_s15, 4294967280  ;;  %s26_s26 = sadd.s32 1, %s3984_s26   ;;  %s6203_s21 = smov %s3968_s22 }
 0x537   : > { %p23_p12 = scmp.ge.s32.totalorder %s26_s26, 4   ;;  %s6204_s22 = smov %s3972_s23 }
 0x538   : > { %s6205_s23 = smov %s4087_s11  ;;  %s6206_s24 = smov %s3980_s25 }
 0x539   : > { %s6207_s25 = smov %s6209_s29  ;;  %25 = sbr.rel (!%p23_p12) target bundleno = 8 (0x8), region = 127 }
 0x540   :  { %3143 = vsyncpa [#allocation5], 1 }
 0x541   :  { %3145 = vsyncpa [#allocation5 + $0x1], 1 }
 0x542   :  { %3146 = vsyncpa [#allocation6], 1 }
 0x543   :  { %3148 = vsyncpa [#allocation6 + $0x1], 1 }
 0x544   :  { %3149 = vsyncpa [#allocation9], 1 }
 0x545   :  { %3151 = vsyncpa [#allocation9 + $0x1], 1 }

</bundles_post_ra>
